<compile_context>
chip_gen: v7x
topology: tpu7x:2x2x1
jax: 0.10.0
libtpu: 0.0.40
codegen_flags: <defaults>
</compile_context>

<pallas_src>
import functools

import jax
import jax.numpy as jnp
from jax.experimental import pallas as pl
from jax.experimental.pallas import tpu as pltpu

_BN_EPS = 1e-5
_LANES = 128      # lane width; channel axes zero-padded to this.  (v6e/v7x
                  # MXUs are 2x256^2 -> pad to 256 when real channels > 128.)
_ROW_TILE = 256   # pixel rows per grid step for the 1x1 stages; production
                  # should use >=512 on v6e (128 MiB VMEM), smaller on v7x.


# ----------------------------------------------------------------------------
# In-kernel helpers: approx reciprocal keeps the divide on the EUP slot.
# ----------------------------------------------------------------------------
def _sigmoid(x):
    return pl.reciprocal(1.0 + jnp.exp(-x), approx=True)


def _silu(x):
    return x * _sigmoid(x)


# ----------------------------------------------------------------------------
# Pass 1: expand 1x1 conv (bf16 MXU, f32 acc) + partial BN1 statistics.
# ----------------------------------------------------------------------------
def _expand_kernel(x_ref, w_ref, h_ref, stats_ref):
    h = jnp.dot(x_ref[...].astype(jnp.bfloat16), w_ref[...],
                preferred_element_type=jnp.float32)
    h_ref[...] = h
    s = jnp.sum(h, axis=0, keepdims=True)
    ss = jnp.sum(h * h, axis=0, keepdims=True)
    stats_ref[...] = jnp.concatenate([s, ss], axis=0)[None]


# ----------------------------------------------------------------------------
# Pass 2: BN1 affine + SiLU, depthwise 3x3 (stride=1, pad=1), partial BN2 stats.
# ----------------------------------------------------------------------------
def _depthwise_kernel(h_ref, a1_ref, b1_ref, wdwm_ref, d_ref, stats_ref, hbuf,
                      *, chunk_rows):
    _, H, W, Ep = h_ref.shape
    n_chunks = H // chunk_rows
    a1 = a1_ref[...]
    b1 = b1_ref[...]

    # Zero halo rows so H-direction taps are pure addressing into the scratch.
    hbuf[0] = jnp.zeros((W, Ep), jnp.float32)
    hbuf[H + 1] = jnp.zeros((W, Ep), jnp.float32)

    @pl.loop(0, n_chunks)
    def _fill(c):
        r = pl.multiple_of(c * chunk_rows, chunk_rows)
        blk = h_ref[0, pl.ds(r, chunk_rows)]
        hbuf[pl.ds(r + 1, chunk_rows)] = _silu(blk * a1 + b1)

    # W-edge zeroing is pre-folded into the (9, W, Ep) tap weights; W shifts
    # are XLU sublane rolls; H shifts are pl.ds reads from the padded scratch.
    # fori_loop bounds live ranges to one row chunk (no full-image temporaries).
    # TODO(synk): stride > 1 not implemented (reference test uses stride=1).
    def body(c, carry):
        s_acc, ss_acc = carry
        r = pl.multiple_of(c * chunk_rows, chunk_rows)
        acc = jnp.zeros((chunk_rows, W, Ep), jnp.float32)
        for ki in range(3):
            rows = hbuf[pl.ds(r + ki, chunk_rows)]                 # (CR, W, Ep)
            acc = acc + wdwm_ref[3 * ki + 0] * pltpu.roll(rows, 1, axis=1)
            acc = acc + wdwm_ref[3 * ki + 1] * rows
            acc = acc + wdwm_ref[3 * ki + 2] * pltpu.roll(rows, W - 1, axis=1)
        d_ref[0, pl.ds(r, chunk_rows)] = acc
        flat = acc.reshape(chunk_rows * W, Ep)
        s_acc = s_acc + jnp.sum(flat, axis=0, keepdims=True)
        ss_acc = ss_acc + jnp.sum(flat * flat, axis=0, keepdims=True)
        return s_acc, ss_acc

    zero = jnp.zeros((1, Ep), jnp.float32)
    s_fin, ss_fin = jax.lax.fori_loop(0, n_chunks, body, (zero, zero))
    stats_ref[...] = jnp.concatenate([s_fin, ss_fin], axis=0)[None]


# ----------------------------------------------------------------------------
# Pass 3: squeeze-and-excitation gate (BN2+SiLU, global pool, FC/SiLU/FC/sig).
# ----------------------------------------------------------------------------
def _se_gate_kernel(d_ref, a2_ref, b2_ref, w1_ref, w2_ref, gate_ref):
    HW = d_ref.shape[1]
    d = _silu(d_ref[0] * a2_ref[...] + b2_ref[...])                # (HW, Ep)
    pooled = jnp.sum(d, axis=0, keepdims=True) * (1.0 / HW)        # (1, Ep)
    p8 = jnp.broadcast_to(pooled, (8, pooled.shape[1]))            # sublane-full M
    g = jnp.dot(p8.astype(jnp.bfloat16), w1_ref[...],
                preferred_element_type=jnp.float32)
    g = _silu(g)
    g = jnp.dot(g.astype(jnp.bfloat16), w2_ref[...],
                preferred_element_type=jnp.float32)
    gate_ref[...] = _sigmoid(g[0:1])[None]


# ----------------------------------------------------------------------------
# Pass 4: BN2+SiLU, gate multiply, pointwise 1x1 (bf16 MXU) + partial BN3 stats.
# ----------------------------------------------------------------------------
def _pointwise_kernel(d_ref, gate_ref, a2_ref, b2_ref, w_ref, p_ref, stats_ref):
    d = _silu(d_ref[0] * a2_ref[...] + b2_ref[...])                # (T, Ep)
    s = d * gate_ref[0]                                            # (T, Ep)
    p = jnp.dot(s.astype(jnp.bfloat16), w_ref[...],
                preferred_element_type=jnp.float32)
    p_ref[0] = p
    su = jnp.sum(p, axis=0, keepdims=True)
    ss = jnp.sum(p * p, axis=0, keepdims=True)
    stats_ref[...] = jnp.concatenate([su, ss], axis=0)[None, None]


# ----------------------------------------------------------------------------
# Pass 5: BN3 affine + SiLU, residual add, store in the caller's dtype.
# ----------------------------------------------------------------------------
def _finalize_kernel(p_ref, a3_ref, b3_ref, *rest, skip):
    if skip:
        x_ref, o_ref = rest
    else:
        (o_ref,) = rest
    y = p_ref[...] * a3_ref[...] + b3_ref[...]
    y = _silu(y)
    if skip:
        y = y + x_ref[...].astype(jnp.float32)
    o_ref[...] = y.astype(o_ref.dtype)


# ----------------------------------------------------------------------------
# Wrapper glue.
# ----------------------------------------------------------------------------
def _round_up(n, m):
    return ((n + m - 1) // m) * m


def _pad_to(a, shape):
    pads = [(0, t - s) for s, t in zip(a.shape, shape)]
    return jnp.pad(a, pads) if any(p[1] for p in pads) else a


def _pick_tile(n, target):
    """Largest multiple of 8 that divides n and is <= target (fallback: n)."""
    best = None
    t = 8
    while t <= min(n, target):
        if n % t == 0:
            best = t
        t += 8
    return best if best is not None else n


def _pick_chunk(h):
    for c in (8, 4, 2, 1):
        if h % c == 0:
            return c
    return 1


def _vmem_limit_bytes():
    # Size to the chip: ~48 MiB on v7x (64 MiB physical), up to 96 MiB on
    # v5e/v6e (128 MiB physical).
    try:
        cap = int(pltpu.get_tpu_info().vmem_capacity_bytes)
    except Exception:
        cap = 64 * 1024 * 1024
    return min(cap * 3 // 4, 96 * 1024 * 1024)


def _bn_affine(partial_stats, gamma, beta, n):
    """Fold train-mode BatchNorm (biased batch stats) into y * a + b."""
    c = partial_stats.shape[-1]
    tot = jnp.sum(partial_stats.reshape(-1, 2, c), axis=0)
    mu = tot[0] / n
    var = jnp.maximum(tot[1] / n - mu * mu, 0.0)
    a = gamma.reshape(-1) * jax.lax.rsqrt(var + _BN_EPS)
    b = beta.reshape(-1) - mu * a
    return a.reshape(1, c), b.reshape(1, c)


def mbconv_forward(x, params, *, stride=1, expansion=6):
    assert stride == 1, "only stride=1 implemented"
    B, H, W, Cin = x.shape
    E = Cin * expansion
    Cout = params["w_pw"].shape[1]
    skip = (stride == 1) and (Cin == Cout)

    Cp, Ep, Sp, Cop = (_round_up(c, _LANES) for c in (Cin, E, E // 4, Cout))
    N = B * H * W
    HW = H * W
    TM = _pick_tile(N, _ROW_TILE)
    THW = _pick_tile(HW, _ROW_TILE)
    CR = _pick_chunk(H)
    vmem = _vmem_limit_bytes()

    def cparams(*sem):
        return pltpu.CompilerParams(dimension_semantics=sem,
                                    vmem_limit_bytes=vmem)

    # Lane-dense zero padding of every channel axis (padded lanes provably stay
    # zero through every stage); MXU operands in bf16 (f32 accumulation
    # in-kernel); x stays in its native dtype in HBM.
    x_p = _pad_to(x, (B, H, W, Cp))
    w_exp = _pad_to(params["w_exp"], (Cp, Ep)).astype(jnp.bfloat16)
    se_w1 = _pad_to(params["se_w1"], (Ep, Sp)).astype(jnp.bfloat16)
    se_w2 = _pad_to(params["se_w2"], (Sp, Ep)).astype(jnp.bfloat16)
    w_pw = _pad_to(params["w_pw"], (Ep, Cop)).astype(jnp.bfloat16)
    g1 = _pad_to(params["g1"], (1, Ep));  be1 = _pad_to(params["b1"], (1, Ep))
    g2 = _pad_to(params["g2"], (1, Ep));  be2 = _pad_to(params["b2"], (1, Ep))
    g3 = _pad_to(params["g3"], (1, Cop)); be3 = _pad_to(params["b3"], (1, Cop))

    # Depthwise tap weights with the W-edge masks pre-folded in: entry
    # (3*ki + kj, j, c) = w_dw[3*ki + kj, c], zeroed where column j would read
    # outside the image for that kj (replaces iota/compare/where in-kernel).
    w_dw = _pad_to(params["w_dw"], (9, Ep)).astype(jnp.float32)
    col = jnp.arange(W, dtype=jnp.int32).reshape(1, W, 1)
    kj_mask = jnp.concatenate(
        [(col > 0), jnp.ones_like(col, dtype=jnp.bool_), (col < W - 1)],
        axis=0).astype(jnp.float32)                                 # (3, W, 1)
    w_dw_m = w_dw.reshape(9, 1, Ep) * jnp.tile(kj_mask, (3, 1, 1))  # (9, W, Ep)

    x_flat = x_p.reshape(N, Cp)

    # ---- pass 1: expand 1x1 (row tiles, 'parallel' -> megacore on v7x) -----
    nt = N // TM
    h_raw, st1 = pl.pallas_call(
        _expand_kernel,
        out_shape=(jax.ShapeDtypeStruct((N, Ep), jnp.float32),
                   jax.ShapeDtypeStruct((nt, 2, Ep), jnp.float32)),
        grid=(nt,),
        in_specs=[pl.BlockSpec((TM, Cp), lambda i: (i, 0)),
                  pl.BlockSpec((Cp, Ep), lambda i: (0, 0))],
        out_specs=(pl.BlockSpec((TM, Ep), lambda i: (i, 0)),
                   pl.BlockSpec((1, 2, Ep), lambda i: (i, 0, 0))),
        compiler_params=cparams("parallel"),
    )(x_flat, w_exp)
    a1, b1 = _bn_affine(st1, g1, be1, N)

    # ---- pass 2: BN1+SiLU + depthwise 3x3 (per image, 'parallel') ----------
    h4 = h_raw.reshape(B, H, W, Ep)
    d_raw, st2 = pl.pallas_call(
        functools.partial(_depthwise_kernel, chunk_rows=CR),
        out_shape=(jax.ShapeDtypeStruct((B, H, W, Ep), jnp.float32),
                   jax.ShapeDtypeStruct((B, 2, Ep), jnp.float32)),
        grid=(B,),
        in_specs=[pl.BlockSpec((1, H, W, Ep), lambda b: (b, 0, 0, 0)),
                  pl.BlockSpec((1, Ep), lambda b: (0, 0)),
                  pl.BlockSpec((1, Ep), lambda b: (0, 0)),
                  pl.BlockSpec((9, W, Ep), lambda b: (0, 0, 0))],
        out_specs=(pl.BlockSpec((1, H, W, Ep), lambda b: (b, 0, 0, 0)),
                   pl.BlockSpec((1, 2, Ep), lambda b: (b, 0, 0))),
        scratch_shapes=[pltpu.VMEM((H + 2, W, Ep), jnp.float32)],
        compiler_params=cparams("parallel"),
    )(h4, a1, b1, w_dw_m)
    a2, b2 = _bn_affine(st2, g2, be2, N)

    # ---- pass 3: squeeze-and-excitation gate (per image, 'parallel') -------
    d3 = d_raw.reshape(B, HW, Ep)
    gate = pl.pallas_call(
        _se_gate_kernel,
        out_shape=jax.ShapeDtypeStruct((B, 1, Ep), jnp.float32),
        grid=(B,),
        in_specs=[pl.BlockSpec((1, HW, Ep), lambda b: (b, 0, 0)),
                  pl.BlockSpec((1, Ep), lambda b: (0, 0)),
                  pl.BlockSpec((1, Ep), lambda b: (0, 0)),
                  pl.BlockSpec((Ep, Sp), lambda b: (0, 0)),
                  pl.BlockSpec((Sp, Ep), lambda b: (0, 0))],
        out_specs=pl.BlockSpec((1, 1, Ep), lambda b: (b, 0, 0)),
        compiler_params=cparams("parallel"),
    )(d3, a2, b2, se_w1, se_w2)

    # ---- pass 4: gate * BN2+SiLU(d), pointwise 1x1 (image x row tiles) -----
    nhw = HW // THW
    p_raw, st3 = pl.pallas_call(
        _pointwise_kernel,
        out_shape=(jax.ShapeDtypeStruct((B, HW, Cop), jnp.float32),
                   jax.ShapeDtypeStruct((B, nhw, 2, Cop), jnp.float32)),
        grid=(B, nhw),
        in_specs=[pl.BlockSpec((1, THW, Ep), lambda b, i: (b, i, 0)),
                  pl.BlockSpec((1, 1, Ep), lambda b, i: (b, 0, 0)),
                  pl.BlockSpec((1, Ep), lambda b, i: (0, 0)),
                  pl.BlockSpec((1, Ep), lambda b, i: (0, 0)),
                  pl.BlockSpec((Ep, Cop), lambda b, i: (0, 0))],
        out_specs=(pl.BlockSpec((1, THW, Cop), lambda b, i: (b, i, 0)),
                   pl.BlockSpec((1, 1, 2, Cop), lambda b, i: (b, i, 0, 0))),
        compiler_params=cparams("parallel", "parallel"),
    )(d3, gate, a2, b2, w_pw)
    a3, b3 = _bn_affine(st3, g3, be3, N)

    # ---- pass 5: BN3+SiLU + residual, native-dtype store (row tiles) -------
    p_flat = p_raw.reshape(N, Cop)
    ins = [p_flat, a3, b3]
    in_specs = [pl.BlockSpec((TM, Cop), lambda i: (i, 0)),
                pl.BlockSpec((1, Cop), lambda i: (0, 0)),
                pl.BlockSpec((1, Cop), lambda i: (0, 0))]
    if skip:
        ins.append(x_flat)                          # Cin == Cout  =>  Cp == Cop
        in_specs.append(pl.BlockSpec((TM, Cp), lambda i: (i, 0)))
    out = pl.pallas_call(
        functools.partial(_finalize_kernel, skip=skip),
        out_shape=jax.ShapeDtypeStruct((N, Cop), x.dtype),
        grid=(nt,),
        in_specs=in_specs,
        out_specs=pl.BlockSpec((TM, Cop), lambda i: (i, 0)),
        compiler_params=cparams("parallel"),
    )(*ins)

    return out.reshape(B, H, W, Cop)[..., :Cout]


# ----------------------------------------------------------------------------
# Deterministic parameters + pure-JAX reference (train-mode BN) for validation.
# ----------------------------------------------------------------------------
def init_params(key, cin, cout, expansion=6):
    E = cin * expansion
    ks = jax.random.split(key, 5)

    def bn_params(c, i):
        gamma = (1.0 + 0.01 * jnp.arange(c, dtype=jnp.float32) + 0.1 * i).reshape(1, c)
        beta = (0.02 * jnp.arange(c, dtype=jnp.float32) - 0.05 * i).reshape(1, c)
        return gamma, beta

    g1, b1 = bn_params(E, 1)
    g2, b2 = bn_params(E, 2)
    g3, b3 = bn_params(cout, 3)
    return dict(
        w_exp=0.3 * jax.random.normal(ks[0], (cin, E), jnp.float32),     # Conv2d(E,Cin,1,1).T
        w_dw=0.3 * jax.random.normal(ks[1], (9, E), jnp.float32),        # Conv2d(E,1,3,3) taps
        se_w1=0.3 * jax.random.normal(ks[2], (E, E // 4), jnp.float32),  # Linear(E, E//4).T
        se_w2=0.3 * jax.random.normal(ks[3], (E // 4, E), jnp.float32),  # Linear(E//4, E).T
        w_pw=0.3 * jax.random.normal(ks[4], (E, cout), jnp.float32),     # Conv2d(Cout,E,1,1).T
        g1=g1, b1=b1, g2=g2, b2=b2, g3=g3, b3=b3,
    )


def mbconv_reference(x, params, *, expansion=6):
    B, H, W, Cin = x.shape
    Cout = params["w_pw"].shape[1]

    def sigmoid(v):
        return 1.0 / (1.0 + jnp.exp(-v))

    def silu(v):
        return v * sigmoid(v)

    def bn_silu(y, g, b):
        mu = jnp.mean(y, axis=(0, 1, 2))
        var = jnp.mean((y - mu) ** 2, axis=(0, 1, 2))
        z = (y - mu) * jax.lax.rsqrt(var + _BN_EPS) * g.reshape(-1) + b.reshape(-1)
        return silu(z)

    h = jnp.einsum("bhwc,ce->bhwe", x, params["w_exp"])
    h = bn_silu(h, params["g1"], params["b1"])

    hp = jnp.pad(h, ((0, 0), (1, 1), (1, 1), (0, 0)))
    d = jnp.zeros_like(h)
    for ki in range(3):
        for kj in range(3):
            d = d + params["w_dw"][3 * ki + kj] * hp[:, ki:ki + H, kj:kj + W, :]
    d = bn_silu(d, params["g2"], params["b2"])

    pooled = jnp.mean(d, axis=(1, 2))
    g = pooled @ params["se_w1"]
    g = silu(g)
    g = g @ params["se_w2"]
    gate = sigmoid(g)
    s = d * gate[:, None, None, :]

    p = jnp.einsum("bhwe,eo->bhwo", s, params["w_pw"])
    p = bn_silu(p, params["g3"], params["b3"])
    if Cin == Cout:
        p = p + x
    return p


if __name__ == "__main__":
    key = jax.random.PRNGKey(0)
    kx, kp = jax.random.split(key)

    B, H, W, Cin, Cout, expansion = 2, 16, 16, 4, 4, 6
    # NHWC input; the equivalent PyTorch NCHW shape would be (2, 4, 16, 16).
    x = jax.random.normal(kx, (B, H, W, Cin), jnp.float32)
    params = init_params(kp, Cin, Cout, expansion=expansion)

    fwd = jax.jit(functools.partial(mbconv_forward, stride=1, expansion=expansion))
    out = jax.block_until_ready(fwd(x, params))
    assert out.shape == (B, H, W, Cout)
    assert bool(jnp.all(jnp.isfinite(out)))

    ref = mbconv_reference(x, params, expansion=expansion)
    err = float(jnp.max(jnp.abs(out - ref)))
    assert err < 2e-1, f"kernel/reference mismatch: max abs err {err}"
    print("KERNEL_OK")
</pallas_src>

<mosaic_0001>
module attributes {stable_mosaic.version = 11 : i64} {
  func.func @_expand_kernel(%arg0: i32, %arg1: memref<256x128xf32, #tpu.memory_space<vmem>>, %arg2: memref<128x128xbf16, #tpu.memory_space<vmem>>, %arg3: memref<256x128xf32, #tpu.memory_space<vmem>>, %arg4: memref<1x2x128xf32, #tpu.memory_space<vmem>>) attributes {dimension_semantics = [#tpu.dimension_semantics<parallel>], iteration_bounds = array<i64: 2>, scalar_prefetch = 0 : i64, scratch_operands = 0 : i64, tpu.core_type = #tpu.core_type<tc>, window_params = [{transform_indices = @transform_0, window_bounds = array<i64: 256, 128>}, {pipeline_mode = #tpu.pipeline_mode<synchronous>, transform_indices = @transform_1, window_bounds = array<i64: 128, 128>}, {transform_indices = @transform_2, window_bounds = array<i64: 256, 128>}, {transform_indices = @transform_3, window_bounds = array<i64: 1, 2, 128>}]} {
    %c0 = arith.constant 0 : index
    %c0_0 = arith.constant 0 : index
    %0 = vector.load %arg1[%c0, %c0_0] : memref<256x128xf32, #tpu.memory_space<vmem>>, vector<256x128xf32>
    %1 = arith.truncf %0 : vector<256x128xf32> to vector<256x128xbf16>
    %c0_1 = arith.constant 0 : index
    %c0_2 = arith.constant 0 : index
    %2 = vector.load %arg2[%c0_1, %c0_2] : memref<128x128xbf16, #tpu.memory_space<vmem>>, vector<128x128xbf16>
    %cst = arith.constant dense<0.000000e+00> : vector<256x128xf32>
    %3 = tpu.matmul %1, %2, %cst {dimension_numbers = #tpu.dot_dimension_numbers<[1], [0], [0], [1], [0, 0, 1, 1], [], []>} : vector<256x128xbf16>, vector<128x128xbf16>, vector<256x128xf32> -> vector<256x128xf32>
    %c0_3 = arith.constant 0 : index
    %c0_4 = arith.constant 0 : index
    %4 = vector.load %arg3[%c0_3, %c0_4] : memref<256x128xf32, #tpu.memory_space<vmem>>, vector<256x128xf32>
    tpu.vector_store %arg3[%c0_3, %c0_4], %3 {strides = array<i32>} : memref<256x128xf32, #tpu.memory_space<vmem>>, vector<256x128xf32>,
    %cst_5 = arith.constant dense<0.000000e+00> : vector<128xf32>
    %5 = vector.multi_reduction <add>, %3, %cst_5 [0] : vector<256x128xf32> to vector<128xf32>
    %6 = vector.shape_cast %5 : vector<128xf32> to vector<1x128xf32>
    %7 = arith.mulf %3, %3 : vector<256x128xf32>
    %cst_6 = arith.constant dense<0.000000e+00> : vector<128xf32>
    %8 = vector.multi_reduction <add>, %7, %cst_6 [0] : vector<256x128xf32> to vector<128xf32>
    %9 = vector.shape_cast %8 : vector<128xf32> to vector<1x128xf32>
    %10 = tpu.concatenate %6, %9 in 0 : vector<1x128xf32>, vector<1x128xf32> -> vector<2x128xf32>
    %11 = vector.shape_cast %10 : vector<2x128xf32> to vector<1x2x128xf32>
    %c0_7 = arith.constant 0 : index
    %c0_8 = arith.constant 0 : index
    %c0_9 = arith.constant 0 : index
    %12 = vector.load %arg4[%c0_7, %c0_8, %c0_9] : memref<1x2x128xf32, #tpu.memory_space<vmem>>, vector<1x2x128xf32>
    tpu.vector_store %arg4[%c0_7, %c0_8, %c0_9], %11 {strides = array<i32>} : memref<1x2x128xf32, #tpu.memory_space<vmem>>, vector<1x2x128xf32>,
    return
  }
  func.func @transform_0(%arg0: i32) -> (i32, i32) {
    %c0_i32 = arith.constant 0 : i32
    %c0_i32_0 = arith.constant 0 : i32
    return %arg0, %c0_i32 : i32, i32
  }
  func.func @transform_1(%arg0: i32) -> (i32, i32) {
    %c0_i32 = arith.constant 0 : i32
    %c0_i32_0 = arith.constant 0 : i32
    %c0_i32_1 = arith.constant 0 : i32
    return %c0_i32, %c0_i32_0 : i32, i32
  }
  func.func @transform_2(%arg0: i32) -> (i32, i32) {
    %c0_i32 = arith.constant 0 : i32
    %c0_i32_0 = arith.constant 0 : i32
    return %arg0, %c0_i32 : i32, i32
  }
  func.func @transform_3(%arg0: i32) -> (i32, i32, i32) {
    %c0_i32 = arith.constant 0 : i32
    %c0_i32_0 = arith.constant 0 : i32
    %c0_i32_1 = arith.constant 0 : i32
    return %arg0, %c0_i32, %c0_i32_0 : i32, i32, i32
  }
}

module attributes {stable_mosaic.version = 11 : i64} {
  func.func @_depthwise_kernel(%arg0: i32, %arg1: memref<1x16x16x128xf32, #tpu.memory_space<vmem>>, %arg2: memref<1x128xf32, #tpu.memory_space<vmem>>, %arg3: memref<1x128xf32, #tpu.memory_space<vmem>>, %arg4: memref<9x16x128xf32, #tpu.memory_space<vmem>>, %arg5: memref<1x16x16x128xf32, #tpu.memory_space<vmem>>, %arg6: memref<1x2x128xf32, #tpu.memory_space<vmem>>, %arg7: memref<18x16x128xf32, #tpu.memory_space<vmem>>) attributes {dimension_semantics = [#tpu.dimension_semantics<parallel>], iteration_bounds = array<i64: 2>, scalar_prefetch = 0 : i64, scratch_operands = 1 : i64, tpu.core_type = #tpu.core_type<tc>, window_params = [{transform_indices = @transform_0, window_bounds = array<i64: 1, 16, 16, 128>}, {pipeline_mode = #tpu.pipeline_mode<synchronous>, transform_indices = @transform_1, window_bounds = array<i64: 1, 128>}, {pipeline_mode = #tpu.pipeline_mode<synchronous>, transform_indices = @transform_2, window_bounds = array<i64: 1, 128>}, {pipeline_mode = #tpu.pipeline_mode<synchronous>, transform_indices = @transform_3, window_bounds = array<i64: 9, 16, 128>}, {transform_indices = @transform_4, window_bounds = array<i64: 1, 16, 16, 128>}, {transform_indices = @transform_5, window_bounds = array<i64: 1, 2, 128>}]} {
    %c0 = arith.constant 0 : index
    %c0_0 = arith.constant 0 : index
    %0 = vector.load %arg2[%c0, %c0_0] : memref<1x128xf32, #tpu.memory_space<vmem>>, vector<1x128xf32>
    %c0_1 = arith.constant 0 : index
    %c0_2 = arith.constant 0 : index
    %1 = vector.load %arg3[%c0_1, %c0_2] : memref<1x128xf32, #tpu.memory_space<vmem>>, vector<1x128xf32>
    %cst = arith.constant 0.000000e+00 : f32
    %2 = vector.broadcast %cst : f32 to vector<16x128xf32>
    %c0_3 = arith.constant 0 : index
    %c0_4 = arith.constant 0 : index
    %c0_5 = arith.constant 0 : index
    %3 = vector.load %arg7[%c0_3, %c0_4, %c0_5] : memref<18x16x128xf32, #tpu.memory_space<vmem>>, vector<1x16x128xf32>
    %4 = vector.shape_cast %3 : vector<1x16x128xf32> to vector<16x128xf32>
    %5 = vector.shape_cast %2 : vector<16x128xf32> to vector<1x16x128xf32>
    tpu.vector_store %arg7[%c0_3, %c0_4, %c0_5], %5 {strides = array<i32>} : memref<18x16x128xf32, #tpu.memory_space<vmem>>, vector<1x16x128xf32>,
    %cst_6 = arith.constant 0.000000e+00 : f32
    %6 = vector.broadcast %cst_6 : f32 to vector<16x128xf32>
    %c17 = arith.constant 17 : index
    %c0_7 = arith.constant 0 : index
    %c0_8 = arith.constant 0 : index
    %7 = vector.load %arg7[%c17, %c0_7, %c0_8] : memref<18x16x128xf32, #tpu.memory_space<vmem>>, vector<1x16x128xf32>
    %8 = vector.shape_cast %7 : vector<1x16x128xf32> to vector<16x128xf32>
    %9 = vector.shape_cast %6 : vector<16x128xf32> to vector<1x16x128xf32>
    tpu.vector_store %arg7[%c17, %c0_7, %c0_8], %9 {strides = array<i32>} : memref<18x16x128xf32, #tpu.memory_space<vmem>>, vector<1x16x128xf32>,
    %c0_i32 = arith.constant 0 : i32
    %c2_i32 = arith.constant 2 : i32
    %10 = arith.addi %c0_i32, %c2_i32 : i32
    %c1_i32 = arith.constant 1 : i32
    scf.for %arg8 = %c0_i32 to %10 step %c1_i32  : i32 {
      %c1_i32_18 = arith.constant 1 : i32
      %17 = arith.muli %arg8, %c1_i32_18 : i32
      %c0_i32_19 = arith.constant 0 : i32
      %18 = arith.addi %c0_i32_19, %17 : i32
      %c8_i32 = arith.constant 8 : i32
      %19 = arith.muli %18, %c8_i32 : i32
      %20 = tpu.assume_multiple %19, 8 : i32
      %c0_20 = arith.constant 0 : index
      %21 = arith.index_cast %20 : i32 to index
      %c0_21 = arith.constant 0 : index
      %c0_22 = arith.constant 0 : index
      %22 = vector.load %arg1[%c0_20, %21, %c0_21, %c0_22] : memref<1x16x16x128xf32, #tpu.memory_space<vmem>>, vector<1x8x16x128xf32>
      %23 = vector.shape_cast %22 : vector<1x8x16x128xf32> to vector<8x16x128xf32>
      %24 = vector.shape_cast %0 : vector<1x128xf32> to vector<1x1x128xf32>
      %25 = vector.broadcast %24 : vector<1x1x128xf32> to vector<8x16x128xf32>
      %26 = arith.mulf %23, %25 : vector<8x16x128xf32>
      %27 = vector.shape_cast %1 : vector<1x128xf32> to vector<1x1x128xf32>
      %28 = vector.broadcast %27 : vector<1x1x128xf32> to vector<8x16x128xf32>
      %29 = arith.addf %26, %28 : vector<8x16x128xf32>
      %cst_23 = arith.constant 0.000000e+00 : f32
      %30 = vector.broadcast %cst_23 : f32 to vector<8x16x128xf32>
      %31 = arith.subf %30, %29 : vector<8x16x128xf32>
      %32 = math.exp %31 : vector<8x16x128xf32>
      %cst_24 = arith.constant 1.000000e+00 : f32
      %33 = vector.broadcast %cst_24 : f32 to vector<8x16x128xf32>
      %34 = arith.addf %33, %32 : vector<8x16x128xf32>
      %35 = tpu.reciprocal %34 {approx = true} : vector<8x16x128xf32> -> vector<8x16x128xf32>
      %36 = arith.mulf %29, %35 : vector<8x16x128xf32>
      %c1_i32_25 = arith.constant 1 : i32
      %37 = arith.addi %20, %c1_i32_25 : i32
      %38 = arith.index_cast %37 : i32 to index
      %c0_26 = arith.constant 0 : index
      %c0_27 = arith.constant 0 : index
      %39 = vector.load %arg7[%38, %c0_26, %c0_27] : memref<18x16x128xf32, #tpu.memory_space<vmem>>, vector<8x16x128xf32>
      tpu.vector_store %arg7[%38, %c0_26, %c0_27], %36 {strides = array<i32>} : memref<18x16x128xf32, #tpu.memory_space<vmem>>, vector<8x16x128xf32>,
    }
    %c2_i32_9 = arith.constant 2 : i32
    %cst_10 = arith.constant 0.000000e+00 : f32
    %11 = vector.broadcast %cst_10 : f32 to vector<1x128xf32>
    %c0_i32_11 = arith.constant 0 : i32
    %c2_i32_12 = arith.constant 2 : i32
    %12 = arith.addi %c0_i32_11, %c2_i32_12 : i32
    %c1_i32_13 = arith.constant 1 : i32
    %13:2 = scf.for %arg8 = %c0_i32_11 to %12 step %c1_i32_13 iter_args(%arg9 = %11, %arg10 = %11) -> (vector<1x128xf32>, vector<1x128xf32>)  : i32 {
      %c8_i32 = arith.constant 8 : i32
      %17 = arith.muli %arg8, %c8_i32 : i32
      %18 = tpu.assume_multiple %17, 8 : i32
      %cst_18 = arith.constant 0.000000e+00 : f32
      %19 = vector.broadcast %cst_18 : f32 to vector<8x16x128xf32>
      %c0_i32_19 = arith.constant 0 : i32
      %20 = arith.addi %18, %c0_i32_19 : i32
      %21 = arith.index_cast %20 : i32 to index
      %c0_20 = arith.constant 0 : index
      %c0_21 = arith.constant 0 : index
      %22 = vector.load %arg7[%21, %c0_20, %c0_21] : memref<18x16x128xf32, #tpu.memory_space<vmem>>, vector<8x16x128xf32>
      %c0_22 = arith.constant 0 : index
      %c0_23 = arith.constant 0 : index
      %c0_24 = arith.constant 0 : index
      %23 = vector.load %arg4[%c0_22, %c0_23, %c0_24] : memref<9x16x128xf32, #tpu.memory_space<vmem>>, vector<1x16x128xf32>
      %24 = vector.shape_cast %23 : vector<1x16x128xf32> to vector<16x128xf32>
      %c1_i32_25 = arith.constant 1 : i32
      %25 = tpu.dynamic_rotate %22 by %c1_i32_25 dim 1 : vector<8x16x128xf32>, i32 -> vector<8x16x128xf32>
      %26 = vector.shape_cast %24 : vector<16x128xf32> to vector<1x16x128xf32>
      %27 = vector.broadcast %26 : vector<1x16x128xf32> to vector<8x16x128xf32>
      %28 = arith.mulf %27, %25 : vector<8x16x128xf32>
      %29 = arith.addf %19, %28 : vector<8x16x128xf32>
      %c1 = arith.constant 1 : index
      %c0_26 = arith.constant 0 : index
      %c0_27 = arith.constant 0 : index
      %30 = vector.load %arg4[%c1, %c0_26, %c0_27] : memref<9x16x128xf32, #tpu.memory_space<vmem>>, vector<1x16x128xf32>
      %31 = vector.shape_cast %30 : vector<1x16x128xf32> to vector<16x128xf32>
      %32 = vector.shape_cast %31 : vector<16x128xf32> to vector<1x16x128xf32>
      %33 = vector.broadcast %32 : vector<1x16x128xf32> to vector<8x16x128xf32>
      %34 = arith.mulf %33, %22 : vector<8x16x128xf32>
      %35 = arith.addf %29, %34 : vector<8x16x128xf32>
      %c2 = arith.constant 2 : index
      %c0_28 = arith.constant 0 : index
      %c0_29 = arith.constant 0 : index
      %36 = vector.load %arg4[%c2, %c0_28, %c0_29] : memref<9x16x128xf32, #tpu.memory_space<vmem>>, vector<1x16x128xf32>
      %37 = vector.shape_cast %36 : vector<1x16x128xf32> to vector<16x128xf32>
      %c15_i32 = arith.constant 15 : i32
      %38 = tpu.dynamic_rotate %22 by %c15_i32 dim 1 : vector<8x16x128xf32>, i32 -> vector<8x16x128xf32>
      %39 = vector.shape_cast %37 : vector<16x128xf32> to vector<1x16x128xf32>
      %40 = vector.broadcast %39 : vector<1x16x128xf32> to vector<8x16x128xf32>
      %41 = arith.mulf %40, %38 : vector<8x16x128xf32>
      %42 = arith.addf %35, %41 : vector<8x16x128xf32>
      %c1_i32_30 = arith.constant 1 : i32
      %43 = arith.addi %18, %c1_i32_30 : i32
      %44 = arith.index_cast %43 : i32 to index
      %c0_31 = arith.constant 0 : index
      %c0_32 = arith.constant 0 : index
      %45 = vector.load %arg7[%44, %c0_31, %c0_32] : memref<18x16x128xf32, #tpu.memory_space<vmem>>, vector<8x16x128xf32>
      %c3 = arith.constant 3 : index
      %c0_33 = arith.constant 0 : index
      %c0_34 = arith.constant 0 : index
      %46 = vector.load %arg4[%c3, %c0_33, %c0_34] : memref<9x16x128xf32, #tpu.memory_space<vmem>>, vector<1x16x128xf32>
      %47 = vector.shape_cast %46 : vector<1x16x128xf32> to vector<16x128xf32>
      %c1_i32_35 = arith.constant 1 : i32
      %48 = tpu.dynamic_rotate %45 by %c1_i32_35 dim 1 : vector<8x16x128xf32>, i32 -> vector<8x16x128xf32>
      %49 = vector.shape_cast %47 : vector<16x128xf32> to vector<1x16x128xf32>
      %50 = vector.broadcast %49 : vector<1x16x128xf32> to vector<8x16x128xf32>
      %51 = arith.mulf %50, %48 : vector<8x16x128xf32>
      %52 = arith.addf %42, %51 : vector<8x16x128xf32>
      %c4 = arith.constant 4 : index
      %c0_36 = arith.constant 0 : index
      %c0_37 = arith.constant 0 : index
      %53 = vector.load %arg4[%c4, %c0_36, %c0_37] : memref<9x16x128xf32, #tpu.memory_space<vmem>>, vector<1x16x128xf32>
      %54 = vector.shape_cast %53 : vector<1x16x128xf32> to vector<16x128xf32>
      %55 = vector.shape_cast %54 : vector<16x128xf32> to vector<1x16x128xf32>
      %56 = vector.broadcast %55 : vector<1x16x128xf32> to vector<8x16x128xf32>
      %57 = arith.mulf %56, %45 : vector<8x16x128xf32>
      %58 = arith.addf %52, %57 : vector<8x16x128xf32>
      %c5 = arith.constant 5 : index
      %c0_38 = arith.constant 0 : index
      %c0_39 = arith.constant 0 : index
      %59 = vector.load %arg4[%c5, %c0_38, %c0_39] : memref<9x16x128xf32, #tpu.memory_space<vmem>>, vector<1x16x128xf32>
      %60 = vector.shape_cast %59 : vector<1x16x128xf32> to vector<16x128xf32>
      %c15_i32_40 = arith.constant 15 : i32
      %61 = tpu.dynamic_rotate %45 by %c15_i32_40 dim 1 : vector<8x16x128xf32>, i32 -> vector<8x16x128xf32>
      %62 = vector.shape_cast %60 : vector<16x128xf32> to vector<1x16x128xf32>
      %63 = vector.broadcast %62 : vector<1x16x128xf32> to vector<8x16x128xf32>
      %64 = arith.mulf %63, %61 : vector<8x16x128xf32>
      %65 = arith.addf %58, %64 : vector<8x16x128xf32>
      %c2_i32_41 = arith.constant 2 : i32
      %66 = arith.addi %18, %c2_i32_41 : i32
      %67 = arith.index_cast %66 : i32 to index
      %c0_42 = arith.constant 0 : index
      %c0_43 = arith.constant 0 : index
      %68 = vector.load %arg7[%67, %c0_42, %c0_43] : memref<18x16x128xf32, #tpu.memory_space<vmem>>, vector<8x16x128xf32>
      %c6 = arith.constant 6 : index
      %c0_44 = arith.constant 0 : index
      %c0_45 = arith.constant 0 : index
      %69 = vector.load %arg4[%c6, %c0_44, %c0_45] : memref<9x16x128xf32, #tpu.memory_space<vmem>>, vector<1x16x128xf32>
      %70 = vector.shape_cast %69 : vector<1x16x128xf32> to vector<16x128xf32>
      %c1_i32_46 = arith.constant 1 : i32
      %71 = tpu.dynamic_rotate %68 by %c1_i32_46 dim 1 : vector<8x16x128xf32>, i32 -> vector<8x16x128xf32>
      %72 = vector.shape_cast %70 : vector<16x128xf32> to vector<1x16x128xf32>
      %73 = vector.broadcast %72 : vector<1x16x128xf32> to vector<8x16x128xf32>
      %74 = arith.mulf %73, %71 : vector<8x16x128xf32>
      %75 = arith.addf %65, %74 : vector<8x16x128xf32>
      %c7 = arith.constant 7 : index
      %c0_47 = arith.constant 0 : index
      %c0_48 = arith.constant 0 : index
      %76 = vector.load %arg4[%c7, %c0_47, %c0_48] : memref<9x16x128xf32, #tpu.memory_space<vmem>>, vector<1x16x128xf32>
      %77 = vector.shape_cast %76 : vector<1x16x128xf32> to vector<16x128xf32>
      %78 = vector.shape_cast %77 : vector<16x128xf32> to vector<1x16x128xf32>
      %79 = vector.broadcast %78 : vector<1x16x128xf32> to vector<8x16x128xf32>
      %80 = arith.mulf %79, %68 : vector<8x16x128xf32>
      %81 = arith.addf %75, %80 : vector<8x16x128xf32>
      %c8 = arith.constant 8 : index
      %c0_49 = arith.constant 0 : index
      %c0_50 = arith.constant 0 : index
      %82 = vector.load %arg4[%c8, %c0_49, %c0_50] : memref<9x16x128xf32, #tpu.memory_space<vmem>>, vector<1x16x128xf32>
      %83 = vector.shape_cast %82 : vector<1x16x128xf32> to vector<16x128xf32>
      %c15_i32_51 = arith.constant 15 : i32
      %84 = tpu.dynamic_rotate %68 by %c15_i32_51 dim 1 : vector<8x16x128xf32>, i32 -> vector<8x16x128xf32>
      %85 = vector.shape_cast %83 : vector<16x128xf32> to vector<1x16x128xf32>
      %86 = vector.broadcast %85 : vector<1x16x128xf32> to vector<8x16x128xf32>
      %87 = arith.mulf %86, %84 : vector<8x16x128xf32>
      %88 = arith.addf %81, %87 : vector<8x16x128xf32>
      %c0_52 = arith.constant 0 : index
      %89 = arith.index_cast %18 : i32 to index
      %c0_53 = arith.constant 0 : index
      %c0_54 = arith.constant 0 : index
      %90 = vector.load %arg5[%c0_52, %89, %c0_53, %c0_54] : memref<1x16x16x128xf32, #tpu.memory_space<vmem>>, vector<1x8x16x128xf32>
      %91 = vector.shape_cast %90 : vector<1x8x16x128xf32> to vector<8x16x128xf32>
      %92 = vector.shape_cast %88 : vector<8x16x128xf32> to vector<1x8x16x128xf32>
      tpu.vector_store %arg5[%c0_52, %89, %c0_53, %c0_54], %92 {strides = array<i32>} : memref<1x16x16x128xf32, #tpu.memory_space<vmem>>, vector<1x8x16x128xf32>,
      %93 = vector.shape_cast %88 : vector<8x16x128xf32> to vector<128x128xf32>
      %cst_55 = arith.constant dense<0.000000e+00> : vector<128xf32>
      %94 = vector.multi_reduction <add>, %93, %cst_55 [0] : vector<128x128xf32> to vector<128xf32>
      %95 = vector.shape_cast %94 : vector<128xf32> to vector<1x128xf32>
      %96 = arith.addf %arg9, %95 : vector<1x128xf32>
      %97 = arith.mulf %93, %93 : vector<128x128xf32>
      %cst_56 = arith.constant dense<0.000000e+00> : vector<128xf32>
      %98 = vector.multi_reduction <add>, %97, %cst_56 [0] : vector<128x128xf32> to vector<128xf32>
      %99 = vector.shape_cast %98 : vector<128xf32> to vector<1x128xf32>
      %100 = arith.addf %arg10, %99 : vector<1x128xf32>
      scf.yield %96, %100 : vector<1x128xf32>, vector<1x128xf32>
    }
    %c2_i32_14 = arith.constant 2 : i32
    %14 = tpu.concatenate %13#0, %13#1 in 0 : vector<1x128xf32>, vector<1x128xf32> -> vector<2x128xf32>
    %15 = vector.shape_cast %14 : vector<2x128xf32> to vector<1x2x128xf32>
    %c0_15 = arith.constant 0 : index
    %c0_16 = arith.constant 0 : index
    %c0_17 = arith.constant 0 : index
    %16 = vector.load %arg6[%c0_15, %c0_16, %c0_17] : memref<1x2x128xf32, #tpu.memory_space<vmem>>, vector<1x2x128xf32>
    tpu.vector_store %arg6[%c0_15, %c0_16, %c0_17], %15 {strides = array<i32>} : memref<1x2x128xf32, #tpu.memory_space<vmem>>, vector<1x2x128xf32>,
    return
  }
  func.func @transform_0(%arg0: i32) -> (i32, i32, i32, i32) {
    %c0_i32 = arith.constant 0 : i32
    %c0_i32_0 = arith.constant 0 : i32
    %c0_i32_1 = arith.constant 0 : i32
    %c0_i32_2 = arith.constant 0 : i32
    return %arg0, %c0_i32, %c0_i32_0, %c0_i32_1 : i32, i32, i32, i32
  }
  func.func @transform_1(%arg0: i32) -> (i32, i32) {
    %c0_i32 = arith.constant 0 : i32
    %c0_i32_0 = arith.constant 0 : i32
    %c0_i32_1 = arith.constant 0 : i32
    return %c0_i32, %c0_i32_0 : i32, i32
  }
  func.func @transform_2(%arg0: i32) -> (i32, i32) {
    %c0_i32 = arith.constant 0 : i32
    %c0_i32_0 = arith.constant 0 : i32
    %c0_i32_1 = arith.constant 0 : i32
    return %c0_i32, %c0_i32_0 : i32, i32
  }
  func.func @transform_3(%arg0: i32) -> (i32, i32, i32) {
    %c0_i32 = arith.constant 0 : i32
    %c0_i32_0 = arith.constant 0 : i32
    %c0_i32_1 = arith.constant 0 : i32
    %c0_i32_2 = arith.constant 0 : i32
    return %c0_i32, %c0_i32_0, %c0_i32_1 : i32, i32, i32
  }
  func.func @transform_4(%arg0: i32) -> (i32, i32, i32, i32) {
    %c0_i32 = arith.constant 0 : i32
    %c0_i32_0 = arith.constant 0 : i32
    %c0_i32_1 = arith.constant 0 : i32
    %c0_i32_2 = arith.constant 0 : i32
    return %arg0, %c0_i32, %c0_i32_0, %c0_i32_1 : i32, i32, i32, i32
  }
  func.func @transform_5(%arg0: i32) -> (i32, i32, i32) {
    %c0_i32 = arith.constant 0 : i32
    %c0_i32_0 = arith.constant 0 : i32
    %c0_i32_1 = arith.constant 0 : i32
    return %arg0, %c0_i32, %c0_i32_0 : i32, i32, i32
  }
}

module attributes {stable_mosaic.version = 11 : i64} {
  func.func @_se_gate_kernel(%arg0: i32, %arg1: memref<1x256x128xf32, #tpu.memory_space<vmem>>, %arg2: memref<1x128xf32, #tpu.memory_space<vmem>>, %arg3: memref<1x128xf32, #tpu.memory_space<vmem>>, %arg4: memref<128x128xbf16, #tpu.memory_space<vmem>>, %arg5: memref<128x128xbf16, #tpu.memory_space<vmem>>, %arg6: memref<1x1x128xf32, #tpu.memory_space<vmem>>) attributes {dimension_semantics = [#tpu.dimension_semantics<parallel>], iteration_bounds = array<i64: 2>, scalar_prefetch = 0 : i64, scratch_operands = 0 : i64, tpu.core_type = #tpu.core_type<tc>, window_params = [{transform_indices = @transform_0, window_bounds = array<i64: 1, 256, 128>}, {pipeline_mode = #tpu.pipeline_mode<synchronous>, transform_indices = @transform_1, window_bounds = array<i64: 1, 128>}, {pipeline_mode = #tpu.pipeline_mode<synchronous>, transform_indices = @transform_2, window_bounds = array<i64: 1, 128>}, {pipeline_mode = #tpu.pipeline_mode<synchronous>, transform_indices = @transform_3, window_bounds = array<i64: 128, 128>}, {pipeline_mode = #tpu.pipeline_mode<synchronous>, transform_indices = @transform_4, window_bounds = array<i64: 128, 128>}, {transform_indices = @transform_5, window_bounds = array<i64: 1, 1, 128>}]} {
    %c0 = arith.constant 0 : index
    %c0_0 = arith.constant 0 : index
    %c0_1 = arith.constant 0 : index
    %0 = vector.load %arg1[%c0, %c0_0, %c0_1] : memref<1x256x128xf32, #tpu.memory_space<vmem>>, vector<1x256x128xf32>
    %1 = vector.shape_cast %0 : vector<1x256x128xf32> to vector<256x128xf32>
    %c0_2 = arith.constant 0 : index
    %c0_3 = arith.constant 0 : index
    %2 = vector.load %arg2[%c0_2, %c0_3] : memref<1x128xf32, #tpu.memory_space<vmem>>, vector<1x128xf32>
    %3 = vector.broadcast %2 : vector<1x128xf32> to vector<256x128xf32>
    %4 = arith.mulf %1, %3 : vector<256x128xf32>
    %c0_4 = arith.constant 0 : index
    %c0_5 = arith.constant 0 : index
    %5 = vector.load %arg3[%c0_4, %c0_5] : memref<1x128xf32, #tpu.memory_space<vmem>>, vector<1x128xf32>
    %6 = vector.broadcast %5 : vector<1x128xf32> to vector<256x128xf32>
    %7 = arith.addf %4, %6 : vector<256x128xf32>
    %cst = arith.constant 0.000000e+00 : f32
    %8 = vector.broadcast %cst : f32 to vector<256x128xf32>
    %9 = arith.subf %8, %7 : vector<256x128xf32>
    %10 = math.exp %9 : vector<256x128xf32>
    %cst_6 = arith.constant 1.000000e+00 : f32
    %11 = vector.broadcast %cst_6 : f32 to vector<256x128xf32>
    %12 = arith.addf %11, %10 : vector<256x128xf32>
    %13 = tpu.reciprocal %12 {approx = true} : vector<256x128xf32> -> vector<256x128xf32>
    %14 = arith.mulf %7, %13 : vector<256x128xf32>
    %cst_7 = arith.constant dense<0.000000e+00> : vector<128xf32>
    %15 = vector.multi_reduction <add>, %14, %cst_7 [0] : vector<256x128xf32> to vector<128xf32>
    %16 = vector.shape_cast %15 : vector<128xf32> to vector<1x128xf32>
    %cst_8 = arith.constant 3.906250e-03 : f32
    %17 = vector.broadcast %cst_8 : f32 to vector<1x128xf32>
    %18 = arith.mulf %16, %17 : vector<1x128xf32>
    %19 = vector.shape_cast %18 : vector<1x128xf32> to vector<1x128xf32>
    %20 = vector.broadcast %19 : vector<1x128xf32> to vector<8x128xf32>
    %21 = arith.truncf %20 : vector<8x128xf32> to vector<8x128xbf16>
    %c0_9 = arith.constant 0 : index
    %c0_10 = arith.constant 0 : index
    %22 = vector.load %arg4[%c0_9, %c0_10] : memref<128x128xbf16, #tpu.memory_space<vmem>>, vector<128x128xbf16>
    %cst_11 = arith.constant dense<0.000000e+00> : vector<8x128xf32>
    %23 = tpu.matmul %21, %22, %cst_11 {dimension_numbers = #tpu.dot_dimension_numbers<[1], [0], [0], [1], [0, 0, 1, 1], [], []>} : vector<8x128xbf16>, vector<128x128xbf16>, vector<8x128xf32> -> vector<8x128xf32>
    %cst_12 = arith.constant 0.000000e+00 : f32
    %24 = vector.broadcast %cst_12 : f32 to vector<8x128xf32>
    %25 = arith.subf %24, %23 : vector<8x128xf32>
    %26 = math.exp %25 : vector<8x128xf32>
    %cst_13 = arith.constant 1.000000e+00 : f32
    %27 = vector.broadcast %cst_13 : f32 to vector<8x128xf32>
    %28 = arith.addf %27, %26 : vector<8x128xf32>
    %29 = tpu.reciprocal %28 {approx = true} : vector<8x128xf32> -> vector<8x128xf32>
    %30 = arith.mulf %23, %29 : vector<8x128xf32>
    %31 = arith.truncf %30 : vector<8x128xf32> to vector<8x128xbf16>
    %c0_14 = arith.constant 0 : index
    %c0_15 = arith.constant 0 : index
    %32 = vector.load %arg5[%c0_14, %c0_15] : memref<128x128xbf16, #tpu.memory_space<vmem>>, vector<128x128xbf16>
    %cst_16 = arith.constant dense<0.000000e+00> : vector<8x128xf32>
    %33 = tpu.matmul %31, %32, %cst_16 {dimension_numbers = #tpu.dot_dimension_numbers<[1], [0], [0], [1], [0, 0, 1, 1], [], []>} : vector<8x128xbf16>, vector<128x128xbf16>, vector<8x128xf32> -> vector<8x128xf32>
    %34 = vector.extract_strided_slice %33 {offsets = [0, 0], sizes = [1, 128], strides = [1, 1]} : vector<8x128xf32> to vector<1x128xf32>
    %cst_17 = arith.constant 0.000000e+00 : f32
    %35 = vector.broadcast %cst_17 : f32 to vector<1x128xf32>
    %36 = arith.subf %35, %34 : vector<1x128xf32>
    %37 = math.exp %36 : vector<1x128xf32>
    %cst_18 = arith.constant 1.000000e+00 : f32
    %38 = vector.broadcast %cst_18 : f32 to vector<1x128xf32>
    %39 = arith.addf %38, %37 : vector<1x128xf32>
    %40 = tpu.reciprocal %39 {approx = true} : vector<1x128xf32> -> vector<1x128xf32>
    %41 = vector.shape_cast %40 : vector<1x128xf32> to vector<1x1x128xf32>
    %c0_19 = arith.constant 0 : index
    %c0_20 = arith.constant 0 : index
    %c0_21 = arith.constant 0 : index
    %42 = vector.load %arg6[%c0_19, %c0_20, %c0_21] : memref<1x1x128xf32, #tpu.memory_space<vmem>>, vector<1x1x128xf32>
    tpu.vector_store %arg6[%c0_19, %c0_20, %c0_21], %41 {strides = array<i32>} : memref<1x1x128xf32, #tpu.memory_space<vmem>>, vector<1x1x128xf32>,
    return
  }
  func.func @transform_0(%arg0: i32) -> (i32, i32, i32) {
    %c0_i32 = arith.constant 0 : i32
    %c0_i32_0 = arith.constant 0 : i32
    %c0_i32_1 = arith.constant 0 : i32
    return %arg0, %c0_i32, %c0_i32_0 : i32, i32, i32
  }
  func.func @transform_1(%arg0: i32) -> (i32, i32) {
    %c0_i32 = arith.constant 0 : i32
    %c0_i32_0 = arith.constant 0 : i32
    %c0_i32_1 = arith.constant 0 : i32
    return %c0_i32, %c0_i32_0 : i32, i32
  }
  func.func @transform_2(%arg0: i32) -> (i32, i32) {
    %c0_i32 = arith.constant 0 : i32
    %c0_i32_0 = arith.constant 0 : i32
    %c0_i32_1 = arith.constant 0 : i32
    return %c0_i32, %c0_i32_0 : i32, i32
  }
  func.func @transform_3(%arg0: i32) -> (i32, i32) {
    %c0_i32 = arith.constant 0 : i32
    %c0_i32_0 = arith.constant 0 : i32
    %c0_i32_1 = arith.constant 0 : i32
    return %c0_i32, %c0_i32_0 : i32, i32
  }
  func.func @transform_4(%arg0: i32) -> (i32, i32) {
    %c0_i32 = arith.constant 0 : i32
    %c0_i32_0 = arith.constant 0 : i32
    %c0_i32_1 = arith.constant 0 : i32
    return %c0_i32, %c0_i32_0 : i32, i32
  }
  func.func @transform_5(%arg0: i32) -> (i32, i32, i32) {
    %c0_i32 = arith.constant 0 : i32
    %c0_i32_0 = arith.constant 0 : i32
    %c0_i32_1 = arith.constant 0 : i32
    return %arg0, %c0_i32, %c0_i32_0 : i32, i32, i32
  }
}

module attributes {stable_mosaic.version = 11 : i64} {
  func.func @_pointwise_kernel(%arg0: i32, %arg1: i32, %arg2: memref<1x256x128xf32, #tpu.memory_space<vmem>>, %arg3: memref<1x1x128xf32, #tpu.memory_space<vmem>>, %arg4: memref<1x128xf32, #tpu.memory_space<vmem>>, %arg5: memref<1x128xf32, #tpu.memory_space<vmem>>, %arg6: memref<128x128xbf16, #tpu.memory_space<vmem>>, %arg7: memref<1x256x128xf32, #tpu.memory_space<vmem>>, %arg8: memref<1x1x2x128xf32, #tpu.memory_space<vmem>>) attributes {dimension_semantics = [#tpu.dimension_semantics<parallel>, #tpu.dimension_semantics<parallel>], iteration_bounds = array<i64: 2, 1>, scalar_prefetch = 0 : i64, scratch_operands = 0 : i64, tpu.core_type = #tpu.core_type<tc>, window_params = [{transform_indices = @transform_0, window_bounds = array<i64: 1, 256, 128>}, {transform_indices = @transform_1, window_bounds = array<i64: 1, 1, 128>}, {pipeline_mode = #tpu.pipeline_mode<synchronous>, transform_indices = @transform_2, window_bounds = array<i64: 1, 128>}, {pipeline_mode = #tpu.pipeline_mode<synchronous>, transform_indices = @transform_3, window_bounds = array<i64: 1, 128>}, {pipeline_mode = #tpu.pipeline_mode<synchronous>, transform_indices = @transform_4, window_bounds = array<i64: 128, 128>}, {transform_indices = @transform_5, window_bounds = array<i64: 1, 256, 128>}, {transform_indices = @transform_6, window_bounds = array<i64: 1, 1, 2, 128>}]} {
    %c0 = arith.constant 0 : index
    %c0_0 = arith.constant 0 : index
    %c0_1 = arith.constant 0 : index
    %0 = vector.load %arg2[%c0, %c0_0, %c0_1] : memref<1x256x128xf32, #tpu.memory_space<vmem>>, vector<1x256x128xf32>
    %1 = vector.shape_cast %0 : vector<1x256x128xf32> to vector<256x128xf32>
    %c0_2 = arith.constant 0 : index
    %c0_3 = arith.constant 0 : index
    %2 = vector.load %arg4[%c0_2, %c0_3] : memref<1x128xf32, #tpu.memory_space<vmem>>, vector<1x128xf32>
    %3 = vector.broadcast %2 : vector<1x128xf32> to vector<256x128xf32>
    %4 = arith.mulf %1, %3 : vector<256x128xf32>
    %c0_4 = arith.constant 0 : index
    %c0_5 = arith.constant 0 : index
    %5 = vector.load %arg5[%c0_4, %c0_5] : memref<1x128xf32, #tpu.memory_space<vmem>>, vector<1x128xf32>
    %6 = vector.broadcast %5 : vector<1x128xf32> to vector<256x128xf32>
    %7 = arith.addf %4, %6 : vector<256x128xf32>
    %cst = arith.constant 0.000000e+00 : f32
    %8 = vector.broadcast %cst : f32 to vector<256x128xf32>
    %9 = arith.subf %8, %7 : vector<256x128xf32>
    %10 = math.exp %9 : vector<256x128xf32>
    %cst_6 = arith.constant 1.000000e+00 : f32
    %11 = vector.broadcast %cst_6 : f32 to vector<256x128xf32>
    %12 = arith.addf %11, %10 : vector<256x128xf32>
    %13 = tpu.reciprocal %12 {approx = true} : vector<256x128xf32> -> vector<256x128xf32>
    %14 = arith.mulf %7, %13 : vector<256x128xf32>
    %c0_7 = arith.constant 0 : index
    %c0_8 = arith.constant 0 : index
    %c0_9 = arith.constant 0 : index
    %15 = vector.load %arg3[%c0_7, %c0_8, %c0_9] : memref<1x1x128xf32, #tpu.memory_space<vmem>>, vector<1x1x128xf32>
    %16 = vector.shape_cast %15 : vector<1x1x128xf32> to vector<1x128xf32>
    %17 = vector.broadcast %16 : vector<1x128xf32> to vector<256x128xf32>
    %18 = arith.mulf %14, %17 : vector<256x128xf32>
    %19 = arith.truncf %18 : vector<256x128xf32> to vector<256x128xbf16>
    %c0_10 = arith.constant 0 : index
    %c0_11 = arith.constant 0 : index
    %20 = vector.load %arg6[%c0_10, %c0_11] : memref<128x128xbf16, #tpu.memory_space<vmem>>, vector<128x128xbf16>
    %cst_12 = arith.constant dense<0.000000e+00> : vector<256x128xf32>
    %21 = tpu.matmul %19, %20, %cst_12 {dimension_numbers = #tpu.dot_dimension_numbers<[1], [0], [0], [1], [0, 0, 1, 1], [], []>} : vector<256x128xbf16>, vector<128x128xbf16>, vector<256x128xf32> -> vector<256x128xf32>
    %c0_13 = arith.constant 0 : index
    %c0_14 = arith.constant 0 : index
    %c0_15 = arith.constant 0 : index
    %22 = vector.load %arg7[%c0_13, %c0_14, %c0_15] : memref<1x256x128xf32, #tpu.memory_space<vmem>>, vector<1x256x128xf32>
    %23 = vector.shape_cast %22 : vector<1x256x128xf32> to vector<256x128xf32>
    %24 = vector.shape_cast %21 : vector<256x128xf32> to vector<1x256x128xf32>
    tpu.vector_store %arg7[%c0_13, %c0_14, %c0_15], %24 {strides = array<i32>} : memref<1x256x128xf32, #tpu.memory_space<vmem>>, vector<1x256x128xf32>,
    %cst_16 = arith.constant dense<0.000000e+00> : vector<128xf32>
    %25 = vector.multi_reduction <add>, %21, %cst_16 [0] : vector<256x128xf32> to vector<128xf32>
    %26 = vector.shape_cast %25 : vector<128xf32> to vector<1x128xf32>
    %27 = arith.mulf %21, %21 : vector<256x128xf32>
    %cst_17 = arith.constant dense<0.000000e+00> : vector<128xf32>
    %28 = vector.multi_reduction <add>, %27, %cst_17 [0] : vector<256x128xf32> to vector<128xf32>
    %29 = vector.shape_cast %28 : vector<128xf32> to vector<1x128xf32>
    %30 = tpu.concatenate %26, %29 in 0 : vector<1x128xf32>, vector<1x128xf32> -> vector<2x128xf32>
    %31 = vector.shape_cast %30 : vector<2x128xf32> to vector<1x1x2x128xf32>
    %c0_18 = arith.constant 0 : index
    %c0_19 = arith.constant 0 : index
    %c0_20 = arith.constant 0 : index
    %c0_21 = arith.constant 0 : index
    %32 = vector.load %arg8[%c0_18, %c0_19, %c0_20, %c0_21] : memref<1x1x2x128xf32, #tpu.memory_space<vmem>>, vector<1x1x2x128xf32>
    tpu.vector_store %arg8[%c0_18, %c0_19, %c0_20, %c0_21], %31 {strides = array<i32>} : memref<1x1x2x128xf32, #tpu.memory_space<vmem>>, vector<1x1x2x128xf32>,
    return
  }
  func.func @transform_0(%arg0: i32, %arg1: i32) -> (i32, i32, i32) {
    %c0_i32 = arith.constant 0 : i32
    %c0_i32_0 = arith.constant 0 : i32
    return %arg0, %arg1, %c0_i32 : i32, i32, i32
  }
  func.func @transform_1(%arg0: i32, %arg1: i32) -> (i32, i32, i32) {
    %c0_i32 = arith.constant 0 : i32
    %c0_i32_0 = arith.constant 0 : i32
    %c0_i32_1 = arith.constant 0 : i32
    return %arg0, %c0_i32, %c0_i32_0 : i32, i32, i32
  }
  func.func @transform_2(%arg0: i32, %arg1: i32) -> (i32, i32) {
    %c0_i32 = arith.constant 0 : i32
    %c0_i32_0 = arith.constant 0 : i32
    %c0_i32_1 = arith.constant 0 : i32
    return %c0_i32, %c0_i32_0 : i32, i32
  }
  func.func @transform_3(%arg0: i32, %arg1: i32) -> (i32, i32) {
    %c0_i32 = arith.constant 0 : i32
    %c0_i32_0 = arith.constant 0 : i32
    %c0_i32_1 = arith.constant 0 : i32
    return %c0_i32, %c0_i32_0 : i32, i32
  }
  func.func @transform_4(%arg0: i32, %arg1: i32) -> (i32, i32) {
    %c0_i32 = arith.constant 0 : i32
    %c0_i32_0 = arith.constant 0 : i32
    %c0_i32_1 = arith.constant 0 : i32
    return %c0_i32, %c0_i32_0 : i32, i32
  }
  func.func @transform_5(%arg0: i32, %arg1: i32) -> (i32, i32, i32) {
    %c0_i32 = arith.constant 0 : i32
    %c0_i32_0 = arith.constant 0 : i32
    return %arg0, %arg1, %c0_i32 : i32, i32, i32
  }
  func.func @transform_6(%arg0: i32, %arg1: i32) -> (i32, i32, i32, i32) {
    %c0_i32 = arith.constant 0 : i32
    %c0_i32_0 = arith.constant 0 : i32
    %c0_i32_1 = arith.constant 0 : i32
    return %arg0, %arg1, %c0_i32, %c0_i32_0 : i32, i32, i32, i32
  }
}

module attributes {stable_mosaic.version = 11 : i64} {
  func.func @_finalize_kernel(%arg0: i32, %arg1: memref<256x128xf32, #tpu.memory_space<vmem>>, %arg2: memref<1x128xf32, #tpu.memory_space<vmem>>, %arg3: memref<1x128xf32, #tpu.memory_space<vmem>>, %arg4: memref<256x128xf32, #tpu.memory_space<vmem>>, %arg5: memref<256x128xf32, #tpu.memory_space<vmem>>) attributes {dimension_semantics = [#tpu.dimension_semantics<parallel>], iteration_bounds = array<i64: 2>, scalar_prefetch = 0 : i64, scratch_operands = 0 : i64, tpu.core_type = #tpu.core_type<tc>, window_params = [{transform_indices = @transform_0, window_bounds = array<i64: 256, 128>}, {pipeline_mode = #tpu.pipeline_mode<synchronous>, transform_indices = @transform_1, window_bounds = array<i64: 1, 128>}, {pipeline_mode = #tpu.pipeline_mode<synchronous>, transform_indices = @transform_2, window_bounds = array<i64: 1, 128>}, {transform_indices = @transform_3, window_bounds = array<i64: 256, 128>}, {transform_indices = @transform_4, window_bounds = array<i64: 256, 128>}]} {
    %c0 = arith.constant 0 : index
    %c0_0 = arith.constant 0 : index
    %0 = vector.load %arg1[%c0, %c0_0] : memref<256x128xf32, #tpu.memory_space<vmem>>, vector<256x128xf32>
    %c0_1 = arith.constant 0 : index
    %c0_2 = arith.constant 0 : index
    %1 = vector.load %arg2[%c0_1, %c0_2] : memref<1x128xf32, #tpu.memory_space<vmem>>, vector<1x128xf32>
    %2 = vector.broadcast %1 : vector<1x128xf32> to vector<256x128xf32>
    %3 = arith.mulf %0, %2 : vector<256x128xf32>
    %c0_3 = arith.constant 0 : index
    %c0_4 = arith.constant 0 : index
    %4 = vector.load %arg3[%c0_3, %c0_4] : memref<1x128xf32, #tpu.memory_space<vmem>>, vector<1x128xf32>
    %5 = vector.broadcast %4 : vector<1x128xf32> to vector<256x128xf32>
    %6 = arith.addf %3, %5 : vector<256x128xf32>
    %cst = arith.constant 0.000000e+00 : f32
    %7 = vector.broadcast %cst : f32 to vector<256x128xf32>
    %8 = arith.subf %7, %6 : vector<256x128xf32>
    %9 = math.exp %8 : vector<256x128xf32>
    %cst_5 = arith.constant 1.000000e+00 : f32
    %10 = vector.broadcast %cst_5 : f32 to vector<256x128xf32>
    %11 = arith.addf %10, %9 : vector<256x128xf32>
    %12 = tpu.reciprocal %11 {approx = true} : vector<256x128xf32> -> vector<256x128xf32>
    %13 = arith.mulf %6, %12 : vector<256x128xf32>
    %c0_6 = arith.constant 0 : index
    %c0_7 = arith.constant 0 : index
    %14 = vector.load %arg4[%c0_6, %c0_7] : memref<256x128xf32, #tpu.memory_space<vmem>>, vector<256x128xf32>
    %15 = arith.addf %13, %14 : vector<256x128xf32>
    %c0_8 = arith.constant 0 : index
    %c0_9 = arith.constant 0 : index
    %16 = vector.load %arg5[%c0_8, %c0_9] : memref<256x128xf32, #tpu.memory_space<vmem>>, vector<256x128xf32>
    tpu.vector_store %arg5[%c0_8, %c0_9], %15 {strides = array<i32>} : memref<256x128xf32, #tpu.memory_space<vmem>>, vector<256x128xf32>,
    return
  }
  func.func @transform_0(%arg0: i32) -> (i32, i32) {
    %c0_i32 = arith.constant 0 : i32
    %c0_i32_0 = arith.constant 0 : i32
    return %arg0, %c0_i32 : i32, i32
  }
  func.func @transform_1(%arg0: i32) -> (i32, i32) {
    %c0_i32 = arith.constant 0 : i32
    %c0_i32_0 = arith.constant 0 : i32
    %c0_i32_1 = arith.constant 0 : i32
    return %c0_i32, %c0_i32_0 : i32, i32
  }
  func.func @transform_2(%arg0: i32) -> (i32, i32) {
    %c0_i32 = arith.constant 0 : i32
    %c0_i32_0 = arith.constant 0 : i32
    %c0_i32_1 = arith.constant 0 : i32
    return %c0_i32, %c0_i32_0 : i32, i32
  }
  func.func @transform_3(%arg0: i32) -> (i32, i32) {
    %c0_i32 = arith.constant 0 : i32
    %c0_i32_0 = arith.constant 0 : i32
    return %arg0, %c0_i32 : i32, i32
  }
  func.func @transform_4(%arg0: i32) -> (i32, i32) {
    %c0_i32 = arith.constant 0 : i32
    %c0_i32_0 = arith.constant 0 : i32
    return %arg0, %c0_i32 : i32, i32
  }
}

</mosaic_0001>

<bundles_post_ra>
// kernel: mbconv_forward.5
= control target key start
LH: loop header
LB: loop body
LE: loop exit
PB: predicated region body
PF: predicated region fallthrough
CT: control target
= control target key end

     0   :  { %s839_s12 = smov 0   ;;  %s1041_s0 = inlined_call_operand.vmem [shape: f32[512,128], index: 0, kind: input, shape index: {}]   ;;  %s1042_s1 = inlined_call_operand.vmem [shape: bf16[128,128], index: 1, kind: input, shape index: {}]   ;;  %s1043_s2 = inlined_call_operand.vmem [shape: f32[512,128], index: 2, kind: output, shape index: {0}]   ;;  %s1044_s3 = inlined_call_operand.vmem [shape: f32[2,2,128], index: 3, kind: output, shape index: {1}]  }
   0x1 LB: > { %s845_s13 = sadd.s32 4294967295, %s817_s12   ;;  %p691_p0 = scmp.ge.s32.totalorder %s817_s12, 1  ;;  %s817_s12 = sphi %s839_s12, %s14_s12  }
   0x2   : > { %p141_p1 = scmp.lt.s32.totalorder %s817_s12, 3 }
   0x4   : > { %p142_p2 = pnand %p691_p0, %p141_p1 }
   0x5   : > { %v803_v0 = vld [vmem:[%s1042_s1] sm:$0xff] (!%p142_p2)   ;;  %s692_s16 = sshll.u32 (!%p142_p2), %s845_s13, 5  ;;  %v804_v1 = vld [vmem:[%s1042_s1 + $0x8] sm:$0xff] (!%p142_p2)   ;;  %v805_v2 = vld [vmem:[%s1042_s1 + $0x10] sm:$0xff] (!%p142_p2)   ;;  %p181_p4 = scmp.lt.s32.totalorder (!%p142_p2), %s845_s13, 1  ;;  %vm597_vm0 = vcmask (!%p142_p2), 1040384  }
   0x6   : > { %145 = sbr.rel (%p142_p2) target bundleno = 331 (0x14b), region = 28  ;;  %p170_p3 = scmp.lt.s32.totalorder (!%p142_p2), %s692_s16, 63  ;;  %731 = vmatprep.subr.bf16.mxu0 (!%p142_p2), %v803_v0  ;;  %779 = vmatprep.subr.bf16.mxu1 (!%p142_p2), %v803_v0  ;;  %v806_v3 = vld [vmem:[%s1042_s1 + $0x18] sm:$0xff] (!%p142_p2)   ;;  %v807_v7 = vld [vmem:[%s1042_s1 + $0x20] sm:$0xff] (!%p142_p2)   ;;  %v808_v11 = vld [vmem:[%s1042_s1 + $0x28] sm:$0xff] (!%p142_p2)  }
   0x7   : > { %732 = vmatpush3.bf16.msra.mxu0 (!%p142_p2), %v803_v0  ;;  %787 = vmatpush3.bf16.msra.mxu1 (!%p142_p2), %v803_v0  ;;  %v809_v12 = vld [vmem:[%s1042_s1 + $0x30] sm:$0xff] (!%p142_p2)   ;;  %v810_v13 = vld [vmem:[%s1042_s1 + $0x38] sm:$0xff] (!%p142_p2)  }
   0x8   : > { %733 = vmatprep.subr.bf16.mxu0 (!%p142_p2), %v804_v1  ;;  %780 = vmatprep.subr.bf16.mxu1 (!%p142_p2), %v804_v1 }
   0xb   : > { %734 = vmatpush3.bf16.msra.mxu0 (!%p142_p2), %v804_v1  ;;  %788 = vmatpush3.bf16.msra.mxu1 (!%p142_p2), %v804_v1 }
   0xc   : > { %735 = vmatprep.subr.bf16.mxu0 (!%p142_p2), %v805_v2  ;;  %781 = vmatprep.subr.bf16.mxu1 (!%p142_p2), %v805_v2 }
   0xd   : > { %s1046_s16 = smov (!%p170_p3, %s692_s16), 63  ;;  %s1048_s13 = smov (!%p181_p4, %s845_s13), 1 }
   0xe   : > { %s693_s21 = sshll.u32 %s1046_s16, 3  ;;  %s696_s11 = sshll.u32 %s1048_s13, 1 }
   0xf   : > { %s867_s24 = scalar_lea.vmem %s1041_s0, %s693_s21  ;;  %736 = vmatpush3.bf16.msra.mxu0 %v805_v2  ;;  %789 = vmatpush3.bf16.msra.mxu1 %v805_v2  ;;  %s921_s10 = scalar_lea.vmem %s1043_s2, %s693_s21 }
  0x10   : > { %v186_v4 = vld [vmem:[%s867_s24] sm:$0xff]  ;;  %v187_v5 = vld [vmem:[%s867_s24 + $0x8] sm:$0xff]  ;;  %737 = vmatprep.subr.bf16.mxu0 %v806_v3  ;;  %782 = vmatprep.subr.bf16.mxu1 %v806_v3  ;;  %v188_v14 = vld [vmem:[%s867_s24 + $0x10] sm:$0xff]  ;;  %s184_s16 = scalar_lea.vmem %s1044_s3, %s696_s11 }
  0x11   : > { %v218_v6 = vpack.c.bf16 %v187_v5, %v186_v4  ;;  %v202_v8 = vld [vmem:[%s867_s24 + $0x80] sm:$0xff]  ;;  %v203_v9 = vld [vmem:[%s867_s24 + $0x88] sm:$0xff]  ;;  %v189_v15 = vld [vmem:[%s867_s24 + $0x18] sm:$0xff] }
  0x12   : > { %v226_v10 = vpack.c.bf16 %v203_v9, %v202_v8  ;;  %v190_v16 = vld [vmem:[%s867_s24 + $0x20] sm:$0xff]  ;;  %v191_v17 = vld [vmem:[%s867_s24 + $0x28] sm:$0xff]  ;;  %v204_v18 = vld [vmem:[%s867_s24 + $0x90] sm:$0xff]  ;;  %v219_v22 = vpack.c.bf16 %v189_v15, %v188_v14 }
  0x13   : > { %747 = vmatprep.mubr.bf16.mxu0 %v218_v6  ;;  %738 = vmatpush3.bf16.msra.mxu0 %v806_v3  ;;  %v205_v19 = vld [vmem:[%s867_s24 + $0x98] sm:$0xff]  ;;  %v206_v20 = vld [vmem:[%s867_s24 + $0xa0] sm:$0xff]  ;;  %v207_v21 = vld [vmem:[%s867_s24 + $0xa8] sm:$0xff]  ;;  %v220_v23 = vpack.c.bf16 %v191_v17, %v190_v16 }
  0x14   : > { %739 = vmatprep.subr.bf16.mxu0 %v807_v7  ;;  %790 = vmatpush3.bf16.msra.mxu1 %v806_v3  ;;  %v227_v24 = vpack.c.bf16 %v205_v19, %v204_v18  ;;  %v228_v25 = vpack.c.bf16 %v207_v21, %v206_v20  ;;  %v192_v26 = vld [vmem:[%s867_s24 + $0x30] sm:$0xff]  ;;  %v193_v27 = vld [vmem:[%s867_s24 + $0x38] sm:$0xff]  ;;  %v194_v28 = vld [vmem:[%s867_s24 + $0x40] sm:$0xff] }
  0x15   : > { %783 = vmatprep.subr.bf16.mxu1 %v807_v7  ;;  %763 = vmatprep.mubr.bf16.mxu1 %v226_v10  ;;  %v195_v29 = vld [vmem:[%s867_s24 + $0x48] sm:$0xff]  ;;  %v208_v30 = vld [vmem:[%s867_s24 + $0xb0] sm:$0xff]  ;;  %v209_v31 = vld [vmem:[%s867_s24 + $0xb8] sm:$0xff]  ;;  %v221_v34 = vpack.c.bf16 %v193_v27, %v192_v26 }
  0x16   : > { %v210_v32 = vld [vmem:[%s867_s24 + $0xc0] sm:$0xff]  ;;  %v211_v33 = vld [vmem:[%s867_s24 + $0xc8] sm:$0xff]  ;;  %v222_v35 = vpack.c.bf16 %v195_v29, %v194_v28  ;;  %v229_v36 = vpack.c.bf16 %v209_v31, %v208_v30  ;;  %v196_v38 = vld [vmem:[%s867_s24 + $0x50] sm:$0xff] }
  0x17   : > { %740 = vmatpush3.bf16.msra.mxu0 %v807_v7  ;;  %v230_v37 = vpack.c.bf16 %v211_v33, %v210_v32  ;;  %v197_v39 = vld [vmem:[%s867_s24 + $0x58] sm:$0xff]  ;;  %v198_v40 = vld [vmem:[%s867_s24 + $0x60] sm:$0xff]  ;;  %v199_v41 = vld [vmem:[%s867_s24 + $0x68] sm:$0xff] }
  0x18   : > { %741 = vmatprep.subr.bf16.mxu0 %v808_v11  ;;  %791 = vmatpush3.bf16.msra.mxu1 %v807_v7  ;;  %v212_v42 = vld [vmem:[%s867_s24 + $0xd0] sm:$0xff]  ;;  %v213_v43 = vld [vmem:[%s867_s24 + $0xd8] sm:$0xff]  ;;  %v214_v44 = vld [vmem:[%s867_s24 + $0xe0] sm:$0xff]  ;;  %v223_v46 = vpack.c.bf16 %v197_v39, %v196_v38  ;;  %v224_v47 = vpack.c.bf16 %v199_v41, %v198_v40 }
  0x19   : > { %784 = vmatprep.subr.bf16.mxu1 %v808_v11  ;;  %v215_v45 = vld [vmem:[%s867_s24 + $0xe8] sm:$0xff]  ;;  %v231_v48 = vpack.c.bf16 %v213_v43, %v212_v42  ;;  %v200_v50 = vld [vmem:[%s867_s24 + $0x70] sm:$0xff]  ;;  %v201_v51 = vld [vmem:[%s867_s24 + $0x78] sm:$0xff] }
  0x1a   : > { %v232_v49 = vpack.c.bf16 %v215_v45, %v214_v44  ;;  %v216_v52 = vld [vmem:[%s867_s24 + $0xf0] sm:$0xff]  ;;  %v217_v53 = vld [vmem:[%s867_s24 + $0xf8] sm:$0xff]  ;;  %v225_v54 = vpack.c.bf16 %v201_v51, %v200_v50 }
  0x1b   : > { %742 = vmatpush3.bf16.msra.mxu0 %v808_v11  ;;  %v233_v55 = vpack.c.bf16 %v217_v53, %v216_v52 }
  0x1c   : > { %743 = vmatprep.subr.bf16.mxu0 %v809_v12  ;;  %792 = vmatpush3.bf16.msra.mxu1 %v808_v11 }
  0x1d   : > { %785 = vmatprep.subr.bf16.mxu1 %v809_v12 }
  0x1f   : > { %744 = vmatpush3.bf16.msra.mxu0 %v809_v12 }
  0x20   : > { %745 = vmatprep.subr.bf16.mxu0 %v810_v13  ;;  %793 = vmatpush3.bf16.msra.mxu1 %v809_v12 }
  0x21   : > { %786 = vmatprep.subr.bf16.mxu1 %v810_v13 }
  0x23   : > { %746 = vmatpush3.bf16.msra.mxu0 %v810_v13 }
  0x24   : > { %794 = vmatpush3.bf16.msra.mxu1 %v810_v13 }
  0x26   : > { %748 = vmatmul.mubr.bf16.vlgmr.msra.gmra.mrb[0].mxu0 %v219_v22 }
  0x27   : > { %751 = vmatprep.mubr.bf16.mxu0 %v220_v23  ;;  %764 = vmatmul.mubr.bf16.vlgmr.msra.gmra.mrb[0].mxu1 %v227_v24 }
  0x28   : > { %767 = vmatprep.mubr.bf16.mxu1 %v228_v25 }
  0x2e   : > { %752 = vmatmul.mubr.bf16.gmra.mrb[4].mxu0 %v221_v34 }
  0x2f   : > { %755 = vmatprep.mubr.bf16.mxu0 %v222_v35  ;;  %768 = vmatmul.mubr.bf16.gmra.mrb[4].mxu1 %v229_v36 }
  0x30   : > { %771 = vmatprep.mubr.bf16.mxu1 %v230_v37 }
  0x36   : > { %756 = vmatmul.mubr.bf16.gmra.mrb[8].mxu0 %v223_v46 }
  0x37   : > { %759 = vmatprep.mubr.bf16.mxu0 %v224_v47  ;;  %772 = vmatmul.mubr.bf16.gmra.mrb[8].mxu1 %v231_v48 }
  0x38   : > { %775 = vmatprep.mubr.bf16.mxu1 %v232_v49 }
  0x3e   : > { %760 = vmatmul.mubr.bf16.gmra.mrb[12].mxu0 %v225_v54 }
  0x3f   : > { %776 = vmatmul.mubr.bf16.gmra.mrb[12].mxu1 %v233_v55 }
  0xf9   : > { %v749_v56 = vpop.f32.mrb[0].mxu0 }
  0xfa   : > { %461 = vst [vmem:[%s921_s10 + $0x10] sm:$0xff] %v749_v56  ;;  %v332_v57 = vpop.f32.mrb[1].mxu0  ;;  %v924_v58 = vpop.f32.mrb[0].mxu1  ;;  %v530_v3 = vmul.f32 %v749_v56, %v749_v56 }
  0xfb   : > { %459 = vst [vmem:[%s921_s10] sm:$0xff] %v332_v57  ;;  %v750_v59 = vpop.f32.mrb[2].mxu0  ;;  %477 = vst [vmem:[%s921_s10 + $0x90] sm:$0xff] %v924_v58  ;;  %v929_v60 = vpop.f32.mrb[1].mxu1  ;;  %v528_v63 = vmul.f32 %v332_v57, %v332_v57 }
  0xfc   : > { %462 = vst [vmem:[%s921_s10 + $0x18] sm:$0xff] %v750_v59  ;;  %v335_v61 = vpop.f32.mrb[3].mxu0  ;;  %475 = vst [vmem:[%s921_s10 + $0x80] sm:$0xff] %v929_v60  ;;  %v934_v62 = vpop.f32.mrb[2].mxu1  ;;  %v531_v6 = vmul.f32 %v750_v59, %v750_v59 }
  0xfd   : > { %460 = vst [vmem:[%s921_s10 + $0x8] sm:$0xff] %v335_v61  ;;  %v491_v0 = vadd.f32 %v335_v61, %v332_v57  ;;  %v529_v1 = vmul.f32 %v335_v61, %v335_v61  ;;  %478 = vst [vmem:[%s921_s10 + $0x98] sm:$0xff] %v934_v62  ;;  %v939_v2 = vpop.f32.mrb[3].mxu1 }
  0xfe   : > { %476 = vst [vmem:[%s921_s10 + $0x88] sm:$0xff] %v939_v2 }
  0xff   : > { %v492_v4 = vadd.f32 %v749_v56, %v491_v0  ;;  %v560_v5 = vadd.f32 %v529_v1, %v528_v63 }
 0x101   : > { %v561_v7 = vadd.f32 %v560_v5, %v530_v3  ;;  %v753_v8 = vpop.f32.mrb[4].mxu0  ;;  %v493_v9 = vadd.f32 %v750_v59, %v492_v4 }
 0x102   : > { %465 = vst [vmem:[%s921_s10 + $0x30] sm:$0xff] %v753_v8  ;;  %v348_v10 = vpop.f32.mrb[5].mxu0  ;;  %v944_v11 = vpop.f32.mrb[4].mxu1  ;;  %v534_v23 = vmul.f32 %v753_v8, %v753_v8 }
 0x103   : > { %463 = vst [vmem:[%s921_s10 + $0x20] sm:$0xff] %v348_v10  ;;  %v494_v12 = vadd.f32 %v493_v9, %v348_v10  ;;  %v532_v13 = vmul.f32 %v348_v10, %v348_v10  ;;  %v562_v14 = vadd.f32 %v561_v7, %v531_v6  ;;  %v754_v15 = vpop.f32.mrb[6].mxu0  ;;  %481 = vst [vmem:[%s921_s10 + $0xb0] sm:$0xff] %v944_v11  ;;  %v949_v16 = vpop.f32.mrb[5].mxu1 }
 0x104   : > { %466 = vst [vmem:[%s921_s10 + $0x38] sm:$0xff] %v754_v15  ;;  %v351_v17 = vpop.f32.mrb[7].mxu0  ;;  %479 = vst [vmem:[%s921_s10 + $0xa0] sm:$0xff] %v949_v16  ;;  %v954_v18 = vpop.f32.mrb[6].mxu1  ;;  %v535_v26 = vmul.f32 %v754_v15, %v754_v15  ;;  %v544_v9 = vmul.f32 %v929_v60, %v929_v60 }
 0x105   : > { %v563_v19 = vadd.f32 %v562_v14, %v532_v13  ;;  %464 = vst [vmem:[%s921_s10 + $0x28] sm:$0xff] %v351_v17  ;;  %v495_v20 = vadd.f32 %v494_v12, %v351_v17  ;;  %v533_v21 = vmul.f32 %v351_v17, %v351_v17  ;;  %482 = vst [vmem:[%s921_s10 + $0xb8] sm:$0xff] %v954_v18  ;;  %v959_v22 = vpop.f32.mrb[7].mxu1 }
 0x106   : > { %480 = vst [vmem:[%s921_s10 + $0xa8] sm:$0xff] %v959_v22  ;;  %v546_v17 = vmul.f32 %v924_v58, %v924_v58 }
 0x107   : > { %v496_v24 = vadd.f32 %v753_v8, %v495_v20  ;;  %v564_v25 = vadd.f32 %v563_v19, %v533_v21  ;;  %v547_v21 = vmul.f32 %v934_v62, %v934_v62 }
 0x109   : > { %v565_v27 = vadd.f32 %v564_v25, %v534_v23  ;;  %v757_v28 = vpop.f32.mrb[8].mxu0  ;;  %v497_v29 = vadd.f32 %v754_v15, %v496_v24  ;;  %v545_v15 = vmul.f32 %v939_v2, %v939_v2 }
 0x10a   : > { %469 = vst [vmem:[%s921_s10 + $0x50] sm:$0xff] %v757_v28  ;;  %v364_v30 = vpop.f32.mrb[9].mxu0  ;;  %v964_v31 = vpop.f32.mrb[8].mxu1  ;;  %v538_v43 = vmul.f32 %v757_v28, %v757_v28 }
 0x10b   : > { %467 = vst [vmem:[%s921_s10 + $0x40] sm:$0xff] %v364_v30  ;;  %v498_v32 = vadd.f32 %v497_v29, %v364_v30  ;;  %v536_v33 = vmul.f32 %v364_v30, %v364_v30  ;;  %v566_v34 = vadd.f32 %v565_v27, %v535_v26  ;;  %v758_v35 = vpop.f32.mrb[10].mxu0  ;;  %485 = vst [vmem:[%s921_s10 + $0xd0] sm:$0xff] %v964_v31  ;;  %v969_v36 = vpop.f32.mrb[9].mxu1 }
 0x10c   : > { %470 = vst [vmem:[%s921_s10 + $0x58] sm:$0xff] %v758_v35  ;;  %v367_v37 = vpop.f32.mrb[11].mxu0  ;;  %483 = vst [vmem:[%s921_s10 + $0xc0] sm:$0xff] %v969_v36  ;;  %v974_v38 = vpop.f32.mrb[10].mxu1  ;;  %v539_v46 = vmul.f32 %v758_v35, %v758_v35 }
 0x10d   : > { %v567_v39 = vadd.f32 %v566_v34, %v536_v33  ;;  %468 = vst [vmem:[%s921_s10 + $0x48] sm:$0xff] %v367_v37  ;;  %v499_v40 = vadd.f32 %v498_v32, %v367_v37  ;;  %v537_v41 = vmul.f32 %v367_v37, %v367_v37  ;;  %486 = vst [vmem:[%s921_s10 + $0xd8] sm:$0xff] %v974_v38  ;;  %v979_v42 = vpop.f32.mrb[11].mxu1 }
 0x10e   : > { %484 = vst [vmem:[%s921_s10 + $0xc8] sm:$0xff] %v979_v42 }
 0x10f   : > { %v500_v44 = vadd.f32 %v757_v28, %v499_v40  ;;  %v568_v45 = vadd.f32 %v567_v39, %v537_v41  ;;  %v549_v28 = vmul.f32 %v959_v22, %v959_v22  ;;  %v553_v39 = vmul.f32 %v979_v42, %v979_v42 }
 0x111   : > { %v569_v47 = vadd.f32 %v568_v45, %v538_v43  ;;  %v761_v48 = vpop.f32.mrb[12].mxu0  ;;  %v501_v49 = vadd.f32 %v758_v35, %v500_v44 }
 0x112   : > { %473 = vst [vmem:[%s921_s10 + $0x70] sm:$0xff] %v761_v48  ;;  %v380_v50 = vpop.f32.mrb[13].mxu0  ;;  %v984_v51 = vpop.f32.mrb[12].mxu1  ;;  %v542_v3 = vmul.f32 %v761_v48, %v761_v48 }
 0x113   : > { %471 = vst [vmem:[%s921_s10 + $0x60] sm:$0xff] %v380_v50  ;;  %v502_v52 = vadd.f32 %v501_v49, %v380_v50  ;;  %v540_v53 = vmul.f32 %v380_v50, %v380_v50  ;;  %v570_v54 = vadd.f32 %v569_v47, %v539_v46  ;;  %v762_v55 = vpop.f32.mrb[14].mxu0  ;;  %489 = vst [vmem:[%s921_s10 + $0xf0] sm:$0xff] %v984_v51  ;;  %v444_v56 = vpop.f32.mrb[13].mxu1 }
 0x114   : > { %474 = vst [vmem:[%s921_s10 + $0x78] sm:$0xff] %v762_v55  ;;  %v383_v57 = vpop.f32.mrb[15].mxu0  ;;  %487 = vst [vmem:[%s921_s10 + $0xe0] sm:$0xff] %v444_v56  ;;  %v778_v59 = vpop.f32.mrb[14].mxu1  ;;  %v543_v6 = vmul.f32 %v762_v55, %v762_v55  ;;  %v556_v44 = vmul.f32 %v444_v56, %v444_v56  ;;  %v558_v49 = vmul.f32 %v984_v51, %v984_v51 }
 0x115   : > { %v571_v61 = vadd.f32 %v570_v54, %v540_v53  ;;  %472 = vst [vmem:[%s921_s10 + $0x68] sm:$0xff] %v383_v57  ;;  %v503_v63 = vadd.f32 %v502_v52, %v383_v57  ;;  %v541_v0 = vmul.f32 %v383_v57, %v383_v57  ;;  %490 = vst [vmem:[%s921_s10 + $0xf8] sm:$0xff] %v778_v59  ;;  %v447_v1 = vpop.f32.mrb[15].mxu1 }
 0x116   : > { %488 = vst [vmem:[%s921_s10 + $0xe8] sm:$0xff] %v447_v1  ;;  %v559_v52 = vmul.f32 %v778_v59, %v778_v59 }
 0x117   : > { %v504_v4 = vadd.f32 %v761_v48, %v503_v63  ;;  %v572_v5 = vadd.f32 %v571_v61, %v541_v0 }
 0x119   : > { %v573_v7 = vadd.f32 %v572_v5, %v542_v3  ;;  %v505_v8 = vadd.f32 %v762_v55, %v504_v4 }
 0x11b   : > { %v506_v10 = vadd.f32 %v505_v8, %v929_v60  ;;  %v574_v12 = vadd.f32 %v573_v7, %v543_v6  ;;  %v548_v60 = vmul.f32 %v949_v16, %v949_v16 }
 0x11d   : > { %v575_v13 = vadd.f32 %v574_v12, %v544_v9  ;;  %v507_v14 = vadd.f32 %v506_v10, %v939_v2 }
 0x11f   : > { %v508_v19 = vadd.f32 %v924_v58, %v507_v14  ;;  %v576_v20 = vadd.f32 %v575_v13, %v545_v15  ;;  %v550_v58 = vmul.f32 %v944_v11, %v944_v11 }
 0x121   : > { %v577_v23 = vadd.f32 %v576_v20, %v546_v17  ;;  %v509_v24 = vadd.f32 %v934_v62, %v508_v19  ;;  %v551_v62 = vmul.f32 %v954_v18, %v954_v18 }
 0x123   : > { %v510_v25 = vadd.f32 %v509_v24, %v949_v16  ;;  %v578_v26 = vadd.f32 %v577_v23, %v547_v21  ;;  %v552_v16 = vmul.f32 %v969_v36, %v969_v36 }
 0x125   : > { %v579_v27 = vadd.f32 %v578_v26, %v548_v60  ;;  %v511_v2 = vadd.f32 %v510_v25, %v959_v22 }
 0x127   : > { %v512_v29 = vadd.f32 %v944_v11, %v511_v2  ;;  %v580_v30 = vadd.f32 %v579_v27, %v549_v28  ;;  %v554_v11 = vmul.f32 %v964_v31, %v964_v31 }
 0x129   : > { %v581_v32 = vadd.f32 %v580_v30, %v550_v58  ;;  %v513_v33 = vadd.f32 %v954_v18, %v512_v29  ;;  %v555_v18 = vmul.f32 %v974_v38, %v974_v38 }
 0x12b   : > { %v514_v34 = vadd.f32 %v513_v33, %v969_v36  ;;  %v582_v35 = vadd.f32 %v581_v32, %v551_v62 }
 0x12d   : > { %v583_v37 = vadd.f32 %v582_v35, %v552_v16  ;;  %v515_v22 = vadd.f32 %v514_v34, %v979_v42  ;;  %v557_v42 = vmul.f32 %v447_v1, %v447_v1 }
 0x12f   : > { %v516_v40 = vadd.f32 %v964_v31, %v515_v22  ;;  %v584_v41 = vadd.f32 %v583_v37, %v553_v39 }
 0x131   : > { %v585_v43 = vadd.f32 %v584_v41, %v554_v11  ;;  %v517_v36 = vadd.f32 %v974_v38, %v516_v40 }
 0x133   : > { %v518_v45 = vadd.f32 %v517_v36, %v444_v56  ;;  %v586_v46 = vadd.f32 %v585_v43, %v555_v18 }
 0x135   : > { %v587_v47 = vadd.f32 %v586_v46, %v556_v44  ;;  %v519_v48 = vadd.f32 %v518_v45, %v447_v1 }
 0x137   : > { %v520_v31 = vadd.f32 %v984_v51, %v519_v48  ;;  %v588_v50 = vadd.f32 %v587_v47, %v557_v42 }
 0x139   : > { %v521_v53 = vadd.f32 %v778_v59, %v520_v31  ;;  %v589_v54 = vadd.f32 %v588_v50, %v558_v49 }
 0x13b   : > { %v522_v55 = vrot.slane %v521_v53, 4  ;;  %v590_v57 = vadd.f32 %v589_v54, %v559_v52 }
 0x13d   : > { %v523_v38 = vadd.f32 %v522_v55, %v521_v53  ;;  %v591_v61 = vrot.slane %v590_v57, 4 }
 0x13f   : > { %v524_v56 = vrot.slane %v523_v38, 2  ;;  %v592_v63 = vadd.f32 %v591_v61, %v590_v57 }
 0x141   : > { %v525_v0 = vadd.f32 %v524_v56, %v523_v38  ;;  %v593_v3 = vrot.slane %v592_v63, 2 }
 0x143   : > { %v526_v1 = vrot.slane %v525_v0, 1  ;;  %v594_v4 = vadd.f32 %v593_v3, %v592_v63 }
 0x145   : > { %v595_v5 = vrot.slane %v594_v4, 1  ;;  %v527_v51 = vadd.f32 %v526_v1, %v525_v0 }
 0x147   : > { %v596_v59 = vadd.f32 %v595_v5, %v594_v4 }
 0x149   : > { %v598_v6 = vsel %vm597_vm0, %v527_v51, %v596_v59 }
 0x14a   : > { %599 = vst [vmem:[%s184_s16] sm:$0x3] %v598_v6 }
 0x14b PF: > { %s14_s12 = sadd.s32 1, %s817_s12  }
 0x14c   : > { %p11_p5 = scmp.ge.s32.totalorder %s14_s12, 4  }
 0x14e   :  { %13 = sbr.rel (!%p11_p5) target bundleno = 1 (0x1), region = 70 }

// kernel: mbconv_forward.7
= control target key start
LH: loop header
LB: loop body
LE: loop exit
PB: predicated region body
PF: predicated region fallthrough
CT: control target
= control target key end

     0   :  { %s1119_s18 = smov 0   ;;  %s1467_s0 = inlined_call_operand.vmem [shape: f32[2,256,128], index: 0, kind: input, shape index: {}]   ;;  %s1468_s1 = inlined_call_operand.vmem [shape: f32[1,128], index: 1, kind: input, shape index: {}]   ;;  %s1469_s2 = inlined_call_operand.vmem [shape: f32[1,128], index: 2, kind: input, shape index: {}]   ;;  %s1470_s3 = inlined_call_operand.vmem [shape: bf16[128,128], index: 3, kind: input, shape index: {}]   ;;  %s1471_s4 = inlined_call_operand.vmem [shape: bf16[128,128], index: 4, kind: input, shape index: {}]   ;;  %s1472_s5 = inlined_call_operand.vmem [shape: f32[2,1,128], index: 5, kind: output, shape index: {}]  }
   0x1 LB: > { %s831_s19 = sadd.s32 4294967295, %s1085_s18   ;;  %p835_p0 = scmp.ge.s32.totalorder %s1085_s18, 1  ;;  %s1085_s18 = sphi %s1119_s18, %s15_s18  }
   0x2   : > { %p187_p1 = scmp.lt.s32.totalorder %s1085_s18, 3 }
   0x4   : > { %p188_p2 = pnand %p835_p0, %p187_p1 }
   0x5   : > { %v927_v0 = vld [vmem:[%s1470_s3] sm:$0xff] (!%p188_p2)   ;;  %v1087_v1 = vmov (!%p188_p2), 0.0   ;;  %v928_v2 = vld [vmem:[%s1470_s3 + $0x8] sm:$0xff] (!%p188_p2)   ;;  %vm1088_vm0 = vmmov (!%p188_p2), 0   ;;  %v929_v3 = vld [vmem:[%s1470_s3 + $0x10] sm:$0xff] (!%p188_p2)   ;;  %p213_p3 = scmp.lt.s32.totalorder (!%p188_p2), %s831_s19, 1 }
   0x6   : > { %191 = sbr.rel (%p188_p2) target bundleno = 620 (0x26c), region = 40  ;;  %877 = vmatprep.subr.bf16.mxu0 (!%p188_p2), %v1087_v1  ;;  %897 = vmatprep.subr.bf16.mxu1 (!%p188_p2), %v1087_v1  ;;  %v930_v4 = vld [vmem:[%s1470_s3 + $0x18] sm:$0xff] (!%p188_p2)   ;;  %v931_v5 = vld [vmem:[%s1470_s3 + $0x20] sm:$0xff] (!%p188_p2)   ;;  %v932_v6 = vld [vmem:[%s1470_s3 + $0x28] sm:$0xff] (!%p188_p2)  }
   0x7   : > { %878 = vmatpush3.bf16.msra.mxu0 (!%p188_p2), %v927_v0  ;;  %893 = vmatprep.mubr.msk.bf16.mxu0 (!%p188_p2), %vm1088_vm0, %v1087_v1  ;;  %v933_v7 = vld [vmem:[%s1470_s3 + $0x30] sm:$0xff] (!%p188_p2)   ;;  %v934_v8 = vld [vmem:[%s1470_s3 + $0x38] sm:$0xff] (!%p188_p2)   ;;  %v1178_v10 = vld [vmem:[%s1468_s1] ss:$0 sm:$0xff] (!%p188_p2) }
   0x8   : > { %879 = vmatprep.subr.bf16.mxu0 (!%p188_p2), %v1087_v1  ;;  %913 = vmatprep.mubr.msk.bf16.mxu1 (!%p188_p2), %vm1088_vm0, %v1087_v1  ;;  %v1189_v17 = vld [vmem:[%s1469_s2] ss:$0 sm:$0xff] (!%p188_p2) }
   0xb   : > { %880 = vmatpush3.bf16.msra.mxu0 (!%p188_p2), %v928_v2 }
   0xc   : > { %881 = vmatprep.subr.bf16.mxu0 (!%p188_p2), %v1087_v1 }
   0xd   : > { %s1474_s19 = smov (!%p213_p3, %s831_s19), 1 }
   0xe   : > { %s858_s11 = sshll.u32 %s1474_s19, 8 }
   0xf   : > { %882 = vmatpush3.bf16.msra.mxu0 %v929_v3  ;;  %s1172_s14 = scalar_lea.vmem %s1467_s0, %s858_s11 }
  0x10   : > { %883 = vmatprep.subr.bf16.mxu0 %v1087_v1  ;;  %v222_v9 = vld [vmem:[%s1172_s14] sm:$0xff]  ;;  %v223_v11 = vld [vmem:[%s1172_s14 + $0x8] sm:$0xff]  ;;  %v224_v12 = vld [vmem:[%s1172_s14 + $0x10] sm:$0xff] }
  0x11   : > { %v225_v13 = vld [vmem:[%s1172_s14 + $0x18] sm:$0xff]  ;;  %v261_v14 = vmul.f32 %v1178_v10, %v222_v9  ;;  %v226_v15 = vld [vmem:[%s1172_s14 + $0x20] sm:$0xff]  ;;  %v262_v16 = vmul.f32 %v1178_v10, %v223_v11  ;;  %v227_v18 = vld [vmem:[%s1172_s14 + $0x28] sm:$0xff]  ;;  %v263_v19 = vmul.f32 %v1178_v10, %v224_v12 }
  0x12   : > { %v264_v20 = vmul.f32 %v1178_v10, %v225_v13  ;;  %v228_v21 = vld [vmem:[%s1172_s14 + $0x30] sm:$0xff]  ;;  %v265_v22 = vmul.f32 %v1178_v10, %v226_v15  ;;  %v266_v24 = vmul.f32 %v1178_v10, %v227_v18  ;;  %v229_v26 = vld [vmem:[%s1172_s14 + $0x38] sm:$0xff]  ;;  %v230_v30 = vld [vmem:[%s1172_s14 + $0x40] sm:$0xff] }
  0x13   : > { %884 = vmatpush3.bf16.msra.mxu0 %v930_v4  ;;  %v1197_v23 = vadd.f32 %v1189_v17, %v261_v14  ;;  %v1201_v25 = vadd.f32 %v1189_v17, %v262_v16  ;;  %v1205_v27 = vadd.f32 %v1189_v17, %v263_v19  ;;  %v267_v28 = vmul.f32 %v1178_v10, %v228_v21  ;;  %v231_v33 = vld [vmem:[%s1172_s14 + $0x48] sm:$0xff]  ;;  %v232_v37 = vld [vmem:[%s1172_s14 + $0x50] sm:$0xff]  ;;  %v233_v39 = vld [vmem:[%s1172_s14 + $0x58] sm:$0xff] }
  0x14   : > { %885 = vmatprep.subr.bf16.mxu0 %v1087_v1  ;;  %v1209_v29 = vadd.f32 %v1189_v17, %v264_v20  ;;  %v1213_v31 = vadd.f32 %v1189_v17, %v265_v22  ;;  %v268_v34 = vmul.f32 %v1178_v10, %v229_v26  ;;  %v1219_v35 = vadd.f32 %v1189_v17, %v266_v24  ;;  %v234_v43 = vld [vmem:[%s1172_s14 + $0x60] sm:$0xff]  ;;  %v235_v47 = vld [vmem:[%s1172_s14 + $0x68] sm:$0xff]  ;;  %v237_v11 = vld [vmem:[%s1172_s14 + $0x78] sm:$0xff] }
  0x15   : > { %v332_v32 = vsub.f32 0.0, %v1197_v23  ;;  %v333_v36 = vsub.f32 0.0, %v1201_v25  ;;  %v334_v38 = vsub.f32 0.0, %v1205_v27  ;;  %v269_v40 = vmul.f32 %v1178_v10, %v230_v30  ;;  %v238_v16 = vld [vmem:[%s1172_s14 + $0x80] sm:$0xff]  ;;  %v239_v20 = vld [vmem:[%s1172_s14 + $0x88] sm:$0xff]  ;;  %v240_v26 = vld [vmem:[%s1172_s14 + $0x90] sm:$0xff] }
  0x16   : > { %v1227_v41 = vadd.f32 %v1189_v17, %v267_v28  ;;  %v335_v42 = vsub.f32 0.0, %v1209_v29  ;;  %v270_v44 = vmul.f32 %v1178_v10, %v231_v33  ;;  %v336_v45 = vsub.f32 0.0, %v1213_v31  ;;  %v242_v33 = vld [vmem:[%s1172_s14 + $0xa0] sm:$0xff] }
  0x17   : > { %886 = vmatpush3.bf16.msra.mxu0 %v931_v5  ;;  %v364_v46 = vmul.f32 1.442695, %v332_v32  ;;  %v271_v48 = vmul.f32 %v1178_v10, %v232_v37  ;;  %v1236_v49 = vadd.f32 %v1189_v17, %v268_v34  ;;  %v337_v50 = vsub.f32 0.0, %v1219_v35  ;;  %v236_v5 = vld [vmem:[%s1172_s14 + $0x70] sm:$0xff]  ;;  %v241_v32 = vld [vmem:[%s1172_s14 + $0x98] sm:$0xff] }
  0x18   : > { %887 = vmatprep.subr.bf16.mxu0 %v1087_v1  ;;  %v366_v51 = vmul.f32 1.442695, %v333_v36  ;;  %v272_v52 = vmul.f32 %v1178_v10, %v233_v39  ;;  %v368_v53 = vmul.f32 1.442695, %v334_v38  ;;  %v273_v54 = vmul.f32 %v1178_v10, %v234_v43  ;;  %v243_v43 = vld [vmem:[%s1172_s14 + $0xa8] sm:$0xff] }
  0x19   : > { %v1242_v55 = vadd.f32 %v1189_v17, %v269_v40  ;;  %v338_v56 = vsub.f32 0.0, %v1227_v41  ;;  %v370_v57 = vmul.f32 1.442695, %v335_v42  ;;  %v274_v58 = vmul.f32 %v1178_v10, %v235_v47 }
  0x1a   : > { %v1247_v59 = vadd.f32 %v1189_v17, %v270_v44  ;;  %943 = vpow2.f32 %v364_v46  ;;  %v372_v60 = vmul.f32 1.442695, %v336_v45  ;;  %v1250_v61 = vadd.f32 %v1189_v17, %v271_v48  ;;  %v244_v44 = vld [vmem:[%s1172_s14 + $0xb0] sm:$0xff] }
  0x1b   : > { %888 = vmatpush3.bf16.msra.mxu0 %v932_v6  ;;  %v339_v62 = vsub.f32 0.0, %v1236_v49  ;;  %945 = vpow2.f32 %v366_v51  ;;  %v374_v63 = vmul.f32 1.442695, %v337_v50  ;;  %v1254_v0 = vadd.f32 %v1189_v17, %v272_v52 }
  0x1c   : > { %889 = vmatprep.subr.bf16.mxu0 %v1087_v1  ;;  %947 = vpow2.f32 %v368_v53  ;;  %v1257_v2 = vadd.f32 %v1189_v17, %v273_v54  ;;  %v340_v3 = vsub.f32 0.0, %v1242_v55  ;;  %v376_v4 = vmul.f32 1.442695, %v338_v56  ;;  %v245_v54 = vld [vmem:[%s1172_s14 + $0xb8] sm:$0xff]  ;;  %v246_v56 = vld [vmem:[%s1172_s14 + $0xc0] sm:$0xff] }
  0x1d   : > { %949 = vpow2.f32 %v370_v57  ;;  %v1262_v6 = vadd.f32 %v1189_v17, %v274_v58  ;;  %v378_v9 = vmul.f32 1.442695, %v339_v62  ;;  %v343_v12 = vsub.f32 0.0, %v1254_v0 }
  0x1e   : > { %951 = vpow2.f32 %v372_v60  ;;  %v275_v13 = vmul.f32 %v1178_v10, %v236_v5  ;;  %v344_v14 = vsub.f32 0.0, %v1257_v2  ;;  %v380_v15 = vmul.f32 1.442695, %v340_v3  ;;  %v247_v5 = vld [vmem:[%s1172_s14 + $0xc8] sm:$0xff] }
  0x1f   : > { %890 = vmatpush3.bf16.msra.mxu0 %v933_v7  ;;  %v341_v7 = vsub.f32 0.0, %v1247_v59  ;;  %953 = vpow2.f32 %v374_v63  ;;  %v345_v18 = vsub.f32 0.0, %v1262_v6  ;;  %v276_v21 = vmul.f32 %v1178_v10, %v237_v11 }
  0x20   : > { %891 = vmatprep.subr.bf16.mxu0 %v1087_v1  ;;  %955 = vpow2.f32 %v376_v4  ;;  %v386_v28 = vmul.f32 1.442695, %v343_v12  ;;  %v277_v34 = vmul.f32 %v1178_v10, %v238_v16  ;;  %v1279_v36 = vadd.f32 %v1189_v17, %v275_v13  ;;  %v249_v16 = vld [vmem:[%s1172_s14 + $0xd8] sm:$0xff] }
  0x21   : > { %v382_v19 = vmul.f32 1.442695, %v341_v7  ;;  %957 = vpow2.f32 %v378_v9  ;;  %v388_v37 = vmul.f32 1.442695, %v344_v14  ;;  %v278_v39 = vmul.f32 %v1178_v10, %v239_v20  ;;  %v248_v7 = vld [vmem:[%s1172_s14 + $0xd0] sm:$0xff] }
  0x22   : > { %959 = vpow2.f32 %v380_v15  ;;  %v390_v40 = vmul.f32 1.442695, %v345_v18  ;;  %v279_v45 = vmul.f32 %v1178_v10, %v240_v26  ;;  %v1286_v46 = vadd.f32 %v1189_v17, %v276_v21  ;;  %v250_v18 = vld [vmem:[%s1172_s14 + $0xe0] sm:$0xff] }
  0x23   : > { %892 = vmatpush3.bf16.msra.mxu0 %v934_v8  ;;  %v342_v8 = vsub.f32 0.0, %v1250_v61  ;;  %961 = vpow2.f32 %v382_v19  ;;  %v280_v50 = vmul.f32 %v1178_v10, %v241_v32  ;;  %v281_v51 = vmul.f32 %v1178_v10, %v242_v33  ;;  %v252_v32 = vld [vmem:[%s1172_s14 + $0xf0] sm:$0xff] }
  0x24   : > { %v944_v24 = vpop.eup %943  ;;  %v1293_v57 = vadd.f32 %v1189_v17, %v277_v34  ;;  %v346_v58 = vsub.f32 0.0, %v1279_v36  ;;  %v282_v62 = vmul.f32 %v1178_v10, %v243_v43  ;;  %v283_v63 = vmul.f32 %v1178_v10, %v244_v44  ;;  %v253_v44 = vld [vmem:[%s1172_s14 + $0xf8] sm:$0xff] }
  0x25   : > { %v384_v22 = vmul.f32 1.442695, %v342_v8  ;;  %v946_v30 = vpop.eup %945  ;;  %v428_v47 = vadd.f32 1.0, %v944_v24  ;;  %v1301_v8 = vadd.f32 %v1189_v17, %v278_v39  ;;  %v347_v9 = vsub.f32 0.0, %v1286_v46 }
  0x26   : > { %v948_v38 = vpop.eup %947  ;;  %v429_v52 = vadd.f32 1.0, %v946_v30  ;;  %v284_v12 = vmul.f32 %v1178_v10, %v245_v54  ;;  %v285_v13 = vmul.f32 %v1178_v10, %v246_v56  ;;  %v1309_v19 = vadd.f32 %v1189_v17, %v279_v45  ;;  %v251_v30 = vld [vmem:[%s1172_s14 + $0xe8] sm:$0xff]  ;;  %s220_s14 = scalar_lea.vmem %s1472_s5, %s1474_s19 }
  0x27   : > { %v950_v42 = vpop.eup %949  ;;  %963 = vpow2.f32 %v384_v22  ;;  %v430_v60 = vadd.f32 1.0, %v948_v38  ;;  %v348_v20 = vsub.f32 0.0, %v1293_v57  ;;  %v392_v21 = vmul.f32 1.442695, %v346_v58 }
  0x28   : > { %v952_v48 = vpop.eup %951  ;;  %965 = vpow2.f32 %v386_v28  ;;  %v431_v3 = vadd.f32 1.0, %v950_v42  ;;  %v1313_v22 = vmul.f32 %v1178_v10, %v247_v5  ;;  %v1316_v24 = vmul.f32 %v1178_v10, %v248_v7 }
  0x29   : > { %v954_v53 = vpop.eup %953  ;;  %967 = vpow2.f32 %v388_v37  ;;  %v432_v11 = vadd.f32 1.0, %v952_v48  ;;  %v1321_v33 = vadd.f32 %v1189_v17, %v280_v50  ;;  %v349_v34 = vsub.f32 0.0, %v1301_v8 }
  0x2a   : > { %969 = vpow2.f32 %v390_v40  ;;  %v956_v4 = vpop.eup %955  ;;  %v433_v14 = vadd.f32 1.0, %v954_v53  ;;  %v394_v37 = vmul.f32 1.442695, %v347_v9  ;;  %v1325_v39 = vmul.f32 %v1178_v10, %v249_v16 }
  0x2b   : > { %971 = vrcp.f32 %v428_v47  ;;  %v958_v15 = vpop.eup %957  ;;  %v434_v26 = vadd.f32 1.0, %v956_v4  ;;  %v1328_v40 = vmul.f32 %v1178_v10, %v250_v18  ;;  %v1332_v45 = vadd.f32 %v1189_v17, %v281_v51 }
  0x2c   : > { %973 = vrcp.f32 %v429_v52  ;;  %v960_v28 = vpop.eup %959  ;;  %v435_v42 = vadd.f32 1.0, %v958_v15  ;;  %v350_v47 = vsub.f32 0.0, %v1309_v19  ;;  %v396_v48 = vmul.f32 1.442695, %v348_v20 }
  0x2d   : > { %975 = vrcp.f32 %v430_v60  ;;  %v962_v38 = vpop.eup %961  ;;  %v1336_v52 = vmul.f32 %v1178_v10, %v251_v30  ;;  %v1339_v53 = vmul.f32 %v1178_v10, %v252_v32  ;;  %v436_v54 = vadd.f32 1.0, %v960_v28 }
  0x2e   : > { %977 = vrcp.f32 %v431_v3  ;;  %v1342_v58 = vadd.f32 %v1189_v17, %v282_v62  ;;  %v351_v51 = vsub.f32 0.0, %v1321_v33  ;;  %v398_v60 = vmul.f32 1.442695, %v349_v34 }
  0x2f   : > { %979 = vrcp.f32 %v432_v11  ;;  %v1346_v4 = vmul.f32 %v1178_v10, %v253_v44  ;;  %v1349_v5 = vadd.f32 %v1189_v17, %v283_v63  ;;  %v437_v7 = vadd.f32 1.0, %v962_v38 }
  0x30   : > { %981 = vrcp.f32 %v433_v14  ;;  %v1352_v11 = vadd.f32 %v1189_v17, %v284_v12  ;;  %v352_v62 = vsub.f32 0.0, %v1332_v45  ;;  %v400_v14 = vmul.f32 1.442695, %v350_v47 }
  0x31   : > { %v964_v43 = vpop.eup %963  ;;  %983 = vpow2.f32 %v392_v21  ;;  %v1356_v16 = vadd.f32 %v1189_v17, %v285_v13  ;;  %v353_v20 = vsub.f32 0.0, %v1342_v58  ;;  %v402_v21 = vmul.f32 1.442695, %v351_v51 }
  0x32   : > { %v966_v50 = vpop.eup %965  ;;  %985 = vrcp.f32 %v434_v26  ;;  %v438_v18 = vadd.f32 1.0, %v964_v43  ;;  %v354_v28 = vsub.f32 0.0, %v1349_v5  ;;  %v404_v34 = vmul.f32 1.442695, %v352_v62 }
  0x33   : > { %v968_v56 = vpop.eup %967  ;;  %987 = vpow2.f32 %v394_v37  ;;  %v439_v30 = vadd.f32 1.0, %v966_v50  ;;  %v406_v47 = vmul.f32 1.442695, %v353_v20 }
  0x34   : > { %v970_v3 = vpop.eup %969  ;;  %989 = vrcp.f32 %v435_v42  ;;  %v1366_v42 = vadd.f32 %v1189_v17, %v1313_v22  ;;  %v440_v43 = vadd.f32 1.0, %v968_v56 }
  0x35   : > { %v972_v9 = vpop.eup %971  ;;  %991 = vpow2.f32 %v396_v48  ;;  %v441_v51 = vadd.f32 1.0, %v970_v3 }
  0x36   : > { %v974_v15 = vpop.eup %973  ;;  %993 = vrcp.f32 %v436_v54  ;;  %v492_v10 = vmul.f32 %v972_v9, %v1197_v23  ;;  %v356_v54 = vsub.f32 0.0, %v1356_v16  ;;  %v357_v62 = vsub.f32 0.0, %v1366_v42 }
  0x37   : > { %v976_v63 = vpop.eup %975  ;;  %995 = vpow2.f32 %v398_v60  ;;  %v493_v12 = vmul.f32 %v974_v15, %v1201_v25  ;;  %v355_v25 = vsub.f32 0.0, %v1352_v11  ;;  %v408_v60 = vmul.f32 1.442695, %v354_v28 }
  0x38   : > { %v978_v26 = vpop.eup %977  ;;  %997 = vrcp.f32 %v437_v7  ;;  %v494_v32 = vmul.f32 %v976_v63, %v1205_v27 }
  0x39   : > { %v980_v13 = vpop.eup %979  ;;  %999 = vpow2.f32 %v400_v14  ;;  %v495_v37 = vmul.f32 %v978_v26, %v1209_v29  ;;  %v524_v23 = vadd.f32 %v493_v12, %v492_v10  ;;  %v1372_v29 = vadd.f32 %v1189_v17, %v1316_v24 }
  0x3a   : > { %v982_v38 = vpop.eup %981  ;;  %1001 = vrcp.f32 %v438_v18  ;;  %v496_v27 = vmul.f32 %v980_v13, %v1213_v31  ;;  %v1378_v31 = vadd.f32 %v1189_v17, %v1325_v39  ;;  %v410_v15 = vmul.f32 1.442695, %v355_v25 }
  0x3b   : > { %v984_v44 = vpop.eup %983  ;;  %1003 = vpow2.f32 %v402_v21  ;;  %v525_v48 = vadd.f32 %v524_v23, %v494_v32  ;;  %v497_v56 = vmul.f32 %v982_v38, %v1219_v35  ;;  %v1384_v35 = vadd.f32 %v1189_v17, %v1328_v40 }
  0x3c   : > { %v986_v50 = vpop.eup %985  ;;  %1005 = vrcp.f32 %v439_v30  ;;  %v442_v14 = vadd.f32 1.0, %v984_v44  ;;  %v358_v63 = vsub.f32 0.0, %v1372_v29  ;;  %v412_v21 = vmul.f32 1.442695, %v356_v54 }
  0x3d   : > { %v988_v22 = vpop.eup %987  ;;  %1007 = vpow2.f32 %v404_v34  ;;  %v526_v7 = vadd.f32 %v525_v48, %v495_v37  ;;  %v498_v3 = vmul.f32 %v986_v50, %v1227_v41  ;;  %v1390_v41 = vadd.f32 %v1189_v17, %v1336_v52 }
  0x3e   : > { %v990_v9 = vpop.eup %989  ;;  %1009 = vrcp.f32 %v440_v43  ;;  %v443_v20 = vadd.f32 1.0, %v988_v22  ;;  %v359_v30 = vsub.f32 0.0, %v1378_v31  ;;  %v414_v13 = vmul.f32 1.442695, %v357_v62 }
  0x3f   : > { %v992_v24 = vpop.eup %991  ;;  %1011 = vpow2.f32 %v406_v47  ;;  %v527_v18 = vadd.f32 %v526_v7, %v496_v27  ;;  %v499_v12 = vmul.f32 %v990_v9, %v1236_v49  ;;  %v1396_v49 = vadd.f32 %v1189_v17, %v1339_v53 }
  0x40   : > { %v994_v10 = vpop.eup %993  ;;  %1013 = vrcp.f32 %v441_v51  ;;  %v444_v32 = vadd.f32 1.0, %v992_v24  ;;  %v360_v38 = vsub.f32 0.0, %v1384_v35  ;;  %v416_v43 = vmul.f32 1.442695, %v358_v63 }
  0x41   : > { %v996_v39 = vpop.eup %995  ;;  %1015 = vpow2.f32 %v408_v60  ;;  %v528_v26 = vadd.f32 %v527_v18, %v497_v56  ;;  %v500_v34 = vmul.f32 %v994_v10, %v1242_v55  ;;  %v1402_v55 = vadd.f32 %v1189_v17, %v1346_v4 }
  0x42   : > { %v998_v28 = vpop.eup %997  ;;  %1017 = vrcp.f32 %v442_v14  ;;  %v445_v25 = vadd.f32 1.0, %v996_v39  ;;  %v361_v48 = vsub.f32 0.0, %v1390_v41  ;;  %v418_v54 = vmul.f32 1.442695, %v359_v30 }
  0x43   : > { %v1000_v40 = vpop.eup %999  ;;  %1019 = vpow2.f32 %v410_v15  ;;  %v529_v37 = vadd.f32 %v528_v26, %v498_v3  ;;  %v501_v44 = vmul.f32 %v998_v28, %v1247_v59  ;;  %v362_v56 = vsub.f32 0.0, %v1396_v49 }
  0x44   : > { %v1002_v23 = vpop.eup %1001  ;;  %1021 = vrcp.f32 %v443_v20  ;;  %v446_v50 = vadd.f32 1.0, %v1000_v40  ;;  %v420_v9 = vmul.f32 1.442695, %v360_v38  ;;  %v363_v14 = vsub.f32 0.0, %v1402_v55 }
  0x45   : > { %v1004_v52 = vpop.eup %1003  ;;  %1023 = vpow2.f32 %v412_v21  ;;  %v530_v47 = vadd.f32 %v529_v37, %v499_v12  ;;  %v502_v51 = vmul.f32 %v1002_v23, %v1250_v61  ;;  %v422_v61 = vmul.f32 1.442695, %v361_v48 }
  0x46   : > { %v1006_v27 = vpop.eup %1005  ;;  %1025 = vrcp.f32 %v444_v32  ;;  %v447_v59 = vadd.f32 1.0, %v1004_v52  ;;  %v424_v39 = vmul.f32 1.442695, %v362_v56  ;;  %v426_v30 = vmul.f32 1.442695, %v363_v14 }
  0x47   : > { %v1008_v53 = vpop.eup %1007  ;;  %1027 = vpow2.f32 %v414_v13  ;;  %v531_v22 = vadd.f32 %v530_v47, %v500_v34  ;;  %v503_v17 = vmul.f32 %v1006_v27, %v1254_v0 }
  0x48   : > { %v1010_v60 = vpop.eup %1009  ;;  %1029 = vrcp.f32 %v445_v25  ;;  %v448_v24 = vadd.f32 1.0, %v1008_v53 }
  0x49   : > { %v1012_v7 = vpop.eup %1011  ;;  %1031 = vpow2.f32 %v416_v43  ;;  %v532_v4 = vadd.f32 %v531_v22, %v501_v44  ;;  %v504_v3 = vmul.f32 %v1010_v60, %v1257_v2 }
  0x4a   : > { %v1014_v62 = vpop.eup %1013  ;;  %1033 = vrcp.f32 %v446_v50  ;;  %v449_v63 = vadd.f32 1.0, %v1012_v7 }
  0x4b   : > { %v1016_v15 = vpop.eup %1015  ;;  %1035 = vpow2.f32 %v418_v54  ;;  %v533_v18 = vadd.f32 %v532_v4, %v502_v51  ;;  %v505_v0 = vmul.f32 %v1014_v62, %v1262_v6 }
  0x4c   : > { %v1018_v10 = vpop.eup %1017  ;;  %1037 = vrcp.f32 %v447_v59  ;;  %v450_v26 = vadd.f32 1.0, %v1016_v15 }
  0x4d   : > { %v1020_v20 = vpop.eup %1019  ;;  %1039 = vpow2.f32 %v420_v9  ;;  %v534_v21 = vadd.f32 %v533_v18, %v503_v17  ;;  %v506_v32 = vmul.f32 %v1018_v10, %v1279_v36 }
  0x4e   : > { %v1022_v12 = vpop.eup %1021  ;;  %1041 = vrcp.f32 %v448_v24  ;;  %v451_v13 = vadd.f32 1.0, %v1020_v20 }
  0x4f   : > { %v1024_v28 = vpop.eup %1023  ;;  %1043 = vpow2.f32 %v422_v61  ;;  %v535_v40 = vadd.f32 %v534_v21, %v504_v3  ;;  %v507_v37 = vmul.f32 %v1022_v12, %v1286_v46 }
  0x50   : > { %v1026_v2 = vpop.eup %1025  ;;  %1045 = vrcp.f32 %v449_v63  ;;  %v452_v6 = vadd.f32 1.0, %v1024_v28 }
  0x51   : > { %v1028_v34 = vpop.eup %1027  ;;  %1047 = vpow2.f32 %v424_v39  ;;  %v536_v23 = vadd.f32 %v535_v40, %v505_v0  ;;  %v508_v52 = vmul.f32 %v1026_v2, %v1293_v57 }
  0x52   : > { %v1030_v38 = vpop.eup %1029  ;;  %1049 = vrcp.f32 %v450_v26  ;;  %v453_v47 = vadd.f32 1.0, %v1028_v34 }
  0x53   : > { %v1032_v25 = vpop.eup %1031  ;;  %1051 = vpow2.f32 %v426_v30  ;;  %v537_v43 = vadd.f32 %v536_v23, %v506_v32  ;;  %v509_v27 = vmul.f32 %v1030_v38, %v1301_v8 }
  0x54   : > { %v1034_v44 = vpop.eup %1033  ;;  %1053 = vrcp.f32 %v451_v13  ;;  %v454_v53 = vadd.f32 1.0, %v1032_v25 }
  0x55   : > { %v1036_v36 = vpop.eup %1035  ;;  %v538_v48 = vadd.f32 %v537_v43, %v507_v37  ;;  %1055 = vrcp.f32 %v452_v6  ;;  %v510_v54 = vmul.f32 %v1034_v44, %v1309_v19 }
  0x56   : > { %v1038_v50 = vpop.eup %1037  ;;  %v455_v60 = vadd.f32 1.0, %v1036_v36  ;;  %1057 = vrcp.f32 %v453_v47 }
  0x57   : > { %v1040_v46 = vpop.eup %1039  ;;  %v539_v51 = vadd.f32 %v538_v48, %v508_v52  ;;  %v511_v57 = vmul.f32 %v1038_v50, %v1321_v33  ;;  %1059 = vrcp.f32 %v454_v53  ;;  %v938_v53 = vld [vmem:[%s1471_s4 + $0x18] sm:$0xff]  }
  0x58   : > { %v1042_v22 = vpop.eup %1041  ;;  %v456_v9 = vadd.f32 1.0, %v1040_v46  ;;  %1061 = vrcp.f32 %v455_v60  ;;  %v939_v46 = vld [vmem:[%s1471_s4 + $0x20] sm:$0xff]  }
  0x59   : > { %v1044_v56 = vpop.eup %1043  ;;  %v540_v59 = vadd.f32 %v539_v51, %v509_v27  ;;  %v512_v8 = vmul.f32 %v1042_v22, %v1332_v45  ;;  %v941_v51 = vld [vmem:[%s1471_s4 + $0x30] sm:$0xff]   ;;  %v942_v22 = vld [vmem:[%s1471_s4 + $0x38] sm:$0xff]  }
  0x5a   : > { %v1046_v7 = vpop.eup %1045  ;;  %v457_v14 = vadd.f32 1.0, %v1044_v56  ;;  %1063 = vrcp.f32 %v456_v9 }
  0x5b   : > { %v1048_v17 = vpop.eup %1047  ;;  %v541_v4 = vadd.f32 %v540_v59, %v510_v54  ;;  %v513_v19 = vmul.f32 %v1046_v7, %v1342_v58  ;;  %v940_v54 = vld [vmem:[%s1471_s4 + $0x28] sm:$0xff]  }
  0x5c   : > { %v1050_v62 = vpop.eup %1049  ;;  %v458_v3 = vadd.f32 1.0, %v1048_v17  ;;  %1065 = vrcp.f32 %v457_v14 }
  0x5d   : > { %v1052_v24 = vpop.eup %1051  ;;  %v542_v15 = vadd.f32 %v541_v4, %v511_v57  ;;  %v514_v33 = vmul.f32 %v1050_v62, %v1349_v5 }
  0x5e   : > { %v1054_v61 = vpop.eup %1053  ;;  %v459_v63 = vadd.f32 1.0, %v1052_v24  ;;  %1067 = vrcp.f32 %v458_v3 }
  0x5f   : > { %v543_v18 = vadd.f32 %v542_v15, %v512_v8  ;;  %v1056_v10 = vpop.eup %1055  ;;  %v515_v20 = vmul.f32 %v1054_v61, %v1352_v11 }
  0x60   : > { %v1058_v39 = vpop.eup %1057  ;;  %v516_v0 = vmul.f32 %v1056_v10, %v1356_v16  ;;  %1069 = vrcp.f32 %v459_v63 }
  0x61   : > { %v544_v45 = vadd.f32 %v543_v18, %v513_v19  ;;  %v1060_v12 = vpop.eup %1059  ;;  %v517_v58 = vmul.f32 %v1058_v39, %v1366_v42 }
  0x62   : > { %v1062_v28 = vpop.eup %1061  ;;  %v518_v5 = vmul.f32 %v1060_v12, %v1372_v29 }
  0x63   : > { %v545_v21 = vadd.f32 %v544_v45, %v514_v33  ;;  %v519_v40 = vmul.f32 %v1062_v28, %v1378_v31 }
  0x64   : > { %v1064_v32 = vpop.eup %1063 }
  0x65   : > { %v546_v26 = vadd.f32 %v545_v21, %v515_v20  ;;  %v520_v13 = vmul.f32 %v1064_v32, %v1384_v35 }
  0x66   : > { %v1066_v11 = vpop.eup %1065 }
  0x67   : > { %v547_v30 = vadd.f32 %v546_v26, %v516_v0  ;;  %v521_v16 = vmul.f32 %v1066_v11, %v1390_v41  ;;  %v935_v41 = vld [vmem:[%s1471_s4] sm:$0xff]  }
  0x68   : > { %v1068_v37 = vpop.eup %1067  ;;  %898 = vmatpush3.bf16.msra.mxu1 %v935_v41 }
  0x69   : > { %v548_v2 = vadd.f32 %v547_v30, %v517_v58  ;;  %v522_v42 = vmul.f32 %v1068_v37, %v1396_v49  ;;  %899 = vmatprep.subr.bf16.mxu1 %v1087_v1  ;;  %v936_v49 = vld [vmem:[%s1471_s4 + $0x8] sm:$0xff]  }
  0x6a   : > { %v1070_v38 = vpop.eup %1069 }
  0x6b   : > { %v549_v34 = vadd.f32 %v548_v2, %v518_v5  ;;  %v523_v25 = vmul.f32 %v1070_v38, %v1402_v55  ;;  %v937_v55 = vld [vmem:[%s1471_s4 + $0x10] sm:$0xff]  }
  0x6c   : > { %900 = vmatpush3.bf16.msra.mxu1 %v936_v49 }
  0x6d   : > { %v550_v23 = vadd.f32 %v549_v34, %v519_v40  ;;  %901 = vmatprep.subr.bf16.mxu1 %v1087_v1 }
  0x6f   : > { %v551_v6 = vadd.f32 %v550_v23, %v520_v13 }
  0x70   : > { %902 = vmatpush3.bf16.msra.mxu1 %v937_v55 }
  0x71   : > { %v552_v29 = vadd.f32 %v551_v6, %v521_v16  ;;  %903 = vmatprep.subr.bf16.mxu1 %v1087_v1 }
  0x73   : > { %v553_v52 = vadd.f32 %v552_v29, %v522_v42 }
  0x74   : > { %904 = vmatpush3.bf16.msra.mxu1 %v938_v53 }
  0x75   : > { %v554_v43 = vadd.f32 %v553_v52, %v523_v25  ;;  %905 = vmatprep.subr.bf16.mxu1 %v1087_v1 }
  0x77   : > { %v555_v44 = vrot.slane %v554_v43, 4 }
  0x78   : > { %906 = vmatpush3.bf16.msra.mxu1 %v939_v46 }
  0x79   : > { %v556_v31 = vadd.f32 %v555_v44, %v554_v43  ;;  %907 = vmatprep.subr.bf16.mxu1 %v1087_v1 }
  0x7b   : > { %v557_v47 = vrot.slane %v556_v31, 2 }
  0x7c   : > { %908 = vmatpush3.bf16.msra.mxu1 %v940_v54 }
  0x7d   : > { %v558_v36 = vadd.f32 %v557_v47, %v556_v31  ;;  %909 = vmatprep.subr.bf16.mxu1 %v1087_v1 }
  0x7f   : > { %v559_v27 = vrot.slane %v558_v36, 1 }
  0x80   : > { %910 = vmatpush3.bf16.msra.mxu1 %v941_v51 }
  0x81   : > { %v560_v35 = vadd.f32 %v559_v27, %v558_v36  ;;  %911 = vmatprep.subr.bf16.mxu1 %v1087_v1 }
  0x83   : > { %v561_v48 = vmul.f32 0.00390625, %v560_v35 }
  0x84   : > { %912 = vmatpush3.bf16.msra.mxu1 %v942_v22 }
  0x85   : > { %v562_v50 = vpack.c.bf16 %v561_v48, %v561_v48 }
  0x87   : > { %894 = vmatmul.mubr.bf16.vlgmr.msra.gmra.mrb[0].mxu0 %v562_v50 }
 0x15a   : > { %v661_v60 = vpop.f32.mrb[0].mxu0 }
 0x15b   : > { %v667_v56 = vsub.f32 0.0, %v661_v60  ;;  %v895_v57 = vpop.f32.mrb[1].mxu0 }
 0x15c   : > { %v664_v59 = vpop.f32.mrb[2].mxu0 }
 0x15d   : > { %v668_v7 = vmul.f32 1.442695, %v667_v56  ;;  %v896_v9 = vpop.f32.mrb[3].mxu0 }
 0x15f   : > { %1071 = vpow2.f32 %v668_v7 }
 0x169   : > { %v1072_v17 = vpop.eup %1071 }
 0x16a   : > { %v670_v8 = vadd.f32 1.0, %v1072_v17 }
 0x16c   : > { %1073 = vrcp.f32 %v670_v8 }
 0x176   : > { %v1074_v4 = vpop.eup %1073 }
 0x177   : > { %v672_v62 = vmul.f32 %v1074_v4, %v661_v60 }
 0x179   : > { %v673_v14 = vpack.c.bf16 %v672_v62, %v672_v62 }
 0x17b   : > { %914 = vmatmul.mubr.bf16.vlgmr.msra.gmra.mrb[0].mxu1 %v673_v14 }
 0x24e   : > { %v772_v1 = vpop.f32.mrb[0].mxu1 }
 0x24f   : > { %v778_v24 = vsub.f32 0.0, %v772_v1  ;;  %v915_v19 = vpop.f32.mrb[1].mxu1 }
 0x250   : > { %v775_v15 = vpop.f32.mrb[2].mxu1 }
 0x251   : > { %v779_v61 = vmul.f32 1.442695, %v778_v24  ;;  %v916_v3 = vpop.f32.mrb[3].mxu1 }
 0x253   : > { %1075 = vpow2.f32 %v779_v61 }
 0x25d   : > { %v1076_v33 = vpop.eup %1075 }
 0x25e   : > { %v781_v18 = vadd.f32 1.0, %v1076_v33 }
 0x260   : > { %1077 = vrcp.f32 %v781_v18 }
 0x26a   : > { %v1078_v10 = vpop.eup %1077 }
 0x26b   : > { %783 = vst [vmem:[%s220_s14] sm:$0x1] %v1078_v10 }
 0x26c PF: > { %s15_s18 = sadd.s32 1, %s1085_s18  }
 0x26d   : > { %p12_p4 = scmp.ge.s32.totalorder %s15_s18, 4  }
 0x26f   :  { %14 = sbr.rel (!%p12_p4) target bundleno = 1 (0x1), region = 70 }

// kernel: mbconv_forward.6
= control target key start
LH: loop header
LB: loop body
LE: loop exit
PB: predicated region body
PF: predicated region fallthrough
CT: control target
= control target key end

     0   :  { %s1473_s18 = smov 0   ;;  %s2272_s0 = inlined_call_operand.vmem [shape: f32[2,16,16,128], index: 0, kind: input, shape index: {}]   ;;  %s2273_s1 = inlined_call_operand.vmem [shape: f32[1,128], index: 1, kind: input, shape index: {}]   ;;  %s2274_s2 = inlined_call_operand.vmem [shape: f32[1,128], index: 2, kind: input, shape index: {}]   ;;  %s2275_s3 = inlined_call_operand.vmem [shape: f32[9,16,128], index: 3, kind: input, shape index: {}]   ;;  %s2276_s4 = inlined_call_operand.vmem [shape: f32[2,16,16,128], index: 4, kind: output, shape index: {0}]   ;;  %s2277_s5 = inlined_call_operand.vmem [shape: f32[2,2,128], index: 5, kind: output, shape index: {1}]  }
   0x1 LB: > { %s1202_s19 = sadd.s32 4294967295, %s1424_s18   ;;  %p1206_p0 = scmp.ge.s32.totalorder %s1424_s18, 1  ;;  %s1424_s18 = sphi %s1473_s18, %s16_s18  }
   0x2   : > { %p190_p1 = scmp.lt.s32.totalorder %s1424_s18, 3 }
   0x4   : > { %p191_p2 = pnand %p1206_p0, %p190_p1 }
   0x5   : > { %p222_p3 = scmp.lt.s32.totalorder (!%p191_p2), %s1202_s19, 1  ;;  %v1484_v0 = vld [vmem:[%s2273_s1] ss:$0 sm:$0xff] (!%p191_p2)  ;;  %v1442_v2 = vmov (!%p191_p2), 0.0   ;;  %s1506_s10 = smov (!%p191_p2), 0  }
   0x6   : > { %194 = sbr.rel (%p191_p2) target bundleno = 216 (0xd8), region = 36  ;;  %v1489_v1 = vld [vmem:[%s2274_s2] ss:$0 sm:$0xff] (!%p191_p2)  ;;  %238 = vst [vmem:[#allocation2] sm:$0xff] (!%p191_p2), %v1442_v2  ;;  %239 = vst [vmem:[#allocation2 + $0x8] sm:$0xff] (!%p191_p2), %v1442_v2 }
   0x7   : > { %241 = vst [vmem:[#allocation2 + $0x110] sm:$0xff] (!%p191_p2), %v1442_v2  ;;  %242 = vst [vmem:[#allocation2 + $0x118] sm:$0xff] (!%p191_p2), %v1442_v2 }
   0xd   : > { %s2281_s19 = smov (!%p222_p3, %s1202_s19), 1 }
   0xe   : > { %s1290_s24 = sshll.u32 %s2281_s19, 8  ;;  %s1211_s25 = sshll.u32 %s2281_s19, 1 }
   0xf   : > { %s1494_s28 = scalar_lea.vmem %s2272_s0, %s1290_s24  ;;  %s1499_s6 = scalar_lea.vmem %s2276_s4, %s1290_s24 }
  0x10   : > { %s1504_s9 = scalar_lea.vmem %s2277_s5, %s1211_s25 }
  0x11 LB: >> { %s1292_s11 = sshll.u32 %s1428_s10, 7  ;;  %s248_s10 = sadd.s32 1, %s1428_s10   ;;  %s1428_s10 = sphi %s1506_s10, %s248_s10  }
  0x12   : >> { %s1515_s12 = scalar_lea.vmem %s1494_s28, %s1292_s11  ;;  %s1617_s13 = scalar_lea.vmem [#allocation2], %s1292_s11 }
  0x13   : >> { %v252_v3 = vld [vmem:[%s1515_s12] sm:$0xff]  ;;  %v253_v4 = vld [vmem:[%s1515_s12 + $0x8] sm:$0xff]  ;;  %v254_v5 = vld [vmem:[%s1515_s12 + $0x10] sm:$0xff]  ;;  %p245_p4 = scmp.ge.s32.totalorder %s248_s10, 2  }
  0x14   : >> { %v274_v6 = vmul.f32 %v1484_v0, %v252_v3  ;;  %v275_v7 = vmul.f32 %v1484_v0, %v253_v4  ;;  %v276_v8 = vmul.f32 %v1484_v0, %v254_v5  ;;  %v255_v9 = vld [vmem:[%s1515_s12 + $0x18] sm:$0xff]  ;;  %v256_v10 = vld [vmem:[%s1515_s12 + $0x20] sm:$0xff]  ;;  %v257_v11 = vld [vmem:[%s1515_s12 + $0x28] sm:$0xff]  ;;  %s1656_s14 = smov (%p245_p4), 0  }
  0x15   : >> { %v277_v12 = vmul.f32 %v1484_v0, %v255_v9  ;;  %v278_v13 = vmul.f32 %v1484_v0, %v256_v10  ;;  %v279_v14 = vmul.f32 %v1484_v0, %v257_v11  ;;  %v258_v15 = vld [vmem:[%s1515_s12 + $0x30] sm:$0xff]  ;;  %v259_v16 = vld [vmem:[%s1515_s12 + $0x38] sm:$0xff]  ;;  %v260_v25 = vld [vmem:[%s1515_s12 + $0x40] sm:$0xff] }
  0x16   : >> { %v1532_v17 = vadd.f32 %v1489_v1, %v274_v6  ;;  %v1535_v18 = vadd.f32 %v1489_v1, %v275_v7  ;;  %v1538_v19 = vadd.f32 %v1489_v1, %v276_v8  ;;  %v280_v20 = vmul.f32 %v1484_v0, %v258_v15  ;;  %v261_v30 = vld [vmem:[%s1515_s12 + $0x48] sm:$0xff]  ;;  %v262_v35 = vld [vmem:[%s1515_s12 + $0x50] sm:$0xff]  ;;  %v263_v36 = vld [vmem:[%s1515_s12 + $0x58] sm:$0xff] }
  0x17   : >> { %v1542_v21 = vadd.f32 %v1489_v1, %v277_v12  ;;  %v1545_v22 = vadd.f32 %v1489_v1, %v278_v13  ;;  %v1548_v23 = vadd.f32 %v1489_v1, %v279_v14  ;;  %v281_v24 = vmul.f32 %v1484_v0, %v259_v16  ;;  %v264_v51 = vld [vmem:[%s1515_s12 + $0x60] sm:$0xff]  ;;  %v265_v4 = vld [vmem:[%s1515_s12 + $0x68] sm:$0xff]  ;;  %v266_v6 = vld [vmem:[%s1515_s12 + $0x70] sm:$0xff] }
  0x18   : >> { %v312_v26 = vsub.f32 0.0, %v1532_v17  ;;  %v313_v27 = vsub.f32 0.0, %v1535_v18  ;;  %v314_v28 = vsub.f32 0.0, %v1538_v19  ;;  %v1556_v29 = vadd.f32 %v1489_v1, %v280_v20  ;;  %v267_v7 = vld [vmem:[%s1515_s12 + $0x78] sm:$0xff] }
  0x19   : >> { %v315_v31 = vsub.f32 0.0, %v1542_v21  ;;  %v316_v32 = vsub.f32 0.0, %v1545_v22  ;;  %v317_v33 = vsub.f32 0.0, %v1548_v23  ;;  %v1563_v34 = vadd.f32 %v1489_v1, %v281_v24 }
  0x1a   : >> { %v328_v37 = vmul.f32 1.442695, %v312_v26  ;;  %v330_v38 = vmul.f32 1.442695, %v313_v27  ;;  %v332_v39 = vmul.f32 1.442695, %v314_v28  ;;  %v282_v40 = vmul.f32 %v1484_v0, %v260_v25 }
  0x1b   : >> { %v334_v41 = vmul.f32 1.442695, %v315_v31  ;;  %v336_v42 = vmul.f32 1.442695, %v316_v32  ;;  %v338_v43 = vmul.f32 1.442695, %v317_v33  ;;  %v283_v44 = vmul.f32 %v1484_v0, %v261_v30 }
  0x1c   : >> { %1338 = vpow2.f32 %v328_v37  ;;  %v318_v45 = vsub.f32 0.0, %v1556_v29  ;;  %v319_v46 = vsub.f32 0.0, %v1563_v34  ;;  %v1572_v47 = vadd.f32 %v1489_v1, %v282_v40 }
  0x1d   : >> { %1340 = vpow2.f32 %v330_v38  ;;  %v1575_v48 = vadd.f32 %v1489_v1, %v283_v44  ;;  %v284_v49 = vmul.f32 %v1484_v0, %v262_v35  ;;  %v285_v50 = vmul.f32 %v1484_v0, %v263_v36 }
  0x1e   : >> { %1342 = vpow2.f32 %v332_v39  ;;  %v340_v52 = vmul.f32 1.442695, %v318_v45  ;;  %v342_v53 = vmul.f32 1.442695, %v319_v46  ;;  %v320_v54 = vsub.f32 0.0, %v1572_v47 }
  0x1f   : >> { %1344 = vpow2.f32 %v334_v41  ;;  %v321_v55 = vsub.f32 0.0, %v1575_v48  ;;  %v1583_v56 = vadd.f32 %v1489_v1, %v284_v49  ;;  %v1586_v57 = vadd.f32 %v1489_v1, %v285_v50 }
  0x20   : >> { %1346 = vpow2.f32 %v336_v42  ;;  %v344_v58 = vmul.f32 1.442695, %v320_v54  ;;  %v286_v59 = vmul.f32 %v1484_v0, %v264_v51  ;;  %v287_v10 = vmul.f32 %v1484_v0, %v265_v4 }
  0x21   : >> { %1348 = vpow2.f32 %v338_v43  ;;  %v346_v60 = vmul.f32 1.442695, %v321_v55  ;;  %v322_v61 = vsub.f32 0.0, %v1583_v56  ;;  %v323_v62 = vsub.f32 0.0, %v1586_v57 }
  0x22   : >> { %1350 = vpow2.f32 %v340_v52  ;;  %v1592_v63 = vadd.f32 %v1489_v1, %v286_v59  ;;  %v288_v13 = vmul.f32 %v1484_v0, %v266_v6  ;;  %v289_v16 = vmul.f32 %v1484_v0, %v267_v7 }
  0x23   : >> { %1352 = vpow2.f32 %v342_v53  ;;  %v348_v2 = vmul.f32 1.442695, %v322_v61  ;;  %v350_v3 = vmul.f32 1.442695, %v323_v62  ;;  %v1602_v27 = vadd.f32 %v1489_v1, %v287_v10 }
  0x24   : >> { %1354 = vpow2.f32 %v344_v58  ;;  %v324_v5 = vsub.f32 0.0, %v1592_v63  ;;  %v1605_v31 = vadd.f32 %v1489_v1, %v288_v13  ;;  %v1608_v35 = vadd.f32 %v1489_v1, %v289_v16 }
  0x25   : >> { %1356 = vpow2.f32 %v346_v60  ;;  %v325_v40 = vsub.f32 0.0, %v1602_v27 }
  0x26   : >> { %v1339_v8 = vpop.eup %1338  ;;  %1358 = vpow2.f32 %v348_v2  ;;  %v352_v9 = vmul.f32 1.442695, %v324_v5  ;;  %v326_v43 = vsub.f32 0.0, %v1605_v31  ;;  %v327_v46 = vsub.f32 0.0, %v1608_v35 }
  0x27   : >> { %v1341_v11 = vpop.eup %1340  ;;  %v360_v12 = vadd.f32 1.0, %v1339_v8  ;;  %1360 = vpow2.f32 %v350_v3  ;;  %v354_v53 = vmul.f32 1.442695, %v325_v40 }
  0x28   : >> { %v1343_v14 = vpop.eup %1342  ;;  %v361_v15 = vadd.f32 1.0, %v1341_v11  ;;  %1362 = vpow2.f32 %v352_v9  ;;  %v356_v58 = vmul.f32 1.442695, %v326_v43  ;;  %v358_v61 = vmul.f32 1.442695, %v327_v46 }
  0x29   : >> { %v1345_v20 = vpop.eup %1344  ;;  %1364 = vrcp.f32 %v360_v12  ;;  %v362_v24 = vadd.f32 1.0, %v1343_v14 }
  0x2a   : >> { %v1347_v25 = vpop.eup %1346  ;;  %1366 = vrcp.f32 %v361_v15  ;;  %v363_v26 = vadd.f32 1.0, %v1345_v20 }
  0x2b   : >> { %v1349_v28 = vpop.eup %1348  ;;  %1368 = vrcp.f32 %v362_v24  ;;  %v364_v30 = vadd.f32 1.0, %v1347_v25 }
  0x2c   : >> { %v1351_v32 = vpop.eup %1350  ;;  %1370 = vrcp.f32 %v363_v26  ;;  %v365_v33 = vadd.f32 1.0, %v1349_v28 }
  0x2d   : >> { %v1353_v36 = vpop.eup %1352  ;;  %1372 = vrcp.f32 %v364_v30  ;;  %v366_v37 = vadd.f32 1.0, %v1351_v32  ;;  %v1652_v32 = vmov (%p245_p4), 0.0  }
  0x2e   : >> { %v1355_v38 = vpop.eup %1354  ;;  %1374 = vrcp.f32 %v365_v33  ;;  %v367_v39 = vadd.f32 1.0, %v1353_v36  ;;  %v1654_v33 = vmov (%p245_p4), 0.0  }
  0x2f   : >> { %v1357_v41 = vpop.eup %1356  ;;  %1376 = vrcp.f32 %v366_v37  ;;  %v368_v42 = vadd.f32 1.0, %v1355_v38 }
  0x30   : >> { %v1359_v44 = vpop.eup %1358  ;;  %1378 = vrcp.f32 %v367_v39  ;;  %v369_v45 = vadd.f32 1.0, %v1357_v41 }
  0x31   : >> { %v1361_v49 = vpop.eup %1360  ;;  %1380 = vrcp.f32 %v368_v42  ;;  %v370_v50 = vadd.f32 1.0, %v1359_v44 }
  0x32   : >> { %v1363_v51 = vpop.eup %1362  ;;  %1382 = vrcp.f32 %v369_v45  ;;  %v371_v52 = vadd.f32 1.0, %v1361_v49 }
  0x33   : >> { %v1365_v54 = vpop.eup %1364  ;;  %1384 = vrcp.f32 %v370_v50  ;;  %v372_v55 = vadd.f32 1.0, %v1363_v51 }
  0x34   : >> { %v1367_v59 = vpop.eup %1366  ;;  %v392_v60 = vmul.f32 %v1365_v54, %v1532_v17  ;;  %1386 = vrcp.f32 %v371_v52 }
  0x35   : >> { %v1369_v62 = vpop.eup %1368  ;;  %v393_v2 = vmul.f32 %v1367_v59, %v1535_v18  ;;  %1388 = vrcp.f32 %v372_v55 }
  0x36   : >> { %v1371_v3 = vpop.eup %1370  ;;  %1218 = vst [vmem:[%s1617_s13 + $0x10] sm:$0xff] %v392_v60  ;;  %v394_v4 = vmul.f32 %v1369_v62, %v1538_v19  ;;  %1390 = vpow2.f32 %v354_v53 }
  0x37   : >> { %v1373_v17 = vpop.eup %1372  ;;  %1219 = vst [vmem:[%s1617_s13 + $0x18] sm:$0xff] %v393_v2  ;;  %v395_v5 = vmul.f32 %v1371_v3, %v1542_v21  ;;  %1392 = vpow2.f32 %v356_v58 }
  0x38   : >> { %v1375_v18 = vpop.eup %1374  ;;  %1220 = vst [vmem:[%s1617_s13 + $0x20] sm:$0xff] %v394_v4  ;;  %v396_v6 = vmul.f32 %v1373_v17, %v1545_v22  ;;  %1394 = vpow2.f32 %v358_v61 }
  0x39   : >> { %v1377_v7 = vpop.eup %1376  ;;  %1221 = vst [vmem:[%s1617_s13 + $0x28] sm:$0xff] %v395_v5  ;;  %v397_v8 = vmul.f32 %v1375_v18, %v1548_v23 }
  0x3a   : >> { %v1379_v19 = vpop.eup %1378  ;;  %1222 = vst [vmem:[%s1617_s13 + $0x30] sm:$0xff] %v396_v6  ;;  %v398_v9 = vmul.f32 %v1377_v7, %v1556_v29 }
  0x3b   : >> { %v1381_v10 = vpop.eup %1380  ;;  %1223 = vst [vmem:[%s1617_s13 + $0x38] sm:$0xff] %v397_v8  ;;  %v399_v21 = vmul.f32 %v1379_v19, %v1563_v34 }
  0x3c   : >> { %v1383_v11 = vpop.eup %1382  ;;  %1224 = vst [vmem:[%s1617_s13 + $0x40] sm:$0xff] %v398_v9  ;;  %v400_v22 = vmul.f32 %v1381_v10, %v1572_v47 }
  0x3d   : >> { %v1385_v12 = vpop.eup %1384  ;;  %1225 = vst [vmem:[%s1617_s13 + $0x48] sm:$0xff] %v399_v21  ;;  %v401_v23 = vmul.f32 %v1383_v11, %v1575_v48 }
  0x3e   : >> { %v1387_v13 = vpop.eup %1386  ;;  %1226 = vst [vmem:[%s1617_s13 + $0x50] sm:$0xff] %v400_v22  ;;  %v402_v14 = vmul.f32 %v1385_v12, %v1583_v56 }
  0x3f   : >> { %v1389_v29 = vpop.eup %1388  ;;  %1227 = vst [vmem:[%s1617_s13 + $0x58] sm:$0xff] %v401_v23  ;;  %v403_v15 = vmul.f32 %v1387_v13, %v1586_v57 }
  0x40   : >> { %v1391_v16 = vpop.eup %1390  ;;  %1228 = vst [vmem:[%s1617_s13 + $0x60] sm:$0xff] %v402_v14  ;;  %v404_v34 = vmul.f32 %v1389_v29, %v1592_v63 }
  0x41   : >> { %v1393_v20 = vpop.eup %1392  ;;  %1229 = vst [vmem:[%s1617_s13 + $0x68] sm:$0xff] %v403_v15  ;;  %v373_v47 = vadd.f32 1.0, %v1391_v16 }
  0x42   : >> { %v1395_v24 = vpop.eup %1394  ;;  %1230 = vst [vmem:[%s1617_s13 + $0x70] sm:$0xff] %v404_v34  ;;  %v374_v48 = vadd.f32 1.0, %v1393_v20 }
  0x43   : >> { %1396 = vrcp.f32 %v373_v47  ;;  %v375_v25 = vadd.f32 1.0, %v1395_v24 }
  0x44   : >> { %1398 = vrcp.f32 %v374_v48 }
  0x45   : >> { %1400 = vrcp.f32 %v375_v25 }
  0x4c   : > { %247 = sbr.rel (!%p245_p4) target bundleno = 17 (0x11), region = 107 }
  0x4d   : >> { %v1397_v56 = vpop.eup %1396 }
  0x4e   : >> { %v1399_v26 = vpop.eup %1398  ;;  %v405_v57 = vmul.f32 %v1397_v56, %v1602_v27 }
  0x4f   : >> { %v1401_v28 = vpop.eup %1400  ;;  %v406_v63 = vmul.f32 %v1399_v26, %v1605_v31 }
  0x50   : >> { %1231 = vst [vmem:[%s1617_s13 + $0x78] sm:$0xff] %v405_v57  ;;  %v407_v30 = vmul.f32 %v1401_v28, %v1608_v35 }
  0x51   : >> { %1232 = vst [vmem:[%s1617_s13 + $0x80] sm:$0xff] %v406_v63 }
  0x52   : >> { %1233 = vst [vmem:[%s1617_s13 + $0x88] sm:$0xff] %v407_v30 }
  0x53 LB: >> { %v472_v27 = vlaneseq  ;;  %s1294_s15 = sshll.u32 %s1440_s14, 7  ;;  %v1673_v1 = vld [vmem:[%s2275_s3 + $0x10] sm:$0xff]  ;;  %v1688_v37 = vld [vmem:[%s2275_s3] sm:$0xff]  ;;  %v1728_v60 = vld [vmem:[%s2275_s3 + $0x18] sm:$0xff]  ;;  %s432_s14 = sadd.s32 1, %s1440_s14   ;;  %s1440_s14 = sphi %s1656_s14, %s432_s14   ;;  %v1436_v33 = vphi %v1654_v33, %v2279_v33   ;;  %v1432_v32 = vphi %v1652_v32, %v2278_v32  }
  0x54   : >> { %s1677_s19 = scalar_lea.vmem [#allocation2], %s1294_s15  ;;  %v1698_v43 = vld [vmem:[%s2275_s3 + $0x20] sm:$0xff]  ;;  %v1713_v52 = vld [vmem:[%s2275_s3 + $0x30] sm:$0xff]  ;;  %v1738_v4 = vld [vmem:[%s2275_s3 + $0x8] sm:$0xff]  ;;  %s1872_s12 = scalar_lea.vmem %s1499_s6, %s1294_s15 }
  0x55   : >> { %v1668_v0 = vshrl.u32 %v472_v27, 7  ;;  %v1718_v53 = vld [vmem:[%s2275_s3 + $0x40] sm:$0xff]  ;;  %v1746_v6 = vld [vmem:[%s2275_s3 + $0x50] sm:$0xff]  ;;  %v1757_v19 = vld [vmem:[%s2275_s3 + $0x28] sm:$0xff]  ;;  %p429_p5 = scmp.ge.s32.totalorder %s432_s14, 2  }
  0x56   : >> { %v1751_v7 = vld [vmem:[%s2275_s3 + $0x70] sm:$0xff]  ;;  %v1768_v22 = vld [vmem:[%s2275_s3 + $0x38] sm:$0xff]  ;;  %v1773_v23 = vld [vmem:[%s2275_s3 + $0x60] sm:$0xff]  ;;  %vm1079_vm2 = vcmask (%p429_p5), 1040384  }
  0x57   : >> { %vm474_vm0 = vcmp.lt.s32.totalorder %v1668_v0, 1  ;;  %vm577_vm1 = vcmp.lt.s32.totalorder %v1668_v0, 7  ;;  %v1778_v13 = vld [vmem:[%s2275_s3 + $0x80] sm:$0xff]  ;;  %v1788_v16 = vld [vmem:[%s2275_s3 + $0x48] sm:$0xff]  ;;  %v1801_v48 = vld [vmem:[%s2275_s3 + $0x58] sm:$0xff] }
  0x58   : >> { %v1811_v28 = vld [vmem:[%s2275_s3 + $0x78] sm:$0xff] }
  0x59   : >> { %v438_v31 = vld [vmem:[%s1677_s19] sm:$0xff]  ;;  %v439_v35 = vld [vmem:[%s1677_s19 + $0x8] sm:$0xff]  ;;  %v1683_v36 = vld [vmem:[%s1677_s19 + $0x10] sm:$0xff] }
  0x5a   : >> { %v456_v38 = vrot.slane %v438_v31, 7  ;;  %v464_v39 = vrot.slane %v439_v35, 7  ;;  %v561_v40 = vrot.slane %v438_v31, 1  ;;  %v1692_v41 = vld [vmem:[%s1677_s19 + $0x18] sm:$0xff]  ;;  %v526_v42 = vmul.f32 %v1673_v1, %v438_v31  ;;  %v1703_v49 = vld [vmem:[%s1677_s19 + $0x20] sm:$0xff]  ;;  %v1706_v50 = vld [vmem:[%s1677_s19 + $0x28] sm:$0xff] }
  0x5b   : >> { %v569_v44 = vrot.slane %v439_v35, 1  ;;  %v648_v45 = vrot.slane %v1683_v36, 7  ;;  %v656_v46 = vrot.slane %v1692_v41, 7  ;;  %v750_v54 = vrot.slane %v1683_v36, 1 }
  0x5c   : >> { %v483_v51 = vsel %vm474_vm0, %v464_v39, %v456_v38  ;;  %v758_v55 = vrot.slane %v1692_v41, 1  ;;  %v836_v2 = vrot.slane %v1703_v49, 7  ;;  %v844_v3 = vrot.slane %v1706_v50, 7 }
  0x5d   : >> { %v491_v58 = vmul.f32 %v483_v51, %v1688_v37  ;;  %v578_v59 = vsel %vm577_vm1, %v561_v40, %v569_v44  ;;  %v672_v62 = vsel %vm474_vm0, %v656_v46, %v648_v45  ;;  %v715_v18 = vmul.f32 %v1718_v53, %v1683_v36 }
  0x5e   : >> { %v594_v61 = vmul.f32 %v1698_v43, %v578_v59  ;;  %v680_v5 = vmul.f32 %v1713_v52, %v672_v62  ;;  %v938_v8 = vrot.slane %v1703_v49, 1  ;;  %v766_v9 = vsel %vm577_vm1, %v750_v54, %v758_v55 }
  0x5f   : >> { %v542_v17 = vadd.f32 %v526_v42, %v491_v58  ;;  %v946_v10 = vrot.slane %v1706_v50, 1  ;;  %v475_v21 = vsel %vm474_vm0, %v456_v38, %v464_v39  ;;  %v527_v11 = vmul.f32 %v1728_v60, %v439_v35  ;;  %v1824_v35 = vld [vmem:[%s2275_s3 + $0x68] sm:$0xff] }
  0x60   : >> { %v492_v14 = vmul.f32 %v475_v21, %v1738_v4  ;;  %v586_v29 = vsel %vm577_vm1, %v569_v44, %v561_v40  ;;  %v664_v15 = vsel %vm474_vm0, %v648_v45, %v656_v46  ;;  %v782_v34 = vmul.f32 %v1746_v6, %v766_v9  ;;  %v1832_v44 = vld [vmem:[%s1677_s19 + $0x30] sm:$0xff]  ;;  %v1835_v45 = vld [vmem:[%s1677_s19 + $0x38] sm:$0xff] }
  0x61   : >> { %v610_v12 = vadd.f32 %v594_v61, %v542_v17  ;;  %v1793_v20 = vsel %vm474_vm0, %v844_v3, %v836_v2  ;;  %v903_v47 = vmul.f32 %v1751_v7, %v1703_v49  ;;  %v595_v24 = vmul.f32 %v1757_v19, %v586_v29 }
  0x62   : >> { %v1805_v56 = vsel %vm577_vm1, %v938_v8, %v946_v10  ;;  %v543_v26 = vadd.f32 %v527_v11, %v492_v14  ;;  %v681_v57 = vmul.f32 %v1768_v22, %v664_v15  ;;  %v868_v63 = vmul.f32 %v1773_v23, %v1793_v20 }
  0x63   : >> { %v696_v25 = vadd.f32 %v680_v5, %v610_v12  ;;  %v970_v30 = vmul.f32 %v1778_v13, %v1805_v56  ;;  %v716_v27 = vmul.f32 %v1788_v16, %v1692_v41  ;;  %v774_v31 = vsel %vm577_vm1, %v758_v55, %v750_v54 }
  0x64   : >> { %v611_v39 = vadd.f32 %v595_v24, %v543_v26  ;;  %v783_v40 = vmul.f32 %v1801_v48, %v774_v31  ;;  %v1829_v42 = vsel %vm474_vm0, %v836_v2, %v844_v3  ;;  %v904_v46 = vmul.f32 %v1811_v28, %v1706_v50  ;;  %v1852_v3 = vld [vmem:[%s2275_s3 + $0x88] sm:$0xff] }
  0x65   : >> { %v731_v38 = vadd.f32 %v715_v18, %v696_v25  ;;  %v493_v51 = vmul.f32 %v672_v62, %v1688_v37  ;;  %v528_v54 = vmul.f32 %v1683_v36, %v1673_v1  ;;  %v596_v55 = vmul.f32 %v1698_v43, %v766_v9 }
  0x66   : >> { %v697_v59 = vadd.f32 %v681_v57, %v611_v39  ;;  %v869_v61 = vmul.f32 %v1824_v35, %v1829_v42  ;;  %v1847_v2 = vsel %vm577_vm1, %v946_v10, %v938_v8  ;;  %v682_v36 = vmul.f32 %v1713_v52, %v1793_v20 }
  0x67   : >> { %v798_v58 = vadd.f32 %v782_v34, %v731_v38  ;;  %v544_v62 = vadd.f32 %v528_v54, %v493_v51  ;;  %v837_v17 = vrot.slane %v1832_v44, 7  ;;  %v845_v5 = vrot.slane %v1835_v45, 7 }
  0x68   : >> { %v732_v9 = vadd.f32 %v716_v27, %v697_v59  ;;  %v717_v8 = vmul.f32 %v1703_v49, %v1718_v53  ;;  %v939_v10 = vrot.slane %v1832_v44, 1  ;;  %v947_v11 = vrot.slane %v1835_v45, 1 }
  0x69   : >> { %v884_v18 = vadd.f32 %v868_v63, %v798_v58  ;;  %v612_v21 = vadd.f32 %v596_v55, %v544_v62  ;;  %v494_v12 = vmul.f32 %v664_v15, %v1738_v4  ;;  %v529_v14 = vmul.f32 %v1692_v41, %v1728_v60 }
  0x6a   : >> { %v799_v34 = vadd.f32 %v783_v40, %v732_v9  ;;  %v971_v24 = vmul.f32 %v1852_v3, %v1847_v2  ;;  %v784_v25 = vmul.f32 %v1746_v6, %v1805_v56  ;;  %v1876_v57 = vsel %vm474_vm0, %v845_v5, %v837_v17 }
  0x6b   : >> { %v919_v29 = vadd.f32 %v903_v47, %v884_v18  ;;  %v698_v26 = vadd.f32 %v682_v36, %v612_v21  ;;  %v545_v15 = vadd.f32 %v529_v14, %v494_v12  ;;  %v597_v41 = vmul.f32 %v1757_v19, %v774_v31  ;;  %v1907_v21 = vld [vmem:[%s1677_s19 + $0x40] sm:$0xff]  ;;  %v1910_v12 = vld [vmem:[%s1677_s19 + $0x48] sm:$0xff] }
  0x6c   : >> { %v885_v63 = vadd.f32 %v869_v61, %v799_v34  ;;  %v870_v27 = vmul.f32 %v1773_v23, %v1876_v57  ;;  %v683_v38 = vmul.f32 %v1768_v22, %v1829_v42  ;;  %v1885_v40 = vsel %vm577_vm1, %v939_v10, %v947_v11 }
  0x6d   : >> { %v986_v47 = vadd.f32 %v970_v30, %v919_v29  ;;  %v733_v39 = vadd.f32 %v717_v8, %v698_v26  ;;  %v613_v51 = vadd.f32 %v597_v41, %v545_v15  ;;  %v718_v54 = vmul.f32 %v1706_v50, %v1788_v16 }
  0x6e   : >> { %v920_v30 = vadd.f32 %v904_v46, %v885_v63  ;;  %v905_v31 = vmul.f32 %v1751_v7, %v1832_v44  ;;  %v972_v55 = vmul.f32 %v1778_v13, %v1885_v40  ;;  %v785_v58 = vmul.f32 %v1801_v48, %v1847_v2 }
  0x6f   : >> { %1003 = vst [vmem:[%s1872_s12] sm:$0xff] %v986_v47  ;;  %v800_v59 = vadd.f32 %v784_v25, %v733_v39  ;;  %v699_v61 = vadd.f32 %v683_v38, %v613_v51  ;;  %v1898_v62 = vsel %vm474_vm0, %v837_v17, %v845_v5  ;;  %v495_v36 = vmul.f32 %v1793_v20, %v1688_v37 }
  0x70   : >> { %v1041_v46 = vmul.f32 %v986_v47, %v986_v47  ;;  %v987_v18 = vadd.f32 %v971_v24, %v920_v30  ;;  %v530_v9 = vmul.f32 %v1703_v49, %v1673_v1  ;;  %v598_v8 = vmul.f32 %v1698_v43, %v1805_v56 }
  0x71   : >> { %v886_v14 = vadd.f32 %v870_v27, %v800_v59  ;;  %v734_v29 = vadd.f32 %v718_v54, %v699_v61  ;;  %v871_v17 = vmul.f32 %v1824_v35, %v1898_v62  ;;  %v906_v20 = vmul.f32 %v1811_v28, %v1835_v45 }
  0x72   : >> { %1004 = vst [vmem:[%s1872_s12 + $0x8] sm:$0xff] %v987_v18  ;;  %v1042_v5 = vmul.f32 %v987_v18, %v987_v18  ;;  %v1919_v49 = vsel %vm577_vm1, %v947_v11, %v939_v10  ;;  %v546_v34 = vadd.f32 %v530_v9, %v495_v36  ;;  %v684_v56 = vmul.f32 %v1713_v52, %v1876_v57 }
  0x73   : >> { %v921_v24 = vadd.f32 %v905_v31, %v886_v14  ;;  %v801_v25 = vadd.f32 %v785_v58, %v734_v29  ;;  %v838_v26 = vrot.slane %v1907_v21, 7  ;;  %v846_v15 = vrot.slane %v1910_v12, 7 }
  0x74   : >> { %v1019_v41 = vadd.f32 %v987_v18, %v986_v47  ;;  %v973_v63 = vmul.f32 %v1852_v3, %v1919_v49  ;;  %v614_v27 = vadd.f32 %v598_v8, %v546_v34  ;;  %v719_v10 = vmul.f32 %v1832_v44, %v1718_v53 }
  0x75   : >> { %v988_v11 = vadd.f32 %v972_v55, %v921_v24  ;;  %v887_v38 = vadd.f32 %v871_v17, %v801_v25  ;;  %v786_v39 = vmul.f32 %v1746_v6, %v1885_v40  ;;  %v940_v51 = vrot.slane %v1907_v21, 1 }
  0x76   : >> { %v700_v54 = vadd.f32 %v684_v56, %v614_v27  ;;  %v948_v30 = vrot.slane %v1910_v12, 1  ;;  %v496_v47 = vmul.f32 %v1829_v42, %v1738_v4  ;;  %v531_v31 = vmul.f32 %v1706_v50, %v1728_v60 }
  0x77   : >> { %v1057_v58 = vadd.f32 %v1042_v5, %v1041_v46  ;;  %1005 = vst [vmem:[%s1872_s12 + $0x10] sm:$0xff] %v988_v11  ;;  %v1043_v59 = vmul.f32 %v988_v11, %v988_v11  ;;  %v922_v55 = vadd.f32 %v906_v20, %v887_v38  ;;  %v1940_v61 = vsel %vm474_vm0, %v846_v15, %v838_v26 }
  0x78   : >> { %v735_v36 = vadd.f32 %v719_v10, %v700_v54  ;;  %v872_v18 = vmul.f32 %v1773_v23, %v1940_v61  ;;  %v547_v9 = vadd.f32 %v531_v31, %v496_v47  ;;  %v599_v42 = vmul.f32 %v1757_v19, %v1847_v2  ;;  %v1968_v10 = vld [vmem:[%s1677_s19 + $0x50] sm:$0xff] }
  0x79   : >> { %v1020_v8 = vadd.f32 %v1019_v41, %v988_v11  ;;  %v989_v14 = vadd.f32 %v973_v63, %v922_v55  ;;  %v907_v50 = vmul.f32 %v1751_v7, %v1907_v21  ;;  %v685_v46 = vmul.f32 %v1768_v22, %v1898_v62  ;;  %v1971_v11 = vld [vmem:[%s1677_s19 + $0x58] sm:$0xff] }
  0x7a   : >> { %v802_v29 = vadd.f32 %v786_v39, %v735_v36  ;;  %v1952_v17 = vsel %vm577_vm1, %v940_v51, %v948_v30  ;;  %v615_v20 = vadd.f32 %v599_v42, %v547_v9  ;;  %v720_v5 = vmul.f32 %v1835_v45, %v1788_v16 }
  0x7b   : >> { %v1058_v2 = vadd.f32 %v1057_v58, %v1043_v59  ;;  %1006 = vst [vmem:[%s1872_s12 + $0x18] sm:$0xff] %v989_v14  ;;  %v974_v34 = vmul.f32 %v1778_v13, %v1952_v17  ;;  %v787_v56 = vmul.f32 %v1801_v48, %v1919_v49  ;;  %v1963_v24 = vsel %vm474_vm0, %v838_v26, %v846_v15 }
  0x7c   : >> { %v1044_v25 = vmul.f32 %v989_v14, %v989_v14  ;;  %v888_v41 = vadd.f32 %v872_v18, %v802_v29  ;;  %v701_v63 = vadd.f32 %v685_v46, %v615_v20  ;;  %v497_v27 = vmul.f32 %v1876_v57, %v1688_v37 }
  0x7d   : >> { %v1021_v38 = vadd.f32 %v1020_v8, %v989_v14  ;;  %v873_v39 = vmul.f32 %v1824_v35, %v1963_v24  ;;  %v532_v54 = vmul.f32 %v1832_v44, %v1673_v1  ;;  %v600_v26 = vmul.f32 %v1698_v43, %v1885_v40 }
  0x7e   : >> { %v923_v15 = vadd.f32 %v907_v50, %v888_v41  ;;  %v736_v47 = vadd.f32 %v720_v5, %v701_v63  ;;  %v908_v57 = vmul.f32 %v1811_v28, %v1910_v12  ;;  %v1983_v31 = vsel %vm577_vm1, %v948_v30, %v940_v51 }
  0x7f   : >> { %v548_v58 = vadd.f32 %v532_v54, %v497_v27  ;;  %v686_v59 = vmul.f32 %v1713_v52, %v1940_v61  ;;  %v839_v55 = vrot.slane %v1968_v10, 7  ;;  %v847_v44 = vrot.slane %v1971_v11, 7 }
  0x80   : >> { %v1059_v36 = vadd.f32 %v1058_v2, %v1044_v25  ;;  %v990_v40 = vadd.f32 %v974_v34, %v923_v15  ;;  %v803_v18 = vadd.f32 %v787_v56, %v736_v47  ;;  %v721_v9 = vmul.f32 %v1907_v21, %v1718_v53 }
  0x81   : >> { %v616_v42 = vadd.f32 %v600_v26, %v548_v58  ;;  %v941_v8 = vrot.slane %v1968_v10, 1  ;;  %v949_v51 = vrot.slane %v1971_v11, 1  ;;  %v498_v30 = vmul.f32 %v1898_v62, %v1738_v4 }
  0x82   : >> { %1007 = vst [vmem:[%s1872_s12 + $0x20] sm:$0xff] %v990_v40  ;;  %v1045_v14 = vmul.f32 %v990_v40, %v990_v40  ;;  %v889_v50 = vadd.f32 %v873_v39, %v803_v18  ;;  %v975_v46 = vmul.f32 %v1852_v3, %v1983_v31  ;;  %v788_v29 = vmul.f32 %v1746_v6, %v1952_v17 }
  0x83   : >> { %v702_v20 = vadd.f32 %v686_v59, %v616_v42  ;;  %v2002_v5 = vsel %vm474_vm0, %v847_v44, %v839_v55  ;;  %v533_v2 = vmul.f32 %v1835_v45, %v1728_v60  ;;  %v601_v62 = vmul.f32 %v1757_v19, %v1919_v49  ;;  %v2043_v42 = vld [vmem:[%s1677_s19 + $0x68] sm:$0xff] }
  0x84   : >> { %v1022_v34 = vadd.f32 %v1021_v38, %v990_v40  ;;  %v924_v56 = vadd.f32 %v908_v57, %v889_v50  ;;  %v874_v25 = vmul.f32 %v1773_v23, %v2002_v5  ;;  %v909_v41 = vmul.f32 %v1751_v7, %v1968_v10 }
  0x85   : >> { %v737_v63 = vadd.f32 %v721_v9, %v702_v20  ;;  %v2014_v27 = vsel %vm577_vm1, %v941_v8, %v949_v51  ;;  %v549_v39 = vadd.f32 %v533_v2, %v498_v30  ;;  %v687_v45 = vmul.f32 %v1768_v22, %v1963_v24  ;;  %v2040_v9 = vld [vmem:[%s1677_s19 + $0x60] sm:$0xff] }
  0x86   : >> { %v1060_v49 = vadd.f32 %v1059_v36, %v1045_v14  ;;  %v991_v38 = vadd.f32 %v975_v46, %v924_v56  ;;  %v976_v54 = vmul.f32 %v1778_v13, %v2014_v27  ;;  %v722_v26 = vmul.f32 %v1910_v12, %v1788_v16 }
  0x87   : >> { %v804_v15 = vadd.f32 %v788_v29, %v737_v63  ;;  %v617_v47 = vadd.f32 %v601_v62, %v549_v39  ;;  %v789_v57 = vmul.f32 %v1801_v48, %v1983_v31  ;;  %v2026_v58 = vsel %vm474_vm0, %v839_v55, %v847_v44 }
  0x88   : >> { %1008 = vst [vmem:[%s1872_s12 + $0x28] sm:$0xff] %v991_v38  ;;  %v910_v59 = vmul.f32 %v1811_v28, %v1971_v11  ;;  %v2033_v36 = vsel %vm577_vm1, %v949_v51, %v941_v8  ;;  %v499_v40 = vmul.f32 %v1940_v61, %v1688_v37  ;;  %v534_v18 = vmul.f32 %v1907_v21, %v1673_v1 }
  0x89   : >> { %v890_v55 = vadd.f32 %v874_v25, %v804_v15  ;;  %v703_v44 = vadd.f32 %v687_v45, %v617_v47  ;;  %v875_v30 = vmul.f32 %v1824_v35, %v2026_v58  ;;  %v602_v14 = vmul.f32 %v1698_v43, %v1952_v17 }
  0x8a   : >> { %v1046_v8 = vmul.f32 %v991_v38, %v991_v38  ;;  %v977_v51 = vmul.f32 %v1852_v3, %v2033_v36  ;;  %v550_v61 = vadd.f32 %v534_v18, %v499_v40  ;;  %v688_v21 = vmul.f32 %v1713_v52, %v2002_v5 }
  0x8b   : >> { %v925_v50 = vadd.f32 %v909_v41, %v890_v55  ;;  %v738_v46 = vadd.f32 %v722_v26, %v703_v44  ;;  %v840_v29 = vrot.slane %v2040_v9, 7  ;;  %v848_v20 = vrot.slane %v2043_v42, 7 }
  0x8c   : >> { %v1023_v2 = vadd.f32 %v1022_v34, %v991_v38  ;;  %v618_v62 = vadd.f32 %v602_v14, %v550_v61  ;;  %v723_v17 = vmul.f32 %v1968_v10, %v1718_v53  ;;  %v942_v56 = vrot.slane %v2040_v9, 1 }
  0x8d   : >> { %v992_v25 = vadd.f32 %v976_v54, %v925_v50  ;;  %v805_v63 = vadd.f32 %v789_v57, %v738_v46  ;;  %v950_v39 = vrot.slane %v2043_v42, 1  ;;  %v500_v41 = vmul.f32 %v1963_v24, %v1738_v4 }
  0x8e   : >> { %v704_v45 = vadd.f32 %v688_v21, %v618_v62  ;;  %v790_v26 = vmul.f32 %v1746_v6, %v2014_v27  ;;  %v2065_v34 = vsel %vm474_vm0, %v848_v20, %v840_v29  ;;  %v535_v38 = vmul.f32 %v1910_v12, %v1728_v60 }
  0x8f   : >> { %v1061_v15 = vadd.f32 %v1060_v49, %v1046_v8  ;;  %1009 = vst [vmem:[%s1872_s12 + $0x30] sm:$0xff] %v992_v25  ;;  %v1047_v54 = vmul.f32 %v992_v25, %v992_v25  ;;  %v891_v47 = vadd.f32 %v875_v30, %v805_v63  ;;  %v876_v57 = vmul.f32 %v1773_v23, %v2065_v34  ;;  %v2097_v63 = vld [vmem:[%s1677_s19 + $0x70] sm:$0xff] }
  0x90   : >> { %v739_v40 = vadd.f32 %v723_v17, %v704_v45  ;;  %v551_v24 = vadd.f32 %v535_v38, %v500_v41  ;;  %v603_v18 = vmul.f32 %v1757_v19, %v1983_v31  ;;  %v689_v55 = vmul.f32 %v1768_v22, %v2026_v58  ;;  %v2100_v41 = vld [vmem:[%s1677_s19 + $0x78] sm:$0xff] }
  0x91   : >> { %v1024_v44 = vadd.f32 %v1023_v2, %v992_v25  ;;  %v926_v14 = vadd.f32 %v910_v59, %v891_v47  ;;  %v911_v12 = vmul.f32 %v1751_v7, %v2040_v9  ;;  %v2080_v49 = vsel %vm577_vm1, %v942_v56, %v950_v39 }
  0x92   : >> { %v806_v30 = vadd.f32 %v790_v26, %v739_v40  ;;  %v978_v8 = vmul.f32 %v1778_v13, %v2080_v49  ;;  %v619_v31 = vadd.f32 %v603_v18, %v551_v24  ;;  %v724_v61 = vmul.f32 %v1971_v11, %v1788_v16 }
  0x93   : >> { %v1062_v21 = vadd.f32 %v1061_v15, %v1047_v54  ;;  %v993_v50 = vadd.f32 %v977_v51, %v926_v14  ;;  %v791_v59 = vmul.f32 %v1801_v48, %v2033_v36  ;;  %v501_v46 = vmul.f32 %v2002_v5, %v1688_v37 }
  0x94   : >> { %v892_v2 = vadd.f32 %v876_v57, %v806_v30  ;;  %v705_v62 = vadd.f32 %v689_v55, %v619_v31  ;;  %v2092_v17 = vsel %vm474_vm0, %v840_v29, %v848_v20  ;;  %v536_v25 = vmul.f32 %v1968_v10, %v1673_v1 }
  0x95   : >> { %1010 = vst [vmem:[%s1872_s12 + $0x38] sm:$0xff] %v993_v50  ;;  %v1048_v51 = vmul.f32 %v993_v50, %v993_v50  ;;  %v877_v45 = vmul.f32 %v1824_v35, %v2092_v17  ;;  %v2107_v5 = vsel %vm577_vm1, %v950_v39, %v942_v56  ;;  %v604_v29 = vmul.f32 %v1698_v43, %v2014_v27 }
  0x96   : >> { %v927_v20 = vadd.f32 %v911_v12, %v892_v2  ;;  %v740_v26 = vadd.f32 %v724_v61, %v705_v62  ;;  %v552_v10 = vadd.f32 %v536_v25, %v501_v46  ;;  %v690_v38 = vmul.f32 %v1713_v52, %v2065_v34 }
  0x97   : >> { %v912_v15 = vmul.f32 %v1811_v28, %v2043_v42  ;;  %v979_v54 = vmul.f32 %v1852_v3, %v2107_v5  ;;  %v841_v47 = vrot.slane %v2097_v63, 7  ;;  %v849_v56 = vrot.slane %v2100_v41, 7 }
  0x98   : >> { %v994_v39 = vadd.f32 %v978_v8, %v927_v20  ;;  %v807_v57 = vadd.f32 %v791_v59, %v740_v26  ;;  %v620_v27 = vadd.f32 %v604_v29, %v552_v10  ;;  %v725_v40 = vmul.f32 %v2040_v9, %v1718_v53 }
  0x99   : >> { %v1025_v24 = vadd.f32 %v1024_v44, %v993_v50  ;;  %v1063_v18 = vadd.f32 %v1062_v21, %v1048_v51  ;;  %v792_v55 = vmul.f32 %v1746_v6, %v2080_v49  ;;  %v502_v14 = vmul.f32 %v2026_v58, %v1738_v4 }
  0x9a   : >> { %1011 = vst [vmem:[%s1872_s12 + $0x40] sm:$0xff] %v994_v39  ;;  %v893_v12 = vadd.f32 %v877_v45, %v807_v57  ;;  %v706_v30 = vadd.f32 %v690_v38, %v620_v27  ;;  %v943_v31 = vrot.slane %v2097_v63, 1  ;;  %v951_v8 = vrot.slane %v2100_v41, 1  ;;  %v2157_v57 = vld [vmem:[%s1677_s19 + $0x80] sm:$0xff]  ;;  %v2160_v27 = vld [vmem:[%s1677_s19 + $0x88] sm:$0xff] }
  0x9b   : >> { %v1049_v61 = vmul.f32 %v994_v39, %v994_v39  ;;  %v2130_v59 = vsel %vm474_vm0, %v849_v56, %v841_v47  ;;  %v537_v44 = vmul.f32 %v1971_v11, %v1728_v60  ;;  %v605_v21 = vmul.f32 %v1757_v19, %v2033_v36 }
  0x9c   : >> { %v928_v58 = vadd.f32 %v912_v15, %v893_v12  ;;  %v741_v50 = vadd.f32 %v725_v40, %v706_v30  ;;  %v878_v46 = vmul.f32 %v1773_v23, %v2130_v59  ;;  %v913_v2 = vmul.f32 %v1751_v7, %v2097_v63 }
  0x9d   : >> { %v553_v62 = vadd.f32 %v537_v44, %v502_v14  ;;  %v691_v25 = vmul.f32 %v1768_v22, %v2092_v17  ;;  %v1026_v51 = vadd.f32 %v1025_v24, %v994_v39  ;;  %v959_v36 = vsel %vm577_vm1, %v943_v31, %v951_v8 }
  0x9e   : >> { %v995_v11 = vadd.f32 %v979_v54, %v928_v58  ;;  %v808_v45 = vadd.f32 %v792_v55, %v741_v50  ;;  %v1064_v29 = vadd.f32 %v1063_v18, %v1049_v61  ;;  %v726_v26 = vmul.f32 %v2043_v42, %v1788_v16 }
  0x9f   : >> { %v621_v20 = vadd.f32 %v605_v21, %v553_v62  ;;  %v503_v10 = vmul.f32 %v2065_v34, %v1688_v37  ;;  %v980_v15 = vmul.f32 %v1778_v13, %v959_v36  ;;  %v793_v39 = vmul.f32 %v1801_v48, %v2107_v5 }
  0xa0   : >> { %1012 = vst [vmem:[%s1872_s12 + $0x48] sm:$0xff] %v995_v11  ;;  %v894_v38 = vadd.f32 %v878_v46, %v808_v45  ;;  %v2154_v54 = vsel %vm474_vm0, %v841_v47, %v849_v56  ;;  %v914_v24 = vmul.f32 %v1811_v28, %v2100_v41  ;;  %v538_v34 = vmul.f32 %v2040_v9, %v1673_v1 }
  0xa1   : >> { %v707_v40 = vadd.f32 %v691_v25, %v621_v20  ;;  %v606_v18 = vmul.f32 %v1698_v43, %v2080_v49  ;;  %v1050_v55 = vmul.f32 %v995_v11, %v995_v11  ;;  %v879_v47 = vmul.f32 %v1824_v35, %v2154_v54 }
  0xa2   : >> { %v929_v14 = vadd.f32 %v913_v2, %v894_v38  ;;  %v692_v56 = vmul.f32 %v1713_v52, %v2130_v59  ;;  %v554_v30 = vadd.f32 %v538_v34, %v503_v10  ;;  %v842_v61 = vrot.slane %v2157_v57, 7 }
  0xa3   : >> { %v742_v12 = vadd.f32 %v726_v26, %v707_v40  ;;  %v850_v44 = vrot.slane %v2160_v27, 7  ;;  %v2176_v9 = vsel %vm577_vm1, %v951_v8, %v943_v31  ;;  %v944_v49 = vrot.slane %v2157_v57, 1 }
  0xa4   : >> { %v996_v21 = vadd.f32 %v980_v15, %v929_v14  ;;  %v952_v58 = vrot.slane %v2160_v27, 1  ;;  %v622_v46 = vadd.f32 %v606_v18, %v554_v30  ;;  %v727_v2 = vmul.f32 %v2097_v63, %v1718_v53 }
  0xa5   : >> { %v809_v50 = vadd.f32 %v793_v39, %v742_v12  ;;  %v504_v62 = vmul.f32 %v2092_v17, %v1738_v4  ;;  %v1027_v25 = vadd.f32 %v1026_v51, %v995_v11  ;;  %v1065_v45 = vadd.f32 %v1064_v29, %v1050_v55  ;;  %v2207_v12 = vld [vmem:[%s1677_s19 + $0x90] sm:$0xff] }
  0xa6   : >> { %1013 = vst [vmem:[%s1872_s12 + $0x50] sm:$0xff] %v996_v21  ;;  %v981_v20 = vmul.f32 %v1852_v3, %v2176_v9  ;;  %v794_v31 = vmul.f32 %v1746_v6, %v959_v36  ;;  %v708_v26 = vadd.f32 %v692_v56, %v622_v46  ;;  %v866_v10 = vsel %vm474_vm0, %v850_v44, %v842_v61 }
  0xa7   : >> { %v895_v8 = vadd.f32 %v879_v47, %v809_v50  ;;  %v539_v38 = vmul.f32 %v2043_v42, %v1728_v60  ;;  %v1051_v15 = vmul.f32 %v996_v21, %v996_v21  ;;  %v880_v17 = vmul.f32 %v1773_v23, %v866_v10 }
  0xa8   : >> { %v960_v51 = vsel %vm577_vm1, %v944_v49, %v952_v58  ;;  %v607_v11 = vmul.f32 %v1757_v19, %v2107_v5  ;;  %v743_v39 = vadd.f32 %v727_v2, %v708_v26  ;;  %v693_v34 = vmul.f32 %v1768_v22, %v2154_v54  ;;  %v1281_v2 = vld [vmem:[%s1677_s19 + $0x98] sm:$0xff] }
  0xa9   : >> { %v930_v29 = vadd.f32 %v914_v24, %v895_v8  ;;  %v555_v40 = vadd.f32 %v539_v38, %v504_v62  ;;  %v1028_v18 = vadd.f32 %v1027_v25, %v996_v21  ;;  %v915_v42 = vmul.f32 %v1751_v7, %v2157_v57 }
  0xaa   : >> { %v982_v55 = vmul.f32 %v1778_v13, %v960_v51  ;;  %v505_v14 = vmul.f32 %v2130_v59, %v1688_v37  ;;  %v810_v56 = vadd.f32 %v794_v31, %v743_v39  ;;  %v728_v24 = vmul.f32 %v2100_v41, %v1788_v16 }
  0xab   : >> { %v997_v47 = vadd.f32 %v981_v20, %v930_v29  ;;  %v623_v5 = vadd.f32 %v607_v11, %v555_v40  ;;  %v1066_v30 = vadd.f32 %v1065_v45, %v1051_v15  ;;  %v795_v21 = vmul.f32 %v1801_v48, %v2176_v9 }
  0xac   : >> { %v540_v50 = vmul.f32 %v2097_v63, %v1673_v1  ;;  %v608_v46 = vmul.f32 %v1698_v43, %v959_v36  ;;  %v896_v37 = vadd.f32 %v880_v17, %v810_v56  ;;  %v858_v62 = vsel %vm474_vm0, %v842_v61, %v850_v44 }
  0xad   : >> { %1014 = vst [vmem:[%s1872_s12 + $0x58] sm:$0xff] %v997_v47  ;;  %v709_v59 = vadd.f32 %v693_v34, %v623_v5  ;;  %v916_v25 = vmul.f32 %v1811_v28, %v2160_v27  ;;  %v881_v45 = vmul.f32 %v1824_v35, %v858_v62  ;;  %v694_v31 = vmul.f32 %v1713_v52, %v866_v10 }
  0xae   : >> { %v556_v20 = vadd.f32 %v540_v50, %v505_v14  ;;  %v843_v8 = vrot.slane %v2207_v12, 7  ;;  %v1052_v1 = vmul.f32 %v997_v47, %v997_v47  ;;  %v931_v63 = vadd.f32 %v915_v42, %v896_v37 }
  0xaf   : >> { %v744_v43 = vadd.f32 %v728_v24, %v709_v59  ;;  %v851_v36 = vrot.slane %v1281_v2, 7  ;;  %v729_v38 = vmul.f32 %v2157_v57, %v1718_v53  ;;  %v945_v61 = vrot.slane %v2207_v12, 1 }
  0xb0   : >> { %v624_v26 = vadd.f32 %v608_v46, %v556_v20  ;;  %v953_v44 = vrot.slane %v1281_v2, 1  ;;  %v998_v15 = vadd.f32 %v982_v55, %v931_v63  ;;  %v506_v52 = vmul.f32 %v2154_v54, %v1738_v4 }
  0xb1   : >> { %v811_v17 = vadd.f32 %v795_v21, %v744_v43  ;;  %v867_v11 = vsel %vm474_vm0, %v851_v36, %v843_v8  ;;  %v968_v10 = vsel %vm577_vm1, %v952_v58, %v944_v49  ;;  %v796_v39 = vmul.f32 %v1746_v6, %v960_v51 }
  0xb2   : >> { %v710_v29 = vadd.f32 %v694_v31, %v624_v26  ;;  %v541_v53 = vmul.f32 %v2100_v41, %v1728_v60  ;;  %v1029_v57 = vadd.f32 %v1028_v18, %v997_v47  ;;  %1015 = vst [vmem:[%s1872_s12 + $0x60] sm:$0xff] %v998_v15  ;;  %v983_v34 = vmul.f32 %v1852_v3, %v968_v10 }
  0xb3   : >> { %v897_v40 = vadd.f32 %v881_v45, %v811_v17  ;;  %v882_v42 = vmul.f32 %v1773_v23, %v867_v11  ;;  %v609_v4 = vmul.f32 %v1757_v19, %v2176_v9  ;;  %v695_v54 = vmul.f32 %v1768_v22, %v858_v62 }
  0xb4   : >> { %v745_v55 = vadd.f32 %v729_v38, %v710_v29  ;;  %v557_v14 = vadd.f32 %v541_v53, %v506_v52  ;;  %v1067_v49 = vadd.f32 %v1066_v30, %v1052_v1  ;;  %v1053_v6 = vmul.f32 %v998_v15, %v998_v15 }
  0xb5   : >> { %v932_v58 = vadd.f32 %v916_v25, %v897_v40  ;;  %v961_v60 = vsel %vm577_vm1, %v945_v61, %v953_v44  ;;  %v917_v51 = vmul.f32 %v1751_v7, %v2207_v12  ;;  %v730_v23 = vmul.f32 %v2160_v27, %v1788_v16 }
  0xb6   : >> { %v812_v41 = vadd.f32 %v796_v39, %v745_v55  ;;  %v625_v18 = vadd.f32 %v609_v4, %v557_v14  ;;  %v1030_v47 = vadd.f32 %v1029_v57, %v998_v15  ;;  %v859_v19 = vsel %vm474_vm0, %v843_v8, %v851_v36 }
  0xb7   : >> { %v999_v56 = vadd.f32 %v983_v34, %v932_v58  ;;  %v984_v9 = vmul.f32 %v1778_v13, %v961_v60  ;;  %v797_v24 = vmul.f32 %v1801_v48, %v968_v10  ;;  %v1068_v30 = vadd.f32 %v1067_v49, %v1053_v6 }
  0xb8   : >> { %v898_v22 = vadd.f32 %v882_v42, %v812_v41  ;;  %v711_v5 = vadd.f32 %v695_v54, %v625_v18  ;;  %v883_v16 = vmul.f32 %v1824_v35, %v859_v19  ;;  %v969_v27 = vsel %vm577_vm1, %v953_v44, %v945_v61 }
  0xb9   : >> { %1016 = vst [vmem:[%s1872_s12 + $0x68] sm:$0xff] %v999_v56  ;;  %v1054_v21 = vmul.f32 %v999_v56, %v999_v56  ;;  %v1031_v50 = vadd.f32 %v1030_v47, %v999_v56  ;;  %v918_v59 = vmul.f32 %v1811_v28, %v1281_v2  ;;  %v985_v25 = vmul.f32 %v1852_v3, %v969_v27 }
  0xba   : >> { %v933_v7 = vadd.f32 %v917_v51, %v898_v22  ;;  %v746_v12 = vadd.f32 %v730_v23, %v711_v5 }
  0xbb   : >> { %v1069_v13 = vadd.f32 %v1068_v30, %v1054_v21 }
  0xbc   : >> { %v1000_v46 = vadd.f32 %v984_v9, %v933_v7  ;;  %v813_v37 = vadd.f32 %v797_v24, %v746_v12 }
  0xbe   : >> { %1017 = vst [vmem:[%s1872_s12 + $0x70] sm:$0xff] %v1000_v46  ;;  %v1055_v62 = vmul.f32 %v1000_v46, %v1000_v46  ;;  %v899_v48 = vadd.f32 %v883_v16, %v813_v37  ;;  %v1032_v45 = vadd.f32 %v1031_v50, %v1000_v46 }
  0xc0   : >> { %v934_v20 = vadd.f32 %v918_v59, %v899_v48  ;;  %v1070_v31 = vadd.f32 %v1069_v13, %v1055_v62 }
  0xc2   : >> { %v1001_v8 = vadd.f32 %v985_v25, %v934_v20 }
  0xc4   : >> { %1018 = vst [vmem:[%s1872_s12 + $0x78] sm:$0xff] %v1001_v8  ;;  %v1033_v35 = vadd.f32 %v1032_v45, %v1001_v8  ;;  %v1056_v1 = vmul.f32 %v1001_v8, %v1001_v8 }
  0xc6   : >> { %v1034_v0 = vrot.slane %v1033_v35, 4  ;;  %v1071_v63 = vadd.f32 %v1070_v31, %v1056_v1 }
  0xc8   : >> { %v1035_v43 = vadd.f32 %v1034_v0, %v1033_v35  ;;  %v1072_v36 = vrot.slane %v1071_v63, 4 }
  0xca   : >> { %v1036_v26 = vrot.slane %v1035_v43, 2  ;;  %v1073_v38 = vadd.f32 %v1072_v36, %v1071_v63 }
  0xcc   : >> { %v1037_v28 = vadd.f32 %v1036_v26, %v1035_v43  ;;  %v1074_v2 = vrot.slane %v1073_v38, 2 }
  0xce   : >> { %v1038_v61 = vrot.slane %v1037_v28, 1  ;;  %v1075_v44 = vadd.f32 %v1074_v2, %v1073_v38 }
  0xd0   : >> { %v1039_v15 = vadd.f32 %v1038_v61, %v1037_v28  ;;  %v1076_v17 = vrot.slane %v1075_v44, 1  ;;  %431 = sbr.rel (!%p429_p5) target bundleno = 83 (0x53), region = 118 }
  0xd2   : >> { %v1040_v3 = vadd.f32 %v1436_v33, %v1039_v15   ;;  %v1077_v11 = vadd.f32 %v1076_v17, %v1075_v44 }
  0xd4   : >> { %v1078_v52 = vadd.f32 %v1432_v32, %v1077_v11   ;;  %v2279_v33 = vmov %v1040_v3 }
  0xd6   : >> { %v2278_v32 = vmov %v1078_v52  ;;  %v1080_v10 = vsel (%p429_p5), %vm1079_vm2, %v1040_v3, %v1078_v52 }
  0xd7   : > { %1081 = vst [vmem:[%s1504_s9] sm:$0x3] %v1080_v10 }
  0xd8 PF: > { %s16_s18 = sadd.s32 1, %s1424_s18  }
  0xd9   : > { %p13_p6 = scmp.ge.s32.totalorder %s16_s18, 4  }
  0xdb   :  { %15 = sbr.rel (!%p13_p6) target bundleno = 1 (0x1), region = 129 }

// kernel: mbconv_forward.8
= control target key start
LH: loop header
LB: loop body
LE: loop exit
PB: predicated region body
PF: predicated region fallthrough
CT: control target
= control target key end

     0   :  { %s1517_s21 = smov 0   ;;  %s1519_s22 = smov 0   ;;  %s1914_s0 = inlined_call_operand.vmem [shape: f32[2,256,128], index: 0, kind: input, shape index: {}]   ;;  %s1915_s1 = inlined_call_operand.vmem [shape: f32[2,1,128], index: 1, kind: input, shape index: {}]   ;;  %s1916_s2 = inlined_call_operand.vmem [shape: f32[1,128], index: 2, kind: input, shape index: {}]   ;;  %s1917_s3 = inlined_call_operand.vmem [shape: f32[1,128], index: 3, kind: input, shape index: {}]   ;;  %s1918_s4 = inlined_call_operand.vmem [shape: bf16[128,128], index: 4, kind: input, shape index: {}]   ;;  %s1919_s5 = inlined_call_operand.vmem [shape: f32[2,256,128], index: 5, kind: output, shape index: {0}]   ;;  %s1920_s6 = inlined_call_operand.vmem [shape: f32[2,1,2,128], index: 6, kind: output, shape index: {1}]  }
   0x1   :  { %s1521_s23 = smov 0  }
   0x2 LB: > { %s29_s24 = sadd.s32 1, %s1476_s22  ;;  %p1189_p0 = scmp.ge.s32.totalorder %s1480_s23, 1  ;;  %s1480_s23 = sphi %s1521_s23, %s17_s23   ;;  %s1476_s22 = sphi %s1519_s22, %s1922_s22   ;;  %s1472_s21 = sphi %s1517_s21, %s1921_s21  }
   0x3   : > { %p31_p1 = scmp.ge.s32.totalorder %s29_s24, 2  ;;  %p246_p2 = scmp.lt.s32.totalorder %s1480_s23, 3 }
   0x5   : > { %s1924_s24 = smov (%p31_p1, %s29_s24), 0  ;;  %p247_p3 = pnand %p1189_p0, %p246_p2 }
   0x6   : > { %v1322_v0 = vld [vmem:[%s1918_s4] sm:$0xff] (!%p247_p3)   ;;  %p295_p4 = scmp.lt.s32.totalorder (!%p247_p3), %s1472_s21, 1  ;;  %v1323_v1 = vld [vmem:[%s1918_s4 + $0x8] sm:$0xff] (!%p247_p3)   ;;  %v1324_v2 = vld [vmem:[%s1918_s4 + $0x10] sm:$0xff] (!%p247_p3)   ;;  %vm1045_vm0 = vcmask (!%p247_p3), 1040384  }
   0x7   : > { %250 = sbr.rel (%p247_p3) target bundleno = 354 (0x162), region = 40  ;;  %1234 = vmatprep.subr.bf16.mxu0 (!%p247_p3), %v1322_v0  ;;  %1282 = vmatprep.subr.bf16.mxu1 (!%p247_p3), %v1322_v0  ;;  %v1325_v3 = vld [vmem:[%s1918_s4 + $0x18] sm:$0xff] (!%p247_p3)   ;;  %v1562_v6 = vld [vmem:[%s1916_s2] ss:$0 sm:$0xff] (!%p247_p3)  ;;  %v1327_v29 = vld [vmem:[%s1918_s4 + $0x28] sm:$0xff] (!%p247_p3)  }
   0x8   : > { %1235 = vmatpush3.bf16.msra.mxu0 (!%p247_p3), %v1322_v0  ;;  %1290 = vmatpush3.bf16.msra.mxu1 (!%p247_p3), %v1322_v0  ;;  %v1569_v9 = vld [vmem:[%s1917_s3] ss:$0 sm:$0xff] (!%p247_p3)  ;;  %v1328_v57 = vld [vmem:[%s1918_s4 + $0x30] sm:$0xff] (!%p247_p3)  }
   0x9   : > { %1236 = vmatprep.subr.bf16.mxu0 (!%p247_p3), %v1323_v1  ;;  %1283 = vmatprep.subr.bf16.mxu1 (!%p247_p3), %v1323_v1  ;;  %v1326_v20 = vld [vmem:[%s1918_s4 + $0x20] sm:$0xff] (!%p247_p3)  }
   0xc   : > { %1237 = vmatpush3.bf16.msra.mxu0 (!%p247_p3), %v1323_v1  ;;  %1291 = vmatpush3.bf16.msra.mxu1 (!%p247_p3), %v1323_v1 }
   0xd   : > { %1238 = vmatprep.subr.bf16.mxu0 (!%p247_p3), %v1324_v2  ;;  %1284 = vmatprep.subr.bf16.mxu1 (!%p247_p3), %v1324_v2 }
   0xe   : > { %s1926_s21 = smov (!%p295_p4, %s1472_s21), 1 }
   0xf   : > { %s1208_s7 = sshll.u32 %s1926_s21, 8  ;;  %s306_s8 = scalar_lea.vmem %s1915_s1, %s1926_s21 }
  0x10   : > { %s1552_s10 = scalar_lea.vmem %s1914_s0, %s1208_s7  ;;  %1239 = vmatpush3.bf16.msra.mxu0 %v1324_v2  ;;  %1292 = vmatpush3.bf16.msra.mxu1 %v1324_v2  ;;  %s1867_s11 = scalar_lea.vmem %s1919_s5, %s1208_s7 }
  0x11   : > { %v325_v4 = vld [vmem:[%s1552_s10] sm:$0xff]  ;;  %v326_v5 = vld [vmem:[%s1552_s10 + $0x8] sm:$0xff]  ;;  %v327_v10 = vld [vmem:[%s1552_s10 + $0x10] sm:$0xff]  ;;  %1240 = vmatprep.subr.bf16.mxu0 %v1325_v3  ;;  %1285 = vmatprep.subr.bf16.mxu1 %v1325_v3  ;;  %s1194_s7 = sshll.u32 %s1926_s21, 1 }
  0x12   : > { %v364_v7 = vmul.f32 %v1562_v6, %v325_v4  ;;  %v365_v8 = vmul.f32 %v1562_v6, %v326_v5  ;;  %v328_v11 = vld [vmem:[%s1552_s10 + $0x18] sm:$0xff]  ;;  %v366_v12 = vmul.f32 %v1562_v6, %v327_v10  ;;  %v329_v13 = vld [vmem:[%s1552_s10 + $0x20] sm:$0xff]  ;;  %v330_v14 = vld [vmem:[%s1552_s10 + $0x28] sm:$0xff]  ;;  %s323_s14 = scalar_lea.vmem %s1920_s6, %s1194_s7 }
  0x13   : > { %v367_v17 = vmul.f32 %v1562_v6, %v328_v11  ;;  %v331_v18 = vld [vmem:[%s1552_s10 + $0x30] sm:$0xff]  ;;  %v332_v19 = vld [vmem:[%s1552_s10 + $0x38] sm:$0xff]  ;;  %v368_v22 = vmul.f32 %v1562_v6, %v329_v13  ;;  %v369_v23 = vmul.f32 %v1562_v6, %v330_v14  ;;  %v333_v34 = vld [vmem:[%s1552_s10 + $0x40] sm:$0xff] }
  0x14   : > { %v1577_v15 = vadd.f32 %v1569_v9, %v364_v7  ;;  %v1580_v16 = vadd.f32 %v1569_v9, %v365_v8  ;;  %v1589_v21 = vadd.f32 %v1569_v9, %v366_v12  ;;  %v370_v24 = vmul.f32 %v1562_v6, %v331_v18  ;;  %1241 = vmatpush3.bf16.msra.mxu0 %v1325_v3  ;;  %v334_v39 = vld [vmem:[%s1552_s10 + $0x48] sm:$0xff]  ;;  %v335_v44 = vld [vmem:[%s1552_s10 + $0x50] sm:$0xff]  ;;  %v336_v48 = vld [vmem:[%s1552_s10 + $0x58] sm:$0xff] }
  0x15   : > { %v1597_v27 = vadd.f32 %v1569_v9, %v367_v17  ;;  %v371_v28 = vmul.f32 %v1562_v6, %v332_v19  ;;  %v1605_v31 = vadd.f32 %v1569_v9, %v368_v22  ;;  %v1608_v32 = vadd.f32 %v1569_v9, %v369_v23  ;;  %1293 = vmatpush3.bf16.msra.mxu1 %v1325_v3  ;;  %v337_v49 = vld [vmem:[%s1552_s10 + $0x60] sm:$0xff]  ;;  %v338_v50 = vld [vmem:[%s1552_s10 + $0x68] sm:$0xff]  ;;  %v339_v3 = vld [vmem:[%s1552_s10 + $0x70] sm:$0xff] }
  0x16   : > { %v435_v25 = vsub.f32 0.0, %v1577_v15  ;;  %v436_v26 = vsub.f32 0.0, %v1580_v16  ;;  %v437_v30 = vsub.f32 0.0, %v1589_v21  ;;  %v1611_v33 = vadd.f32 %v1569_v9, %v370_v24  ;;  %1242 = vmatprep.subr.bf16.mxu0 %v1326_v20  ;;  %1286 = vmatprep.subr.bf16.mxu1 %v1326_v20  ;;  %v340_v8 = vld [vmem:[%s1552_s10 + $0x78] sm:$0xff]  ;;  %v341_v14 = vld [vmem:[%s1552_s10 + $0x80] sm:$0xff] }
  0x17   : > { %v438_v37 = vsub.f32 0.0, %v1597_v27  ;;  %v1616_v38 = vadd.f32 %v1569_v9, %v371_v28  ;;  %v439_v41 = vsub.f32 0.0, %v1605_v31  ;;  %v440_v42 = vsub.f32 0.0, %v1608_v32  ;;  %v1329_v10 = vld [vmem:[%s1918_s4 + $0x38] sm:$0xff]  }
  0x18   : > { %v467_v35 = vmul.f32 1.442695, %v435_v25  ;;  %v469_v36 = vmul.f32 1.442695, %v436_v26  ;;  %v471_v40 = vmul.f32 1.442695, %v437_v30  ;;  %v372_v47 = vmul.f32 %v1562_v6, %v333_v34  ;;  %1243 = vmatpush3.bf16.msra.mxu0 %v1326_v20 }
  0x19   : > { %v441_v43 = vsub.f32 0.0, %v1611_v33  ;;  %v473_v45 = vmul.f32 1.442695, %v438_v37  ;;  %v442_v46 = vsub.f32 0.0, %v1616_v38  ;;  %v475_v51 = vmul.f32 1.442695, %v439_v41  ;;  %1294 = vmatpush3.bf16.msra.mxu1 %v1326_v20  ;;  %1244 = vmatprep.subr.bf16.mxu0 %v1327_v29 }
  0x1a   : > { %1330 = vpow2.f32 %v467_v35  ;;  %v477_v52 = vmul.f32 1.442695, %v440_v42  ;;  %v373_v55 = vmul.f32 %v1562_v6, %v334_v39  ;;  %v1630_v56 = vadd.f32 %v1569_v9, %v372_v47  ;;  %1287 = vmatprep.subr.bf16.mxu1 %v1327_v29  ;;  %v342_v20 = vld [vmem:[%s1552_s10 + $0x88] sm:$0xff]  ;;  %v343_v47 = vld [vmem:[%s1552_s10 + $0x90] sm:$0xff] }
  0x1b   : > { %1332 = vpow2.f32 %v469_v36  ;;  %v479_v53 = vmul.f32 1.442695, %v441_v43  ;;  %v481_v54 = vmul.f32 1.442695, %v442_v46  ;;  %v374_v58 = vmul.f32 %v1562_v6, %v335_v44 }
  0x1c   : > { %1334 = vpow2.f32 %v471_v40  ;;  %v375_v59 = vmul.f32 %v1562_v6, %v336_v48  ;;  %v376_v60 = vmul.f32 %v1562_v6, %v337_v49  ;;  %v1639_v61 = vadd.f32 %v1569_v9, %v373_v55  ;;  %1245 = vmatpush3.bf16.msra.mxu0 %v1327_v29 }
  0x1d   : > { %1336 = vpow2.f32 %v473_v45  ;;  %v443_v62 = vsub.f32 0.0, %v1630_v56  ;;  %v377_v63 = vmul.f32 %v1562_v6, %v338_v50  ;;  %v1644_v0 = vadd.f32 %v1569_v9, %v374_v58  ;;  %1295 = vmatpush3.bf16.msra.mxu1 %v1327_v29  ;;  %1246 = vmatprep.subr.bf16.mxu0 %v1328_v57  ;;  %v345_v58 = vld [vmem:[%s1552_s10 + $0xa0] sm:$0xff] }
  0x1e   : > { %1338 = vpow2.f32 %v475_v51  ;;  %v1647_v1 = vadd.f32 %v1569_v9, %v375_v59  ;;  %v1650_v2 = vadd.f32 %v1569_v9, %v376_v60  ;;  %v444_v4 = vsub.f32 0.0, %v1639_v61  ;;  %1288 = vmatprep.subr.bf16.mxu1 %v1328_v57 }
  0x1f   : > { %1340 = vpow2.f32 %v477_v52  ;;  %v483_v5 = vmul.f32 1.442695, %v443_v62  ;;  %v1655_v7 = vadd.f32 %v1569_v9, %v377_v63  ;;  %v445_v11 = vsub.f32 0.0, %v1644_v0  ;;  %v344_v52 = vld [vmem:[%s1552_s10 + $0x98] sm:$0xff] }
  0x20   : > { %1342 = vpow2.f32 %v479_v53  ;;  %v446_v12 = vsub.f32 0.0, %v1647_v1  ;;  %v447_v13 = vsub.f32 0.0, %v1650_v2  ;;  %v485_v17 = vmul.f32 1.442695, %v444_v4  ;;  %1247 = vmatpush3.bf16.msra.mxu0 %v1328_v57 }
  0x21   : > { %1344 = vpow2.f32 %v481_v54  ;;  %v448_v18 = vsub.f32 0.0, %v1655_v7  ;;  %v378_v19 = vmul.f32 %v1562_v6, %v339_v3  ;;  %v487_v22 = vmul.f32 1.442695, %v445_v11  ;;  %1296 = vmatpush3.bf16.msra.mxu1 %v1328_v57  ;;  %1248 = vmatprep.subr.bf16.mxu0 %v1329_v10  ;;  %v346_v3 = vld [vmem:[%s1552_s10 + $0xa8] sm:$0xff]  ;;  %v347_v11 = vld [vmem:[%s1552_s10 + $0xb0] sm:$0xff] }
  0x22   : > { %1346 = vpow2.f32 %v483_v5  ;;  %v489_v23 = vmul.f32 1.442695, %v446_v12  ;;  %v1668_v24 = vmul.f32 1.442695, %v447_v13  ;;  %v379_v25 = vmul.f32 %v1562_v6, %v340_v8  ;;  %1289 = vmatprep.subr.bf16.mxu1 %v1329_v10 }
  0x23   : > { %1348 = vpow2.f32 %v485_v17  ;;  %v1671_v28 = vmul.f32 1.442695, %v448_v18  ;;  %v1674_v29 = vadd.f32 %v1569_v9, %v378_v19  ;;  %v380_v30 = vmul.f32 %v1562_v6, %v341_v14 }
  0x24   : > { %v1331_v26 = vpop.eup %1330  ;;  %1350 = vpow2.f32 %v487_v22  ;;  %v1678_v36 = vadd.f32 %v1569_v9, %v379_v25  ;;  %v381_v37 = vmul.f32 %v1562_v6, %v342_v20  ;;  %1249 = vmatpush3.bf16.msra.mxu0 %v1329_v10  ;;  %v382_v63 = vmul.f32 %v1562_v6, %v343_v47  ;;  %v1730_v47 = vld [vmem:[%s306_s8] ss:$0 sm:$0xff] }
  0x25   : > { %v1333_v34 = vpop.eup %1332  ;;  %v531_v35 = vadd.f32 1.0, %v1331_v26  ;;  %1352 = vpow2.f32 %v489_v23  ;;  %v449_v41 = vsub.f32 0.0, %v1674_v29  ;;  %v1683_v42 = vadd.f32 %v1569_v9, %v380_v30  ;;  %1297 = vmatpush3.bf16.msra.mxu1 %v1329_v10 }
  0x26   : > { %v1335_v39 = vpop.eup %1334  ;;  %v532_v40 = vadd.f32 1.0, %v1333_v34  ;;  %v450_v45 = vsub.f32 0.0, %v1678_v36  ;;  %v1687_v46 = vadd.f32 %v1569_v9, %v381_v37  ;;  %v383_v10 = vmul.f32 %v1562_v6, %v344_v52 }
  0x27   : > { %v1337_v43 = vpop.eup %1336  ;;  %1354 = vrcp.f32 %v531_v35  ;;  %v533_v44 = vadd.f32 1.0, %v1335_v39  ;;  %v1690_v50 = vmul.f32 1.442695, %v449_v41  ;;  %v451_v51 = vsub.f32 0.0, %v1683_v42  ;;  %v348_v39 = vld [vmem:[%s1552_s10 + $0xb8] sm:$0xff] }
  0x28   : > { %v1339_v48 = vpop.eup %1338  ;;  %1356 = vrcp.f32 %v532_v40  ;;  %v534_v49 = vadd.f32 1.0, %v1337_v43  ;;  %v1694_v55 = vmul.f32 1.442695, %v450_v45  ;;  %v452_v57 = vsub.f32 0.0, %v1687_v46 }
  0x29   : > { %v1341_v53 = vpop.eup %1340  ;;  %1358 = vrcp.f32 %v533_v44  ;;  %v535_v54 = vadd.f32 1.0, %v1339_v48  ;;  %v1698_v62 = vmul.f32 1.442695, %v451_v51  ;;  %v1707_v14 = vadd.f32 %v1569_v9, %v382_v63 }
  0x2a   : > { %v1343_v59 = vpop.eup %1342  ;;  %1360 = vrcp.f32 %v534_v49  ;;  %v536_v60 = vadd.f32 1.0, %v1341_v53  ;;  %v1702_v8 = vmul.f32 1.442695, %v452_v57  ;;  %v384_v17 = vmul.f32 %v1562_v6, %v345_v58 }
  0x2b   : > { %v1345_v4 = vpop.eup %1344  ;;  %1362 = vrcp.f32 %v535_v54  ;;  %v537_v5 = vadd.f32 1.0, %v1343_v59  ;;  %v1711_v19 = vadd.f32 %v1569_v9, %v383_v10  ;;  %v385_v20 = vmul.f32 %v1562_v6, %v346_v3 }
  0x2c   : > { %v1347_v12 = vpop.eup %1346  ;;  %1364 = vrcp.f32 %v536_v60  ;;  %v538_v13 = vadd.f32 1.0, %v1345_v4  ;;  %v453_v23 = vsub.f32 0.0, %v1707_v14  ;;  %v1720_v25 = vadd.f32 %v1569_v9, %v384_v17 }
  0x2d   : > { %1366 = vrcp.f32 %v537_v5  ;;  %v539_v18 = vadd.f32 1.0, %v1347_v12  ;;  %v1349_v22 = vpop.eup %1348  ;;  %v386_v26 = vmul.f32 %v1562_v6, %v347_v11  ;;  %v454_v35 = vsub.f32 0.0, %v1711_v19 }
  0x2e   : > { %1368 = vrcp.f32 %v538_v13  ;;  %v1351_v30 = vpop.eup %1350  ;;  %v540_v34 = vadd.f32 1.0, %v1349_v22  ;;  %v1725_v37 = vadd.f32 %v1569_v9, %v385_v20  ;;  %v503_v43 = vmul.f32 1.442695, %v453_v23 }
  0x2f   : > { %1370 = vrcp.f32 %v539_v18  ;;  %v1353_v40 = vpop.eup %1352  ;;  %v541_v41 = vadd.f32 1.0, %v1351_v30  ;;  %v455_v44 = vsub.f32 0.0, %v1720_v25  ;;  %v505_v49 = vmul.f32 1.442695, %v454_v35 }
  0x30   : > { %1372 = vpow2.f32 %v1668_v24  ;;  %v542_v48 = vadd.f32 1.0, %v1353_v40  ;;  %v456_v51 = vsub.f32 0.0, %v1725_v37  ;;  %v387_v57 = vmul.f32 %v1562_v6, %v348_v39 }
  0x31   : > { %v1355_v45 = vpop.eup %1354  ;;  %1374 = vrcp.f32 %v540_v34  ;;  %v507_v54 = vmul.f32 1.442695, %v455_v44  ;;  %v1737_v60 = vadd.f32 %v1569_v9, %v386_v26 }
  0x32   : > { %v1357_v52 = vpop.eup %1356  ;;  %v595_v53 = vmul.f32 %v1355_v45, %v1577_v15  ;;  %1376 = vrcp.f32 %v541_v41  ;;  %v509_v59 = vmul.f32 1.442695, %v456_v51  ;;  %v1743_v15 = vadd.f32 %v1569_v9, %v387_v57 }
  0x33   : > { %v1359_v58 = vpop.eup %1358  ;;  %v596_v24 = vmul.f32 %v1357_v52, %v1580_v16  ;;  %1378 = vrcp.f32 %v542_v48  ;;  %v457_v11 = vsub.f32 0.0, %v1737_v60 }
  0x34   : > { %v1361_v63 = vpop.eup %1360  ;;  %v634_v3 = vmul.f32 %v1730_v47, %v595_v53  ;;  %v597_v4 = vmul.f32 %v1359_v58, %v1589_v21  ;;  %1380 = vpow2.f32 %v1671_v28  ;;  %v458_v21 = vsub.f32 0.0, %v1743_v15 }
  0x35   : > { %v1363_v5 = vpop.eup %1362  ;;  %v635_v10 = vmul.f32 %v1730_v47, %v596_v24  ;;  %v598_v16 = vmul.f32 %v1361_v63, %v1597_v27  ;;  %1382 = vpow2.f32 %v1690_v50  ;;  %v351_v24 = vld [vmem:[%s1552_s10 + $0xd0] sm:$0xff] }
  0x36   : > { %v1365_v12 = vpop.eup %1364  ;;  %v636_v13 = vmul.f32 %v1730_v47, %v597_v4  ;;  %v599_v17 = vmul.f32 %v1363_v5, %v1605_v31  ;;  %1384 = vpow2.f32 %v1694_v55  ;;  %v511_v31 = vmul.f32 1.442695, %v457_v11  ;;  %v352_v11 = vld [vmem:[%s1552_s10 + $0xd8] sm:$0xff] }
  0x37   : > { %v1367_v28 = vpop.eup %1366  ;;  %v666_v18 = vpack.c.bf16 %v635_v10, %v634_v3  ;;  %v637_v20 = vmul.f32 %v1730_v47, %v598_v16  ;;  %v600_v27 = vmul.f32 %v1365_v12, %v1608_v32  ;;  %1386 = vpow2.f32 %v1698_v62  ;;  %v349_v32 = vld [vmem:[%s1552_s10 + $0xc0] sm:$0xff] }
  0x38   : > { %v1369_v50 = vpop.eup %1368  ;;  %v638_v22 = vmul.f32 %v1730_v47, %v599_v17  ;;  %v601_v23 = vmul.f32 %v1367_v28, %v1611_v33  ;;  %1388 = vpow2.f32 %v1702_v8  ;;  %v513_v40 = vmul.f32 1.442695, %v458_v21  ;;  %v350_v33 = vld [vmem:[%s1552_s10 + $0xc8] sm:$0xff]  ;;  %v353_v21 = vld [vmem:[%s1552_s10 + $0xe0] sm:$0xff] }
  0x39   : > { %v1371_v55 = vpop.eup %1370  ;;  %1250 = vmatprep.mubr.bf16.mxu0 %v666_v18  ;;  %v667_v26 = vpack.c.bf16 %v637_v20, %v636_v13  ;;  %v639_v30 = vmul.f32 %v1730_v47, %v600_v27  ;;  %v602_v34 = vmul.f32 %v1369_v50, %v1616_v38  ;;  %1390 = vpow2.f32 %v503_v43  ;;  %v354_v50 = vld [vmem:[%s1552_s10 + $0xe8] sm:$0xff] }
  0x3a   : > { %v1373_v35 = vpop.eup %1372  ;;  %v640_v62 = vmul.f32 %v1730_v47, %v601_v23  ;;  %v603_v39 = vmul.f32 %v1371_v55, %v1630_v56  ;;  %1392 = vpow2.f32 %v505_v49  ;;  %v388_v51 = vmul.f32 %v1562_v6, %v349_v32 }
  0x3b   : > { %v1375_v41 = vpop.eup %1374  ;;  %1251 = vmatmul.mubr.bf16.vlgmr.msra.gmra.mrb[0].mxu0 %v667_v26  ;;  %v668_v8 = vpack.c.bf16 %v639_v30, %v638_v22  ;;  %v641_v44 = vmul.f32 %v1730_v47, %v602_v34  ;;  %v543_v45 = vadd.f32 1.0, %v1373_v35  ;;  %1394 = vpow2.f32 %v507_v54 }
  0x3c   : > { %v1377_v48 = vpop.eup %1376  ;;  %v604_v38 = vmul.f32 %v1375_v41, %v1639_v61  ;;  %v642_v43 = vmul.f32 %v1730_v47, %v603_v39  ;;  %1396 = vpow2.f32 %v509_v59  ;;  %v389_v53 = vmul.f32 %v1562_v6, %v350_v33 }
  0x3d   : > { %v1379_v56 = vpop.eup %1378  ;;  %1254 = vmatprep.mubr.bf16.mxu0 %v668_v8  ;;  %v669_v49 = vpack.c.bf16 %v641_v44, %v640_v62  ;;  %v605_v52 = vmul.f32 %v1377_v48, %v1644_v0  ;;  %1398 = vrcp.f32 %v543_v45  ;;  %v1774_v61 = vadd.f32 %v1569_v9, %v388_v51 }
  0x3e   : > { %v1381_v57 = vpop.eup %1380  ;;  %v643_v54 = vmul.f32 %v1730_v47, %v604_v38  ;;  %v606_v58 = vmul.f32 %v1379_v56, %v1647_v1  ;;  %1400 = vpow2.f32 %v511_v31  ;;  %v1781_v3 = vadd.f32 %v1569_v9, %v389_v53  ;;  %v356_v53 = vld [vmem:[%s1552_s10 + $0xf8] sm:$0xff] }
  0x3f   : > { %v1383_v59 = vpop.eup %1382  ;;  %v1778_v63 = vmul.f32 %v1730_v47, %v605_v52  ;;  %v544_v0 = vadd.f32 1.0, %v1381_v57  ;;  %1402 = vpow2.f32 %v513_v40  ;;  %v459_v16 = vsub.f32 0.0, %v1774_v61  ;;  %v355_v52 = vld [vmem:[%s1552_s10 + $0xf0] sm:$0xff] }
  0x40   : > { %v1385_v4 = vpop.eup %1384  ;;  %v670_v5 = vpack.c.bf16 %v643_v54, %v642_v43  ;;  %v645_v1 = vmul.f32 %v1730_v47, %v606_v58  ;;  %v545_v10 = vadd.f32 1.0, %v1383_v59  ;;  %v390_v17 = vmul.f32 %v1562_v6, %v351_v24 }
  0x41   : > { %v1387_v12 = vpop.eup %1386  ;;  %1404 = vrcp.f32 %v544_v0  ;;  %v546_v13 = vadd.f32 1.0, %v1385_v4  ;;  %v460_v27 = vsub.f32 0.0, %v1781_v3  ;;  %v515_v31 = vmul.f32 1.442695, %v459_v16 }
  0x42   : > { %v1389_v28 = vpop.eup %1388  ;;  %v671_v18 = vpack.c.bf16 %v645_v1, %v1778_v63  ;;  %1406 = vrcp.f32 %v545_v10  ;;  %v547_v20 = vadd.f32 1.0, %v1387_v12  ;;  %v391_v55 = vmul.f32 %v1562_v6, %v352_v11 }
  0x43   : > { %v1391_v22 = vpop.eup %1390  ;;  %1255 = vmatmul.mubr.bf16.gmra.mrb[4].mxu0 %v669_v49  ;;  %1408 = vrcp.f32 %v546_v13  ;;  %v548_v23 = vadd.f32 1.0, %v1389_v28  ;;  %v1793_v34 = vadd.f32 %v1569_v9, %v390_v17  ;;  %v392_v32 = vmul.f32 %v1562_v6, %v353_v21 }
  0x44   : > { %v1393_v26 = vpop.eup %1392  ;;  %1258 = vmatprep.mubr.bf16.mxu0 %v670_v5  ;;  %1410 = vrcp.f32 %v547_v20  ;;  %v549_v30 = vadd.f32 1.0, %v1391_v22  ;;  %v1797_v39 = vadd.f32 %v1569_v9, %v391_v55  ;;  %v393_v40 = vmul.f32 %v1562_v6, %v354_v50 }
  0x45   : > { %v1395_v35 = vpop.eup %1394  ;;  %1412 = vrcp.f32 %v548_v23  ;;  %v550_v62 = vadd.f32 1.0, %v1393_v26  ;;  %v461_v8 = vsub.f32 0.0, %v1793_v34  ;;  %v1802_v44 = vadd.f32 %v1569_v9, %v392_v32 }
  0x46   : > { %v1397_v33 = vpop.eup %1396  ;;  %1414 = vrcp.f32 %v549_v30  ;;  %v551_v41 = vadd.f32 1.0, %v1395_v35  ;;  %v462_v38 = vsub.f32 0.0, %v1797_v39  ;;  %v1806_v43 = vadd.f32 %v1569_v9, %v393_v40 }
  0x47   : > { %v1399_v45 = vpop.eup %1398  ;;  %1416 = vrcp.f32 %v550_v62  ;;  %v552_v48 = vadd.f32 1.0, %v1397_v33  ;;  %v463_v49 = vsub.f32 0.0, %v1802_v44  ;;  %v517_v58 = vmul.f32 1.442695, %v460_v27 }
  0x48   : > { %v1401_v51 = vpop.eup %1400  ;;  %v607_v56 = vmul.f32 %v1399_v45, %v1650_v2  ;;  %1418 = vrcp.f32 %v551_v41  ;;  %v464_v24 = vsub.f32 0.0, %v1806_v43  ;;  %v519_v63 = vmul.f32 1.442695, %v461_v8 }
  0x49   : > { %v1403_v57 = vpop.eup %1402  ;;  %1420 = vrcp.f32 %v552_v48  ;;  %v553_v54 = vadd.f32 1.0, %v1401_v51  ;;  %v521_v0 = vmul.f32 1.442695, %v462_v38  ;;  %v394_v2 = vmul.f32 %v1562_v6, %v355_v52 }
  0x4a   : > { %v554_v59 = vadd.f32 1.0, %v1403_v57  ;;  %1422 = vpow2.f32 %v515_v31  ;;  %v646_v5 = vmul.f32 %v1730_v47, %v607_v56  ;;  %v395_v1 = vmul.f32 %v1562_v6, %v356_v53 }
  0x4b   : > { %v1405_v4 = vpop.eup %1404  ;;  %1259 = vmatmul.mubr.bf16.gmra.mrb[8].mxu0 %v671_v18  ;;  %1424 = vrcp.f32 %v553_v54  ;;  %v523_v11 = vmul.f32 1.442695, %v463_v49  ;;  %v525_v12 = vmul.f32 1.442695, %v464_v24  ;;  %v1819_v21 = vadd.f32 %v1569_v9, %v394_v2 }
  0x4c   : > { %v1407_v10 = vpop.eup %1406  ;;  %v608_v16 = vmul.f32 %v1405_v4, %v1655_v7  ;;  %1426 = vrcp.f32 %v554_v59  ;;  %v1822_v28 = vadd.f32 %v1569_v9, %v395_v1 }
  0x4d   : > { %v1409_v13 = vpop.eup %1408  ;;  %v609_v17 = vmul.f32 %v1407_v10, %v1674_v29  ;;  %1428 = vpow2.f32 %v517_v58  ;;  %v465_v29 = vsub.f32 0.0, %v1819_v21 }
  0x4e   : > { %v1411_v18 = vpop.eup %1410  ;;  %v647_v20 = vmul.f32 %v1730_v47, %v608_v16  ;;  %v610_v6 = vmul.f32 %v1409_v13, %v1678_v36  ;;  %1430 = vpow2.f32 %v519_v63  ;;  %v466_v30 = vsub.f32 0.0, %v1822_v28 }
  0x4f   : > { %v1413_v7 = vpop.eup %1412  ;;  %v648_v27 = vmul.f32 %v1730_v47, %v609_v17  ;;  %v611_v50 = vmul.f32 %v1411_v18, %v1683_v42  ;;  %1432 = vpow2.f32 %v521_v0  ;;  %v527_v40 = vmul.f32 1.442695, %v465_v29 }
  0x50   : > { %v1415_v22 = vpop.eup %1414  ;;  %v672_v23 = vpack.c.bf16 %v647_v20, %v646_v5  ;;  %v649_v31 = vmul.f32 %v1730_v47, %v610_v6  ;;  %v612_v9 = vmul.f32 %v1413_v7, %v1687_v46  ;;  %1434 = vpow2.f32 %v523_v11 }
  0x51   : > { %v1417_v55 = vpop.eup %1416  ;;  %v650_v26 = vmul.f32 %v1730_v47, %v611_v50  ;;  %v613_v36 = vmul.f32 %v1415_v22, %v1707_v14  ;;  %1436 = vpow2.f32 %v525_v12  ;;  %v529_v8 = vmul.f32 1.442695, %v466_v30 }
  0x52   : > { %v1419_v32 = vpop.eup %1418  ;;  %1262 = vmatprep.mubr.bf16.mxu0 %v672_v23  ;;  %v673_v42 = vpack.c.bf16 %v649_v31, %v648_v27  ;;  %v651_v35 = vmul.f32 %v1730_v47, %v612_v9  ;;  %v614_v62 = vmul.f32 %v1417_v55, %v1711_v19  ;;  %1438 = vpow2.f32 %v527_v40 }
  0x53   : > { %v1421_v33 = vpop.eup %1420  ;;  %v652_v46 = vmul.f32 %v1730_v47, %v613_v36  ;;  %v615_v41 = vmul.f32 %v1419_v32, %v1720_v25  ;;  %1440 = vpow2.f32 %v529_v8 }
  0x54   : > { %v1423_v45 = vpop.eup %1422  ;;  %1263 = vmatmul.mubr.bf16.gmra.mrb[12].mxu0 %v673_v42  ;;  %v674_v14 = vpack.c.bf16 %v651_v35, %v650_v26  ;;  %v653_v48 = vmul.f32 %v1730_v47, %v614_v62  ;;  %v616_v38 = vmul.f32 %v1421_v33, %v1725_v37 }
  0x55   : > { %v1425_v51 = vpop.eup %1424  ;;  %v654_v56 = vmul.f32 %v1730_v47, %v615_v41  ;;  %v555_v49 = vadd.f32 1.0, %v1423_v45 }
  0x56   : > { %v1427_v19 = vpop.eup %1426  ;;  %1266 = vmatprep.mubr.bf16.mxu1 %v674_v14  ;;  %v675_v52 = vpack.c.bf16 %v653_v48, %v652_v46  ;;  %v655_v53 = vmul.f32 %v1730_v47, %v616_v38  ;;  %v617_v25 = vmul.f32 %v1425_v51, %v1737_v60 }
  0x57   : > { %v1429_v57 = vpop.eup %1428  ;;  %v618_v54 = vmul.f32 %v1427_v19, %v1743_v15  ;;  %1442 = vrcp.f32 %v555_v49 }
  0x58   : > { %v1431_v58 = vpop.eup %1430  ;;  %1267 = vmatmul.mubr.bf16.vlgmr.msra.gmra.mrb[0].mxu1 %v675_v52  ;;  %v676_v37 = vpack.c.bf16 %v655_v53, %v654_v56  ;;  %v656_v24 = vmul.f32 %v1730_v47, %v617_v25  ;;  %v556_v59 = vadd.f32 1.0, %v1429_v57 }
  0x59   : > { %v1433_v63 = vpop.eup %1432  ;;  %v657_v0 = vmul.f32 %v1730_v47, %v618_v54  ;;  %v557_v4 = vadd.f32 1.0, %v1431_v58 }
  0x5a   : > { %v1435_v5 = vpop.eup %1434  ;;  %1270 = vmatprep.mubr.bf16.mxu1 %v676_v37  ;;  %1444 = vrcp.f32 %v556_v59  ;;  %v558_v2 = vadd.f32 1.0, %v1433_v63 }
  0x5b   : > { %v1437_v1 = vpop.eup %1436  ;;  %1446 = vrcp.f32 %v557_v4  ;;  %v559_v60 = vadd.f32 1.0, %v1435_v5  ;;  %v677_v10 = vpack.c.bf16 %v657_v0, %v656_v24 }
  0x5c   : > { %1448 = vrcp.f32 %v558_v2  ;;  %v560_v15 = vadd.f32 1.0, %v1437_v1  ;;  %v1439_v16 = vpop.eup %1438 }
  0x5d   : > { %1450 = vrcp.f32 %v559_v60  ;;  %v1441_v11 = vpop.eup %1440  ;;  %v561_v12 = vadd.f32 1.0, %v1439_v16 }
  0x5e   : > { %1452 = vrcp.f32 %v560_v15  ;;  %v562_v13 = vadd.f32 1.0, %v1441_v11 }
  0x5f   : > { %1454 = vrcp.f32 %v561_v12 }
  0x60   : > { %1271 = vmatmul.mubr.bf16.gmra.mrb[4].mxu1 %v677_v10  ;;  %1456 = vrcp.f32 %v562_v13 }
  0x61   : > { %v1443_v17 = vpop.eup %1442 }
  0x62   : > { %v619_v18 = vmul.f32 %v1443_v17, %v1774_v61 }
  0x64   : > { %v1445_v20 = vpop.eup %1444  ;;  %v658_v27 = vmul.f32 %v1730_v47, %v619_v18 }
  0x65   : > { %v1447_v6 = vpop.eup %1446  ;;  %v620_v7 = vmul.f32 %v1445_v20, %v1781_v3 }
  0x66   : > { %v1449_v50 = vpop.eup %1448  ;;  %v621_v29 = vmul.f32 %v1447_v6, %v1793_v34 }
  0x67   : > { %v1451_v22 = vpop.eup %1450  ;;  %v659_v23 = vmul.f32 %v1730_v47, %v620_v7  ;;  %v622_v31 = vmul.f32 %v1449_v50, %v1797_v39 }
  0x68   : > { %v1453_v9 = vpop.eup %1452  ;;  %v660_v55 = vmul.f32 %v1730_v47, %v621_v29  ;;  %v623_v61 = vmul.f32 %v1451_v22, %v1802_v44 }
  0x69   : > { %v678_v26 = vpack.c.bf16 %v659_v23, %v658_v27  ;;  %v661_v36 = vmul.f32 %v1730_v47, %v622_v31  ;;  %v624_v3 = vmul.f32 %v1453_v9, %v1806_v43  ;;  %v1455_v32 = vpop.eup %1454 }
  0x6a   : > { %v662_v30 = vmul.f32 %v1730_v47, %v623_v61  ;;  %v1457_v35 = vpop.eup %1456  ;;  %v625_v39 = vmul.f32 %v1455_v32, %v1819_v21 }
  0x6b   : > { %1274 = vmatprep.mubr.bf16.mxu1 %v678_v26  ;;  %v679_v34 = vpack.c.bf16 %v661_v36, %v660_v55  ;;  %v663_v42 = vmul.f32 %v1730_v47, %v624_v3  ;;  %v626_v44 = vmul.f32 %v1457_v35, %v1822_v28 }
  0x6c   : > { %v664_v40 = vmul.f32 %v1730_v47, %v625_v39 }
  0x6d   : > { %1275 = vmatmul.mubr.bf16.gmra.mrb[8].mxu1 %v679_v34  ;;  %v680_v62 = vpack.c.bf16 %v663_v42, %v662_v30  ;;  %v665_v43 = vmul.f32 %v1730_v47, %v626_v44 }
  0x6f   : > { %1278 = vmatprep.mubr.bf16.mxu1 %v680_v62  ;;  %v681_v33 = vpack.c.bf16 %v665_v43, %v664_v40 }
  0x75   : > { %1279 = vmatmul.mubr.bf16.gmra.mrb[12].mxu1 %v681_v33 }
 0x10e   : > { %v1252_v21 = vpop.f32.mrb[0].mxu0 }
 0x10f   : > { %909 = vst [vmem:[%s1867_s11 + $0x10] sm:$0xff] %v1252_v21  ;;  %v780_v28 = vpop.f32.mrb[1].mxu0  ;;  %v978_v14 = vmul.f32 %v1252_v21, %v1252_v21 }
 0x110   : > { %907 = vst [vmem:[%s1867_s11] sm:$0xff] %v780_v28  ;;  %v1253_v46 = vpop.f32.mrb[2].mxu0  ;;  %v976_v41 = vmul.f32 %v780_v28, %v780_v28 }
 0x111   : > { %910 = vst [vmem:[%s1867_s11 + $0x18] sm:$0xff] %v1253_v46  ;;  %v783_v47 = vpop.f32.mrb[3].mxu0  ;;  %v979_v51 = vmul.f32 %v1253_v46, %v1253_v46 }
 0x112   : > { %908 = vst [vmem:[%s1867_s11 + $0x8] sm:$0xff] %v783_v47  ;;  %v939_v8 = vadd.f32 %v783_v47, %v780_v28  ;;  %v977_v45 = vmul.f32 %v783_v47, %v783_v47 }
 0x114   : > { %v940_v48 = vadd.f32 %v1252_v21, %v939_v8  ;;  %v1008_v38 = vadd.f32 %v977_v45, %v976_v41 }
 0x116   : > { %v1009_v56 = vadd.f32 %v1008_v38, %v978_v14  ;;  %v1256_v49 = vpop.f32.mrb[4].mxu0  ;;  %v941_v19 = vadd.f32 %v1253_v46, %v940_v48 }
 0x117   : > { %913 = vst [vmem:[%s1867_s11 + $0x30] sm:$0xff] %v1256_v49  ;;  %v796_v52 = vpop.f32.mrb[5].mxu0  ;;  %v982_v63 = vmul.f32 %v1256_v49, %v1256_v49 }
 0x118   : > { %911 = vst [vmem:[%s1867_s11 + $0x20] sm:$0xff] %v796_v52  ;;  %v942_v53 = vadd.f32 %v941_v19, %v796_v52  ;;  %v980_v25 = vmul.f32 %v796_v52, %v796_v52  ;;  %v1010_v57 = vadd.f32 %v1009_v56, %v979_v51  ;;  %v1257_v54 = vpop.f32.mrb[6].mxu0 }
 0x119   : > { %914 = vst [vmem:[%s1867_s11 + $0x38] sm:$0xff] %v1257_v54  ;;  %v799_v58 = vpop.f32.mrb[7].mxu0  ;;  %v983_v5 = vmul.f32 %v1257_v54, %v1257_v54 }
 0x11a   : > { %v1011_v37 = vadd.f32 %v1010_v57, %v980_v25  ;;  %912 = vst [vmem:[%s1867_s11 + $0x28] sm:$0xff] %v799_v58  ;;  %v943_v24 = vadd.f32 %v942_v53, %v799_v58  ;;  %v981_v59 = vmul.f32 %v799_v58, %v799_v58 }
 0x11c   : > { %v944_v0 = vadd.f32 %v1256_v49, %v943_v24  ;;  %v1012_v4 = vadd.f32 %v1011_v37, %v981_v59 }
 0x11e   : > { %v1013_v2 = vadd.f32 %v1012_v4, %v982_v63  ;;  %v1260_v1 = vpop.f32.mrb[8].mxu0  ;;  %v945_v60 = vadd.f32 %v1257_v54, %v944_v0 }
 0x11f   : > { %917 = vst [vmem:[%s1867_s11 + $0x50] sm:$0xff] %v1260_v1  ;;  %v812_v10 = vpop.f32.mrb[9].mxu0  ;;  %v986_v6 = vmul.f32 %v1260_v1, %v1260_v1 }
 0x120   : > { %915 = vst [vmem:[%s1867_s11 + $0x40] sm:$0xff] %v812_v10  ;;  %v946_v15 = vadd.f32 %v945_v60, %v812_v10  ;;  %v984_v16 = vmul.f32 %v812_v10, %v812_v10  ;;  %v1014_v11 = vadd.f32 %v1013_v2, %v983_v5  ;;  %v1261_v12 = vpop.f32.mrb[10].mxu0 }
 0x121   : > { %918 = vst [vmem:[%s1867_s11 + $0x58] sm:$0xff] %v1261_v12  ;;  %v815_v13 = vpop.f32.mrb[11].mxu0  ;;  %v987_v50 = vmul.f32 %v1261_v12, %v1261_v12 }
 0x122   : > { %v1015_v17 = vadd.f32 %v1014_v11, %v984_v16  ;;  %916 = vst [vmem:[%s1867_s11 + $0x48] sm:$0xff] %v815_v13  ;;  %v947_v18 = vadd.f32 %v946_v15, %v815_v13  ;;  %v985_v20 = vmul.f32 %v815_v13, %v815_v13 }
 0x124   : > { %v948_v7 = vadd.f32 %v1260_v1, %v947_v18  ;;  %v1016_v27 = vadd.f32 %v1015_v17, %v985_v20 }
 0x126   : > { %v1017_v29 = vadd.f32 %v1016_v27, %v986_v6  ;;  %v949_v22 = vadd.f32 %v1261_v12, %v948_v7 }
 0x127   : > { %v1264_v23 = vpop.f32.mrb[12].mxu0 }
 0x128   : > { %921 = vst [vmem:[%s1867_s11 + $0x70] sm:$0xff] %v1264_v23  ;;  %v828_v31 = vpop.f32.mrb[13].mxu0  ;;  %v1018_v9 = vadd.f32 %v1017_v29, %v987_v50  ;;  %v990_v35 = vmul.f32 %v1264_v23, %v1264_v23 }
 0x129   : > { %919 = vst [vmem:[%s1867_s11 + $0x60] sm:$0xff] %v828_v31  ;;  %v950_v55 = vadd.f32 %v949_v22, %v828_v31  ;;  %v988_v61 = vmul.f32 %v828_v31, %v828_v31  ;;  %v1265_v26 = vpop.f32.mrb[14].mxu0 }
 0x12a   : > { %922 = vst [vmem:[%s1867_s11 + $0x78] sm:$0xff] %v1265_v26  ;;  %v831_v36 = vpop.f32.mrb[15].mxu0  ;;  %v991_v43 = vmul.f32 %v1265_v26, %v1265_v26 }
 0x12b   : > { %v1019_v3 = vadd.f32 %v1018_v9, %v988_v61  ;;  %920 = vst [vmem:[%s1867_s11 + $0x68] sm:$0xff] %v831_v36  ;;  %v951_v30 = vadd.f32 %v950_v55, %v831_v36  ;;  %v989_v32 = vmul.f32 %v831_v36, %v831_v36  ;;  %v1268_v34 = vpop.f32.mrb[0].mxu1 }
 0x12c   : > { %925 = vst [vmem:[%s1867_s11 + $0x90] sm:$0xff] %v1268_v34  ;;  %v844_v42 = vpop.f32.mrb[1].mxu1  ;;  %v994_v38 = vmul.f32 %v1268_v34, %v1268_v34 }
 0x12d   : > { %v952_v39 = vadd.f32 %v1264_v23, %v951_v30  ;;  %v1020_v62 = vadd.f32 %v1019_v3, %v989_v32  ;;  %923 = vst [vmem:[%s1867_s11 + $0x80] sm:$0xff] %v844_v42  ;;  %v1269_v44 = vpop.f32.mrb[2].mxu1  ;;  %v992_v28 = vmul.f32 %v844_v42, %v844_v42 }
 0x12e   : > { %926 = vst [vmem:[%s1867_s11 + $0x98] sm:$0xff] %v1269_v44  ;;  %v847_v40 = vpop.f32.mrb[3].mxu1  ;;  %v995_v52 = vmul.f32 %v1269_v44, %v1269_v44 }
 0x12f   : > { %v1021_v33 = vadd.f32 %v1020_v62, %v990_v35  ;;  %v953_v21 = vadd.f32 %v1265_v26, %v952_v39  ;;  %924 = vst [vmem:[%s1867_s11 + $0x88] sm:$0xff] %v847_v40  ;;  %v993_v45 = vmul.f32 %v847_v40, %v847_v40 }
 0x131   : > { %v954_v46 = vadd.f32 %v953_v21, %v844_v42  ;;  %v1022_v47 = vadd.f32 %v1021_v33, %v991_v43 }
 0x133   : > { %v1023_v41 = vadd.f32 %v1022_v47, %v992_v28  ;;  %v955_v8 = vadd.f32 %v954_v46, %v847_v40  ;;  %v1272_v14 = vpop.f32.mrb[4].mxu1 }
 0x134   : > { %929 = vst [vmem:[%s1867_s11 + $0xb0] sm:$0xff] %v1272_v14  ;;  %v860_v48 = vpop.f32.mrb[5].mxu1  ;;  %v998_v63 = vmul.f32 %v1272_v14, %v1272_v14 }
 0x135   : > { %v956_v51 = vadd.f32 %v1268_v34, %v955_v8  ;;  %v1024_v56 = vadd.f32 %v1023_v41, %v993_v45  ;;  %927 = vst [vmem:[%s1867_s11 + $0xa0] sm:$0xff] %v860_v48  ;;  %v1273_v49 = vpop.f32.mrb[6].mxu1  ;;  %v996_v57 = vmul.f32 %v860_v48, %v860_v48 }
 0x136   : > { %930 = vst [vmem:[%s1867_s11 + $0xb8] sm:$0xff] %v1273_v49  ;;  %v863_v19 = vpop.f32.mrb[7].mxu1  ;;  %v999_v5 = vmul.f32 %v1273_v49, %v1273_v49 }
 0x137   : > { %v1025_v53 = vadd.f32 %v1024_v56, %v994_v38  ;;  %v957_v25 = vadd.f32 %v1269_v44, %v956_v51  ;;  %928 = vst [vmem:[%s1867_s11 + $0xa8] sm:$0xff] %v863_v19  ;;  %v997_v59 = vmul.f32 %v863_v19, %v863_v19 }
 0x139   : > { %v958_v54 = vadd.f32 %v957_v25, %v860_v48  ;;  %v1026_v58 = vadd.f32 %v1025_v53, %v995_v52 }
 0x13b   : > { %v1027_v37 = vadd.f32 %v1026_v58, %v996_v57  ;;  %v959_v24 = vadd.f32 %v958_v54, %v863_v19 }
 0x13d   : > { %v960_v0 = vadd.f32 %v1272_v14, %v959_v24  ;;  %v1028_v4 = vadd.f32 %v1027_v37, %v997_v59 }
 0x13f   : > { %v1029_v2 = vadd.f32 %v1028_v4, %v998_v63  ;;  %v961_v1 = vadd.f32 %v1273_v49, %v960_v0 }
 0x140   : > { %v1276_v60 = vpop.f32.mrb[8].mxu1 }
 0x141   : > { %933 = vst [vmem:[%s1867_s11 + $0xd0] sm:$0xff] %v1276_v60  ;;  %v876_v10 = vpop.f32.mrb[9].mxu1  ;;  %v1030_v15 = vadd.f32 %v1029_v2, %v999_v5  ;;  %v1002_v6 = vmul.f32 %v1276_v60, %v1276_v60 }
 0x142   : > { %931 = vst [vmem:[%s1867_s11 + $0xc0] sm:$0xff] %v876_v10  ;;  %v962_v16 = vadd.f32 %v961_v1, %v876_v10  ;;  %v1000_v11 = vmul.f32 %v876_v10, %v876_v10  ;;  %v1277_v12 = vpop.f32.mrb[10].mxu1 }
 0x143   : > { %934 = vst [vmem:[%s1867_s11 + $0xd8] sm:$0xff] %v1277_v12  ;;  %v879_v13 = vpop.f32.mrb[11].mxu1  ;;  %v1003_v50 = vmul.f32 %v1277_v12, %v1277_v12 }
 0x144   : > { %v1031_v17 = vadd.f32 %v1030_v15, %v1000_v11  ;;  %932 = vst [vmem:[%s1867_s11 + $0xc8] sm:$0xff] %v879_v13  ;;  %v963_v18 = vadd.f32 %v962_v16, %v879_v13  ;;  %v1001_v20 = vmul.f32 %v879_v13, %v879_v13 }
 0x146   : > { %v964_v7 = vadd.f32 %v1276_v60, %v963_v18  ;;  %v1032_v27 = vadd.f32 %v1031_v17, %v1001_v20 }
 0x148   : > { %v1033_v29 = vadd.f32 %v1032_v27, %v1002_v6  ;;  %v1280_v22 = vpop.f32.mrb[12].mxu1  ;;  %v965_v23 = vadd.f32 %v1277_v12, %v964_v7 }
 0x149   : > { %937 = vst [vmem:[%s1867_s11 + $0xf0] sm:$0xff] %v1280_v22  ;;  %v892_v31 = vpop.f32.mrb[13].mxu1  ;;  %v1006_v34 = vmul.f32 %v1280_v22, %v1280_v22 }
 0x14a   : > { %935 = vst [vmem:[%s1867_s11 + $0xe0] sm:$0xff] %v892_v31  ;;  %v966_v9 = vadd.f32 %v965_v23, %v892_v31  ;;  %v1004_v55 = vmul.f32 %v892_v31, %v892_v31  ;;  %v1034_v61 = vadd.f32 %v1033_v29, %v1003_v50  ;;  %v1281_v26 = vpop.f32.mrb[14].mxu1 }
 0x14b   : > { %938 = vst [vmem:[%s1867_s11 + $0xf8] sm:$0xff] %v1281_v26  ;;  %v895_v36 = vpop.f32.mrb[15].mxu1  ;;  %v1007_v39 = vmul.f32 %v1281_v26, %v1281_v26 }
 0x14c   : > { %v1035_v3 = vadd.f32 %v1034_v61, %v1004_v55  ;;  %936 = vst [vmem:[%s1867_s11 + $0xe8] sm:$0xff] %v895_v36  ;;  %v967_v30 = vadd.f32 %v966_v9, %v895_v36  ;;  %v1005_v32 = vmul.f32 %v895_v36, %v895_v36 }
 0x14e   : > { %v968_v42 = vadd.f32 %v1280_v22, %v967_v30  ;;  %v1036_v35 = vadd.f32 %v1035_v3, %v1005_v32 }
 0x150   : > { %v969_v62 = vadd.f32 %v1281_v26, %v968_v42  ;;  %v1037_v44 = vadd.f32 %v1036_v35, %v1006_v34 }
 0x152   : > { %v970_v40 = vrot.slane %v969_v62, 4  ;;  %v1038_v43 = vadd.f32 %v1037_v44, %v1007_v39 }
 0x154   : > { %v971_v33 = vadd.f32 %v970_v40, %v969_v62  ;;  %v1039_v21 = vrot.slane %v1038_v43, 4 }
 0x156   : > { %v972_v28 = vrot.slane %v971_v33, 2  ;;  %v1040_v46 = vadd.f32 %v1039_v21, %v1038_v43 }
 0x158   : > { %v973_v47 = vadd.f32 %v972_v28, %v971_v33  ;;  %v1041_v41 = vrot.slane %v1040_v46, 2 }
 0x15a   : > { %v974_v8 = vrot.slane %v973_v47, 1  ;;  %v1042_v45 = vadd.f32 %v1041_v41, %v1040_v46 }
 0x15c   : > { %v1043_v14 = vrot.slane %v1042_v45, 1  ;;  %v975_v48 = vadd.f32 %v974_v8, %v973_v47 }
 0x15e   : > { %v1044_v38 = vadd.f32 %v1043_v14, %v1042_v45 }
 0x160   : > { %v1046_v51 = vsel %vm1045_vm0, %v975_v48, %v1044_v38 }
 0x161   : > { %1047 = vst [vmem:[%s323_s14] sm:$0x3] %v1046_v51 }
 0x162 PF: > { %s17_s23 = sadd.s32 1, %s1480_s23   ;;  %s1921_s21 = smov %s1476_s22 }
 0x163   : > { %p14_p5 = scmp.ge.s32.totalorder %s17_s23, 4   ;;  %s1922_s22 = smov %s1924_s24 }
 0x165   :  { %16 = sbr.rel (!%p14_p5) target bundleno = 2 (0x2), region = 85 }

// kernel: mbconv_forward.9
= control target key start
LH: loop header
LB: loop body
LE: loop exit
PB: predicated region body
PF: predicated region fallthrough
CT: control target
= control target key end

     0   :  { %s873_s15 = smov 0   ;;  %s1217_s0 = inlined_call_operand.vmem [shape: f32[512,128], index: 0, kind: input, shape index: {}]   ;;  %s1218_s1 = inlined_call_operand.vmem [shape: f32[1,128], index: 1, kind: input, shape index: {}]   ;;  %s1219_s2 = inlined_call_operand.vmem [shape: f32[1,128], index: 2, kind: input, shape index: {}]   ;;  %s1220_s3 = inlined_call_operand.vmem [shape: f32[512,128], index: 3, kind: input, shape index: {}]   ;;  %s1221_s4 = inlined_call_operand.vmem [shape: f32[512,128], index: 4, kind: output, shape index: {}]  }
   0x1 LB: > { %s689_s16 = sadd.s32 4294967295, %s846_s15   ;;  %p693_p0 = scmp.ge.s32.totalorder %s846_s15, 1  ;;  %s846_s15 = sphi %s873_s15, %s14_s15  }
   0x2   : > { %p174_p1 = scmp.lt.s32.totalorder %s846_s15, 3 }
   0x4   : > { %p175_p2 = pnand %p693_p0, %p174_p1 }
   0x5   : > { %s694_s17 = sshll.u32 (!%p175_p2), %s689_s16, 5  ;;  %v886_v0 = vld [vmem:[%s1218_s1] ss:$0 sm:$0xff] (!%p175_p2) }
   0x6   : > { %178 = sbr.rel (%p175_p2) target bundleno = 111 (0x6f), region = 36  ;;  %p206_p3 = scmp.lt.s32.totalorder (!%p175_p2), %s694_s17, 63  ;;  %v898_v2 = vld [vmem:[%s1219_s2] ss:$0 sm:$0xff] (!%p175_p2) }
   0xd   : > { %s1223_s17 = smov (!%p206_p3, %s694_s17), 63 }
   0xe   : > { %s881_s18 = sshll.u32 %s1223_s17, 3 }
   0xf   : > { %s892_s23 = scalar_lea.vmem %s1217_s0, %s881_s18  ;;  %s1033_s28 = scalar_lea.vmem %s1220_s3, %s881_s18 }
  0x10   : > { %v223_v1 = vld [vmem:[%s892_s23] sm:$0xff]  ;;  %v224_v3 = vld [vmem:[%s892_s23 + $0x8] sm:$0xff]  ;;  %v225_v6 = vld [vmem:[%s892_s23 + $0x10] sm:$0xff]  ;;  %s1060_s5 = scalar_lea.vmem %s1221_s4, %s881_s18 }
  0x11   : > { %v262_v4 = vmul.f32 %v886_v0, %v223_v1  ;;  %v263_v5 = vmul.f32 %v886_v0, %v224_v3  ;;  %v264_v7 = vmul.f32 %v886_v0, %v225_v6  ;;  %v226_v8 = vld [vmem:[%s892_s23 + $0x18] sm:$0xff]  ;;  %v227_v9 = vld [vmem:[%s892_s23 + $0x20] sm:$0xff]  ;;  %v228_v14 = vld [vmem:[%s892_s23 + $0x28] sm:$0xff] }
  0x12   : > { %v265_v12 = vmul.f32 %v886_v0, %v226_v8  ;;  %v266_v13 = vmul.f32 %v886_v0, %v227_v9  ;;  %v267_v16 = vmul.f32 %v886_v0, %v228_v14  ;;  %v229_v17 = vld [vmem:[%s892_s23 + $0x30] sm:$0xff]  ;;  %v230_v18 = vld [vmem:[%s892_s23 + $0x38] sm:$0xff]  ;;  %v231_v27 = vld [vmem:[%s892_s23 + $0x40] sm:$0xff] }
  0x13   : > { %v908_v10 = vadd.f32 %v898_v2, %v262_v4  ;;  %v911_v11 = vadd.f32 %v898_v2, %v263_v5  ;;  %v917_v15 = vadd.f32 %v898_v2, %v264_v7  ;;  %v268_v25 = vmul.f32 %v886_v0, %v229_v17  ;;  %v232_v36 = vld [vmem:[%s892_s23 + $0x48] sm:$0xff]  ;;  %v233_v37 = vld [vmem:[%s892_s23 + $0x50] sm:$0xff]  ;;  %v234_v41 = vld [vmem:[%s892_s23 + $0x58] sm:$0xff] }
  0x14   : > { %v925_v21 = vadd.f32 %v898_v2, %v265_v12  ;;  %v928_v22 = vadd.f32 %v898_v2, %v266_v13  ;;  %v932_v24 = vadd.f32 %v898_v2, %v267_v16  ;;  %v269_v26 = vmul.f32 %v886_v0, %v230_v18  ;;  %v235_v48 = vld [vmem:[%s892_s23 + $0x60] sm:$0xff]  ;;  %v236_v49 = vld [vmem:[%s892_s23 + $0x68] sm:$0xff]  ;;  %v237_v59 = vld [vmem:[%s892_s23 + $0x70] sm:$0xff] }
  0x15   : > { %v333_v19 = vsub.f32 0.0, %v908_v10  ;;  %v334_v20 = vsub.f32 0.0, %v911_v11  ;;  %v335_v23 = vsub.f32 0.0, %v917_v15  ;;  %v941_v34 = vadd.f32 %v898_v2, %v268_v25  ;;  %v238_v63 = vld [vmem:[%s892_s23 + $0x78] sm:$0xff]  ;;  %v239_v5 = vld [vmem:[%s892_s23 + $0x80] sm:$0xff]  ;;  %v240_v6 = vld [vmem:[%s892_s23 + $0x88] sm:$0xff] }
  0x16   : > { %v336_v30 = vsub.f32 0.0, %v925_v21  ;;  %v337_v31 = vsub.f32 0.0, %v928_v22  ;;  %v338_v33 = vsub.f32 0.0, %v932_v24  ;;  %v944_v35 = vadd.f32 %v898_v2, %v269_v26 }
  0x17   : > { %v365_v28 = vmul.f32 1.442695, %v333_v19  ;;  %v367_v29 = vmul.f32 1.442695, %v334_v20  ;;  %v369_v32 = vmul.f32 1.442695, %v335_v23  ;;  %v270_v40 = vmul.f32 %v886_v0, %v231_v27 }
  0x18   : > { %v371_v38 = vmul.f32 1.442695, %v336_v30  ;;  %v373_v39 = vmul.f32 1.442695, %v337_v31  ;;  %v375_v42 = vmul.f32 1.442695, %v338_v33  ;;  %v271_v46 = vmul.f32 %v886_v0, %v232_v36 }
  0x19   : > { %712 = vpow2.f32 %v365_v28  ;;  %v339_v43 = vsub.f32 0.0, %v941_v34  ;;  %v340_v44 = vsub.f32 0.0, %v944_v35  ;;  %v953_v45 = vadd.f32 %v898_v2, %v270_v40 }
  0x1a   : > { %714 = vpow2.f32 %v367_v29  ;;  %v272_v47 = vmul.f32 %v886_v0, %v233_v37  ;;  %v273_v52 = vmul.f32 %v886_v0, %v234_v41  ;;  %v962_v54 = vadd.f32 %v898_v2, %v271_v46 }
  0x1b   : > { %716 = vpow2.f32 %v369_v32  ;;  %v377_v50 = vmul.f32 1.442695, %v339_v43  ;;  %v379_v51 = vmul.f32 1.442695, %v340_v44  ;;  %v341_v53 = vsub.f32 0.0, %v953_v45 }
  0x1c   : > { %718 = vpow2.f32 %v371_v38  ;;  %v965_v55 = vadd.f32 %v898_v2, %v272_v47  ;;  %v968_v56 = vadd.f32 %v898_v2, %v273_v52  ;;  %v274_v57 = vmul.f32 %v886_v0, %v235_v48  ;;  %v241_v38 = vld [vmem:[%s892_s23 + $0x90] sm:$0xff]  ;;  %v242_v48 = vld [vmem:[%s892_s23 + $0x98] sm:$0xff] }
  0x1d   : > { %720 = vpow2.f32 %v373_v39  ;;  %v275_v58 = vmul.f32 %v886_v0, %v236_v49  ;;  %v381_v60 = vmul.f32 1.442695, %v341_v53  ;;  %v342_v61 = vsub.f32 0.0, %v962_v54  ;;  %v243_v53 = vld [vmem:[%s892_s23 + $0xa0] sm:$0xff] }
  0x1e   : > { %722 = vpow2.f32 %v375_v42  ;;  %v343_v62 = vsub.f32 0.0, %v965_v55  ;;  %v344_v1 = vsub.f32 0.0, %v968_v56  ;;  %v978_v3 = vadd.f32 %v898_v2, %v274_v57  ;;  %v244_v57 = vld [vmem:[%s892_s23 + $0xa8] sm:$0xff] }
  0x1f   : > { %724 = vpow2.f32 %v377_v50  ;;  %v981_v4 = vadd.f32 %v898_v2, %v275_v58  ;;  %v383_v7 = vmul.f32 1.442695, %v342_v61  ;;  %v276_v9 = vmul.f32 %v886_v0, %v237_v59 }
  0x20   : > { %726 = vpow2.f32 %v379_v51  ;;  %v385_v8 = vmul.f32 1.442695, %v343_v62  ;;  %v387_v12 = vmul.f32 1.442695, %v344_v1  ;;  %v345_v13 = vsub.f32 0.0, %v978_v3  ;;  %v245_v62 = vld [vmem:[%s892_s23 + $0xb0] sm:$0xff] }
  0x21   : > { %728 = vpow2.f32 %v381_v60  ;;  %v346_v14 = vsub.f32 0.0, %v981_v4  ;;  %v277_v16 = vmul.f32 %v886_v0, %v238_v63  ;;  %v990_v18 = vadd.f32 %v898_v2, %v276_v9 }
  0x22   : > { %730 = vpow2.f32 %v383_v7  ;;  %v278_v19 = vmul.f32 %v886_v0, %v239_v5  ;;  %v279_v20 = vmul.f32 %v886_v0, %v240_v6  ;;  %v389_v26 = vmul.f32 1.442695, %v345_v13 }
  0x23   : > { %v713_v17 = vpop.eup %712  ;;  %732 = vpow2.f32 %v385_v8  ;;  %v994_v27 = vmul.f32 1.442695, %v346_v14  ;;  %v347_v30 = vsub.f32 0.0, %v990_v18  ;;  %v998_v31 = vadd.f32 %v898_v2, %v277_v16 }
  0x24   : > { %v715_v23 = vpop.eup %714  ;;  %v429_v25 = vadd.f32 1.0, %v713_v17  ;;  %734 = vpow2.f32 %v387_v12  ;;  %v1001_v36 = vadd.f32 %v898_v2, %v278_v19  ;;  %v1004_v37 = vadd.f32 %v898_v2, %v279_v20 }
  0x25   : > { %v717_v28 = vpop.eup %716  ;;  %v430_v29 = vadd.f32 1.0, %v715_v23  ;;  %v1007_v41 = vmul.f32 1.442695, %v347_v30  ;;  %v348_v42 = vsub.f32 0.0, %v998_v31  ;;  %v280_v52 = vmul.f32 %v886_v0, %v241_v38 }
  0x26   : > { %v719_v32 = vpop.eup %718  ;;  %736 = vrcp.f32 %v429_v25  ;;  %v431_v33 = vadd.f32 1.0, %v717_v28  ;;  %v349_v46 = vsub.f32 0.0, %v1001_v36  ;;  %v350_v47 = vsub.f32 0.0, %v1004_v37 }
  0x27   : > { %v721_v39 = vpop.eup %720  ;;  %738 = vrcp.f32 %v430_v29  ;;  %v432_v40 = vadd.f32 1.0, %v719_v32  ;;  %v1013_v51 = vmul.f32 1.442695, %v348_v42  ;;  %v1024_v5 = vadd.f32 %v898_v2, %v280_v52 }
  0x28   : > { %v723_v43 = vpop.eup %722  ;;  %740 = vrcp.f32 %v431_v33  ;;  %v433_v44 = vadd.f32 1.0, %v721_v39  ;;  %v1018_v60 = vmul.f32 1.442695, %v349_v46  ;;  %v1020_v61 = vmul.f32 1.442695, %v350_v47  ;;  %v525_v33 = vld [vmem:[%s1033_s28] sm:$0xff] }
  0x29   : > { %v725_v49 = vpop.eup %724  ;;  %742 = vrcp.f32 %v432_v40  ;;  %v434_v50 = vadd.f32 1.0, %v723_v43  ;;  %v281_v6 = vmul.f32 %v886_v0, %v242_v48  ;;  %v282_v8 = vmul.f32 %v886_v0, %v243_v53  ;;  %v246_v47 = vld [vmem:[%s892_s23 + $0xb8] sm:$0xff] }
  0x2a   : > { %v727_v58 = vpop.eup %726  ;;  %744 = vrcp.f32 %v433_v44  ;;  %v435_v59 = vadd.f32 1.0, %v725_v49  ;;  %v283_v9 = vmul.f32 %v886_v0, %v244_v57  ;;  %v351_v13 = vsub.f32 0.0, %v1024_v5  ;;  %v526_v44 = vld [vmem:[%s1033_s28 + $0x8] sm:$0xff] }
  0x2b   : > { %v729_v63 = vpop.eup %728  ;;  %746 = vrcp.f32 %v434_v50  ;;  %v436_v1 = vadd.f32 1.0, %v727_v58  ;;  %v1037_v14 = vadd.f32 %v898_v2, %v281_v6  ;;  %v284_v16 = vmul.f32 %v886_v0, %v245_v62  ;;  %v527_v50 = vld [vmem:[%s1033_s28 + $0x10] sm:$0xff]  ;;  %v529_v6 = vld [vmem:[%s1033_s28 + $0x20] sm:$0xff] }
  0x2c   : > { %748 = vrcp.f32 %v435_v59  ;;  %v437_v7 = vadd.f32 1.0, %v729_v63  ;;  %v731_v12 = vpop.eup %730  ;;  %v1041_v20 = vadd.f32 %v898_v2, %v282_v8  ;;  %v1044_v23 = vadd.f32 %v898_v2, %v283_v9  ;;  %v528_v59 = vld [vmem:[%s1033_s28 + $0x18] sm:$0xff]  ;;  %v247_v8 = vld [vmem:[%s892_s23 + $0xc0] sm:$0xff] }
  0x2d   : > { %750 = vrcp.f32 %v436_v1  ;;  %v733_v17 = vpop.eup %732  ;;  %v438_v19 = vadd.f32 1.0, %v731_v12  ;;  %v401_v29 = vmul.f32 1.442695, %v351_v13  ;;  %v352_v30 = vsub.f32 0.0, %v1037_v14  ;;  %v530_v12 = vld [vmem:[%s1033_s28 + $0x28] sm:$0xff] }
  0x2e   : > { %752 = vrcp.f32 %v437_v7  ;;  %v735_v25 = vpop.eup %734  ;;  %v439_v28 = vadd.f32 1.0, %v733_v17  ;;  %v353_v39 = vsub.f32 0.0, %v1041_v20  ;;  %v354_v40 = vsub.f32 0.0, %v1044_v23  ;;  %v531_v17 = vld [vmem:[%s1033_s28 + $0x30] sm:$0xff] }
  0x2f   : > { %754 = vpow2.f32 %v389_v26  ;;  %v440_v38 = vadd.f32 1.0, %v735_v25  ;;  %v403_v26 = vmul.f32 1.442695, %v352_v30  ;;  %v1053_v46 = vadd.f32 %v898_v2, %v284_v16 }
  0x30   : > { %v737_v32 = vpop.eup %736  ;;  %756 = vrcp.f32 %v438_v19  ;;  %v407_v52 = vmul.f32 1.442695, %v354_v40  ;;  %v285_v7 = vmul.f32 %v886_v0, %v246_v47  ;;  %v286_v30 = vmul.f32 %v886_v0, %v247_v8 }
  0x31   : > { %v739_v42 = vpop.eup %738  ;;  %v493_v43 = vmul.f32 %v737_v32, %v908_v10  ;;  %758 = vrcp.f32 %v439_v28  ;;  %v405_v10 = vmul.f32 1.442695, %v353_v39  ;;  %v355_v62 = vsub.f32 0.0, %v1053_v46  ;;  %v532_v28 = vld [vmem:[%s1033_s28 + $0x38] sm:$0xff] }
  0x32   : > { %v741_v48 = vpop.eup %740  ;;  %v494_v49 = vmul.f32 %v739_v42, %v911_v11  ;;  %760 = vrcp.f32 %v440_v38  ;;  %v1082_v19 = vadd.f32 %v898_v2, %v285_v7  ;;  %v1096_v40 = vadd.f32 %v898_v2, %v286_v30  ;;  %v248_v42 = vld [vmem:[%s892_s23 + $0xc8] sm:$0xff] }
  0x33   : > { %v743_v53 = vpop.eup %742  ;;  %v557_v57 = vadd.f32 %v525_v33, %v493_v43  ;;  %v495_v58 = vmul.f32 %v741_v48, %v917_v15  ;;  %762 = vpow2.f32 %v994_v27  ;;  %v409_v13 = vmul.f32 1.442695, %v355_v62  ;;  %v533_v33 = vld [vmem:[%s1033_s28 + $0x40] sm:$0xff]  ;;  %v249_v43 = vld [vmem:[%s892_s23 + $0xd0] sm:$0xff] }
  0x34   : > { %v745_v63 = vpop.eup %744  ;;  %v558_v1 = vadd.f32 %v526_v44, %v494_v49  ;;  %v496_v11 = vmul.f32 %v743_v53, %v925_v21  ;;  %764 = vpow2.f32 %v1007_v41  ;;  %v356_v38 = vsub.f32 0.0, %v1082_v19 }
  0x35   : > { %v747_v9 = vpop.eup %746  ;;  %589 = vst [vmem:[%s1060_s5] sm:$0xff] %v557_v57  ;;  %v559_v15 = vadd.f32 %v527_v50, %v495_v58  ;;  %v497_v27 = vmul.f32 %v745_v63, %v928_v22  ;;  %766 = vpow2.f32 %v1013_v51  ;;  %v535_v50 = vld [vmem:[%s1033_s28 + $0x50] sm:$0xff]  ;;  %v357_v53 = vsub.f32 0.0, %v1096_v40 }
  0x36   : > { %v749_v21 = vpop.eup %748  ;;  %590 = vst [vmem:[%s1060_s5 + $0x8] sm:$0xff] %v558_v1  ;;  %v560_v16 = vadd.f32 %v528_v59, %v496_v11  ;;  %v498_v41 = vmul.f32 %v747_v9, %v932_v24  ;;  %768 = vpow2.f32 %v1018_v60  ;;  %v411_v48 = vmul.f32 1.442695, %v356_v38  ;;  %v536_v59 = vld [vmem:[%s1033_s28 + $0x58] sm:$0xff]  ;;  %v251_v9 = vld [vmem:[%s892_s23 + $0xe0] sm:$0xff] }
  0x37   : > { %v751_v25 = vpop.eup %750  ;;  %591 = vst [vmem:[%s1060_s5 + $0x10] sm:$0xff] %v559_v15  ;;  %v561_v22 = vadd.f32 %v529_v6, %v497_v27  ;;  %v499_v51 = vmul.f32 %v749_v21, %v941_v34  ;;  %770 = vpow2.f32 %v1020_v61  ;;  %v288_v62 = vmul.f32 %v886_v0, %v249_v43  ;;  %v250_v11 = vld [vmem:[%s892_s23 + $0xd8] sm:$0xff] }
  0x38   : > { %v753_v24 = vpop.eup %752  ;;  %592 = vst [vmem:[%s1060_s5 + $0x18] sm:$0xff] %v560_v16  ;;  %v562_v60 = vadd.f32 %v530_v12, %v498_v41  ;;  %v500_v32 = vmul.f32 %v751_v25, %v944_v35  ;;  %772 = vpow2.f32 %v401_v29  ;;  %v534_v29 = vld [vmem:[%s1033_s28 + $0x48] sm:$0xff]  ;;  %v289_v41 = vmul.f32 %v886_v0, %v250_v11 }
  0x39   : > { %v755_v39 = vpop.eup %754  ;;  %593 = vst [vmem:[%s1060_s5 + $0x20] sm:$0xff] %v561_v22  ;;  %v563_v34 = vadd.f32 %v531_v17, %v499_v51  ;;  %v501_v61 = vmul.f32 %v753_v24, %v953_v45  ;;  %774 = vpow2.f32 %v403_v26  ;;  %v290_v51 = vmul.f32 %v886_v0, %v251_v9 }
  0x3a   : > { %v757_v44 = vpop.eup %756  ;;  %594 = vst [vmem:[%s1060_s5 + $0x28] sm:$0xff] %v562_v60  ;;  %v564_v35 = vadd.f32 %v532_v28, %v500_v32  ;;  %v441_v47 = vadd.f32 1.0, %v755_v39  ;;  %776 = vpow2.f32 %v405_v10  ;;  %v287_v10 = vmul.f32 %v886_v0, %v248_v42  ;;  %v252_v28 = vld [vmem:[%s892_s23 + $0xe8] sm:$0xff]  ;;  %v253_v32 = vld [vmem:[%s892_s23 + $0xf0] sm:$0xff] }
  0x3b   : > { %v759_v49 = vpop.eup %758  ;;  %595 = vst [vmem:[%s1060_s5 + $0x30] sm:$0xff] %v563_v34  ;;  %v565_v45 = vadd.f32 %v533_v33, %v501_v61  ;;  %v502_v26 = vmul.f32 %v757_v44, %v962_v54  ;;  %778 = vpow2.f32 %v407_v52  ;;  %v413_v52 = vmul.f32 1.442695, %v357_v53 }
  0x3c   : > { %v761_v57 = vpop.eup %760  ;;  %596 = vst [vmem:[%s1060_s5 + $0x38] sm:$0xff] %v564_v35  ;;  %v503_v58 = vmul.f32 %v759_v49, %v965_v55  ;;  %780 = vrcp.f32 %v441_v47  ;;  %v1115_v8 = vadd.f32 %v898_v2, %v287_v10  ;;  %v1130_v60 = vadd.f32 %v898_v2, %v289_v41 }
  0x3d   : > { %v763_v63 = vpop.eup %762  ;;  %597 = vst [vmem:[%s1060_s5 + $0x40] sm:$0xff] %v565_v45  ;;  %v566_v54 = vadd.f32 %v534_v29, %v502_v26  ;;  %v504_v1 = vmul.f32 %v761_v57, %v968_v56  ;;  %782 = vpow2.f32 %v409_v13  ;;  %v1120_v56 = vadd.f32 %v898_v2, %v288_v62  ;;  %v537_v45 = vld [vmem:[%s1033_s28 + $0x60] sm:$0xff] }
  0x3e   : > { %v765_v6 = vpop.eup %764  ;;  %v567_v7 = vadd.f32 %v535_v50, %v503_v58  ;;  %v442_v55 = vadd.f32 1.0, %v763_v63  ;;  %784 = vpow2.f32 %v411_v48  ;;  %v358_v16 = vsub.f32 0.0, %v1115_v8  ;;  %v254_v48 = vld [vmem:[%s892_s23 + $0xf8] sm:$0xff] }
  0x3f   : > { %v767_v15 = vpop.eup %766  ;;  %598 = vst [vmem:[%s1060_s5 + $0x48] sm:$0xff] %v566_v54  ;;  %v568_v27 = vadd.f32 %v536_v59, %v504_v1  ;;  %v443_v12 = vadd.f32 1.0, %v765_v6  ;;  %786 = vpow2.f32 %v413_v52  ;;  %v359_v22 = vsub.f32 0.0, %v1120_v56 }
  0x40   : > { %v769_v13 = vpop.eup %768  ;;  %599 = vst [vmem:[%s1060_s5 + $0x50] sm:$0xff] %v567_v7  ;;  %788 = vrcp.f32 %v442_v55  ;;  %v444_v21 = vadd.f32 1.0, %v767_v15  ;;  %v1134_v39 = vadd.f32 %v898_v2, %v290_v51  ;;  %v415_v42 = vmul.f32 1.442695, %v358_v16  ;;  %v538_v55 = vld [vmem:[%s1033_s28 + $0x68] sm:$0xff] }
  0x41   : > { %v771_v17 = vpop.eup %770  ;;  %600 = vst [vmem:[%s1060_s5 + $0x58] sm:$0xff] %v568_v27  ;;  %790 = vrcp.f32 %v443_v12  ;;  %v445_v25 = vadd.f32 1.0, %v769_v13  ;;  %v291_v43 = vmul.f32 %v886_v0, %v252_v28  ;;  %v417_v29 = vmul.f32 1.442695, %v359_v22  ;;  %v539_v13 = vld [vmem:[%s1033_s28 + $0x70] sm:$0xff] }
  0x42   : > { %v773_v30 = vpop.eup %772  ;;  %792 = vrcp.f32 %v444_v21  ;;  %v446_v24 = vadd.f32 1.0, %v771_v17  ;;  %v292_v47 = vmul.f32 %v886_v0, %v253_v32  ;;  %v360_v50 = vsub.f32 0.0, %v1130_v60  ;;  %v540_v17 = vld [vmem:[%s1033_s28 + $0x78] sm:$0xff] }
  0x43   : > { %v775_v33 = vpop.eup %774  ;;  %794 = vrcp.f32 %v445_v25  ;;  %v447_v38 = vadd.f32 1.0, %v773_v30  ;;  %v1142_v53 = vadd.f32 %v898_v2, %v291_v43  ;;  %v361_v59 = vsub.f32 0.0, %v1134_v39  ;;  %v541_v30 = vld [vmem:[%s1033_s28 + $0x80] sm:$0xff] }
  0x44   : > { %v777_v34 = vpop.eup %776  ;;  %796 = vrcp.f32 %v446_v24  ;;  %v448_v61 = vadd.f32 1.0, %v775_v33  ;;  %v1147_v10 = vadd.f32 %v898_v2, %v292_v47  ;;  %v293_v1 = vmul.f32 %v886_v0, %v254_v48  ;;  %v542_v33 = vld [vmem:[%s1033_s28 + $0x88] sm:$0xff] }
  0x45   : > { %v779_v44 = vpop.eup %778  ;;  %798 = vrcp.f32 %v447_v38  ;;  %v449_v35 = vadd.f32 1.0, %v777_v34  ;;  %v362_v54 = vsub.f32 0.0, %v1142_v53  ;;  %v419_v15 = vmul.f32 1.442695, %v360_v50 }
  0x46   : > { %v781_v49 = vpop.eup %780  ;;  %800 = vrcp.f32 %v448_v61  ;;  %v450_v26 = vadd.f32 1.0, %v779_v44  ;;  %v1154_v27 = vadd.f32 %v898_v2, %v293_v1  ;;  %v421_v21 = vmul.f32 1.442695, %v361_v59 }
  0x47   : > { %v783_v57 = vpop.eup %782  ;;  %v505_v58 = vmul.f32 %v781_v49, %v978_v3  ;;  %802 = vrcp.f32 %v449_v35  ;;  %v363_v3 = vsub.f32 0.0, %v1147_v10  ;;  %v423_v25 = vmul.f32 1.442695, %v362_v54 }
  0x48   : > { %v785_v62 = vpop.eup %784  ;;  %804 = vrcp.f32 %v450_v26  ;;  %v451_v63 = vadd.f32 1.0, %v783_v57  ;;  %v364_v22 = vsub.f32 0.0, %v1154_v27 }
  0x49   : > { %v787_v52 = vpop.eup %786  ;;  %v569_v11 = vadd.f32 %v537_v45, %v505_v58  ;;  %v452_v6 = vadd.f32 1.0, %v785_v62  ;;  %806 = vpow2.f32 %v415_v42  ;;  %v547_v62 = vld [vmem:[%s1033_s28 + $0xb0] sm:$0xff] }
  0x4a   : > { %v789_v7 = vpop.eup %788  ;;  %808 = vrcp.f32 %v451_v63  ;;  %v453_v9 = vadd.f32 1.0, %v787_v52  ;;  %v427_v38 = vmul.f32 1.442695, %v364_v22  ;;  %v548_v52 = vld [vmem:[%s1033_s28 + $0xb8] sm:$0xff] }
  0x4b   : > { %v791_v12 = vpop.eup %790  ;;  %601 = vst [vmem:[%s1060_s5 + $0x60] sm:$0xff] %v569_v11  ;;  %v506_v0 = vmul.f32 %v789_v7, %v981_v4  ;;  %810 = vrcp.f32 %v452_v6  ;;  %v425_v4 = vmul.f32 1.442695, %v363_v3  ;;  %v549_v3 = vld [vmem:[%s1033_s28 + $0xc0] sm:$0xff] }
  0x4c   : > { %v793_v16 = vpop.eup %792  ;;  %v507_v41 = vmul.f32 %v791_v12, %v990_v18  ;;  %812 = vrcp.f32 %v453_v9 }
  0x4d   : > { %v795_v2 = vpop.eup %794  ;;  %v570_v51 = vadd.f32 %v538_v55, %v506_v0  ;;  %v508_v28 = vmul.f32 %v793_v16, %v998_v31  ;;  %814 = vpow2.f32 %v417_v29  ;;  %v543_v31 = vld [vmem:[%s1033_s28 + $0x90] sm:$0xff] }
  0x4e   : > { %v797_v24 = vpop.eup %796  ;;  %v571_v32 = vadd.f32 %v539_v13, %v507_v41  ;;  %v509_v18 = vmul.f32 %v795_v2, %v1001_v36  ;;  %816 = vpow2.f32 %v419_v15  ;;  %v544_v36 = vld [vmem:[%s1033_s28 + $0x98] sm:$0xff]  ;;  %v550_v2 = vld [vmem:[%s1033_s28 + $0xc8] sm:$0xff] }
  0x4f   : > { %v799_v34 = vpop.eup %798  ;;  %602 = vst [vmem:[%s1060_s5 + $0x68] sm:$0xff] %v570_v51  ;;  %v572_v61 = vadd.f32 %v540_v17, %v508_v28  ;;  %v510_v42 = vmul.f32 %v797_v24, %v1004_v37  ;;  %818 = vpow2.f32 %v421_v21  ;;  %v545_v37 = vld [vmem:[%s1033_s28 + $0xa0] sm:$0xff] }
  0x50   : > { %v801_v43 = vpop.eup %800  ;;  %603 = vst [vmem:[%s1060_s5 + $0x70] sm:$0xff] %v571_v32  ;;  %v573_v44 = vadd.f32 %v541_v30, %v509_v18  ;;  %v511_v35 = vmul.f32 %v799_v34, %v1024_v5  ;;  %820 = vpow2.f32 %v423_v25  ;;  %v546_v5 = vld [vmem:[%s1033_s28 + $0xa8] sm:$0xff]  ;;  %v552_v18 = vld [vmem:[%s1033_s28 + $0xd8] sm:$0xff]  ;;  %v553_v34 = vld [vmem:[%s1033_s28 + $0xe0] sm:$0xff] }
  0x51   : > { %v803_v29 = vpop.eup %802  ;;  %604 = vst [vmem:[%s1060_s5 + $0x78] sm:$0xff] %v572_v61  ;;  %v574_v47 = vadd.f32 %v542_v33, %v510_v42  ;;  %v512_v48 = vmul.f32 %v801_v43, %v1037_v14  ;;  %822 = vpow2.f32 %v425_v4  ;;  %v551_v4 = vld [vmem:[%s1033_s28 + $0xd0] sm:$0xff] }
  0x52   : > { %v805_v49 = vpop.eup %804  ;;  %605 = vst [vmem:[%s1060_s5 + $0x80] sm:$0xff] %v573_v44  ;;  %v575_v45 = vadd.f32 %v543_v31, %v511_v35  ;;  %v513_v26 = vmul.f32 %v803_v29, %v1041_v20  ;;  %824 = vpow2.f32 %v427_v38  ;;  %v554_v31 = vld [vmem:[%s1033_s28 + $0xe8] sm:$0xff]  ;;  %v555_v35 = vld [vmem:[%s1033_s28 + $0xf0] sm:$0xff] }
  0x53   : > { %v807_v50 = vpop.eup %806  ;;  %606 = vst [vmem:[%s1060_s5 + $0x88] sm:$0xff] %v574_v47  ;;  %v576_v57 = vadd.f32 %v544_v36, %v512_v48  ;;  %v514_v58 = vmul.f32 %v805_v49, %v1044_v23  ;;  %v556_v47 = vld [vmem:[%s1033_s28 + $0xf8] sm:$0xff] }
  0x54   : > { %v809_v14 = vpop.eup %808  ;;  %607 = vst [vmem:[%s1060_s5 + $0x90] sm:$0xff] %v575_v45  ;;  %v577_v59 = vadd.f32 %v545_v37, %v513_v26  ;;  %v454_v63 = vadd.f32 1.0, %v807_v50 }
  0x55   : > { %v811_v54 = vpop.eup %810  ;;  %608 = vst [vmem:[%s1060_s5 + $0x98] sm:$0xff] %v576_v57  ;;  %v578_v1 = vadd.f32 %v546_v5, %v514_v58  ;;  %v515_v20 = vmul.f32 %v809_v14, %v1053_v46 }
  0x56   : > { %v813_v11 = vpop.eup %812  ;;  %609 = vst [vmem:[%s1060_s5 + $0xa0] sm:$0xff] %v577_v59  ;;  %v516_v6 = vmul.f32 %v811_v54, %v1082_v19  ;;  %826 = vrcp.f32 %v454_v63 }
  0x57   : > { %v815_v23 = vpop.eup %814  ;;  %610 = vst [vmem:[%s1060_s5 + $0xa8] sm:$0xff] %v578_v1  ;;  %v579_v7 = vadd.f32 %v547_v62, %v515_v20  ;;  %v517_v55 = vmul.f32 %v813_v11, %v1096_v40 }
  0x58   : > { %v817_v9 = vpop.eup %816  ;;  %v580_v15 = vadd.f32 %v548_v52, %v516_v6  ;;  %v455_v12 = vadd.f32 1.0, %v815_v23 }
  0x59   : > { %v819_v0 = vpop.eup %818  ;;  %611 = vst [vmem:[%s1060_s5 + $0xb0] sm:$0xff] %v579_v7  ;;  %v581_v46 = vadd.f32 %v549_v3, %v517_v55  ;;  %v456_v13 = vadd.f32 1.0, %v817_v9 }
  0x5a   : > { %v821_v21 = vpop.eup %820  ;;  %612 = vst [vmem:[%s1060_s5 + $0xb8] sm:$0xff] %v580_v15  ;;  %828 = vrcp.f32 %v455_v12  ;;  %v457_v19 = vadd.f32 1.0, %v819_v0 }
  0x5b   : > { %v823_v16 = vpop.eup %822  ;;  %613 = vst [vmem:[%s1060_s5 + $0xc0] sm:$0xff] %v581_v46  ;;  %830 = vrcp.f32 %v456_v13  ;;  %v458_v41 = vadd.f32 1.0, %v821_v21 }
  0x5c   : > { %v825_v17 = vpop.eup %824  ;;  %832 = vrcp.f32 %v457_v19  ;;  %v459_v40 = vadd.f32 1.0, %v823_v16 }
  0x5d   : > { %834 = vrcp.f32 %v458_v41  ;;  %v460_v25 = vadd.f32 1.0, %v825_v17 }
  0x5e   : > { %836 = vrcp.f32 %v459_v40 }
  0x5f   : > { %838 = vrcp.f32 %v460_v25 }
  0x60   : > { %v827_v22 = vpop.eup %826 }
  0x61   : > { %v518_v51 = vmul.f32 %v827_v22, %v1115_v8 }
  0x63   : > { %v582_v28 = vadd.f32 %v550_v2, %v518_v51 }
  0x64   : > { %v829_v30 = vpop.eup %828 }
  0x65   : > { %v831_v24 = vpop.eup %830  ;;  %614 = vst [vmem:[%s1060_s5 + $0xc8] sm:$0xff] %v582_v28  ;;  %v519_v32 = vmul.f32 %v829_v30, %v1120_v56 }
  0x66   : > { %v833_v33 = vpop.eup %832  ;;  %v520_v38 = vmul.f32 %v831_v24, %v1130_v60 }
  0x67   : > { %v835_v61 = vpop.eup %834  ;;  %v583_v42 = vadd.f32 %v551_v4, %v519_v32  ;;  %v521_v8 = vmul.f32 %v833_v33, %v1134_v39 }
  0x68   : > { %v837_v43 = vpop.eup %836  ;;  %v584_v44 = vadd.f32 %v552_v18, %v520_v38  ;;  %v522_v56 = vmul.f32 %v835_v61, %v1142_v53 }
  0x69   : > { %v839_v36 = vpop.eup %838  ;;  %615 = vst [vmem:[%s1060_s5 + $0xd0] sm:$0xff] %v583_v42  ;;  %v585_v29 = vadd.f32 %v553_v34, %v521_v8  ;;  %v523_v60 = vmul.f32 %v837_v43, %v1147_v10 }
  0x6a   : > { %616 = vst [vmem:[%s1060_s5 + $0xd8] sm:$0xff] %v584_v44  ;;  %v586_v48 = vadd.f32 %v554_v31, %v522_v56  ;;  %v524_v37 = vmul.f32 %v839_v36, %v1154_v27 }
  0x6b   : > { %617 = vst [vmem:[%s1060_s5 + $0xe0] sm:$0xff] %v585_v29  ;;  %v587_v39 = vadd.f32 %v555_v35, %v523_v60 }
  0x6c   : > { %618 = vst [vmem:[%s1060_s5 + $0xe8] sm:$0xff] %v586_v48  ;;  %v588_v49 = vadd.f32 %v556_v47, %v524_v37 }
  0x6d   : > { %619 = vst [vmem:[%s1060_s5 + $0xf0] sm:$0xff] %v587_v39 }
  0x6e   : > { %620 = vst [vmem:[%s1060_s5 + $0xf8] sm:$0xff] %v588_v49 }
  0x6f PF: > { %s14_s15 = sadd.s32 1, %s846_s15  }
  0x70   : > { %p11_p4 = scmp.ge.s32.totalorder %s14_s15, 4  }
  0x72   :  { %13 = sbr.rel (!%p11_p4) target bundleno = 1 (0x1), region = 69 }

</bundles_post_ra>
